<compile_context>
chip_gen: v5e
topology: v5e:2x2
jax: 0.10.0
libtpu: 0.0.40
codegen_flags: <defaults>
</compile_context>

<pallas_src>
import functools

import numpy as np
import jax
import jax.numpy as jnp
from jax import lax
from jax.experimental import pallas as pl
from jax.experimental.pallas import tpu as pltpu


# ----------------------------------------------------------------------------
# Parameter setup (plain JAX / numpy glue, input-independent)
# ----------------------------------------------------------------------------
def convT_unroll(W, Hin, Win, stride, pad):
    """Unroll a ConvTranspose2d weight (Cin, Cout, K, K) into a dense matrix.

    out_flat[n, co*Hout*Wout + oh*Wout + ow] =
        sum_row x_flat[n, ci*Hin*Win + ih*Win + iw] * M[row, col]
    with oh = ih*stride - pad + kh, ow = iw*stride - pad + kw.
    """
    Cin, Cout, K, _ = W.shape
    Hout = (Hin - 1) * stride - 2 * pad + K
    Wout = (Win - 1) * stride - 2 * pad + K
    M = np.zeros((Cin, Hin, Win, Cout, Hout, Wout), dtype=np.float32)
    for ih in range(Hin):
        for kh in range(K):
            oh = ih * stride - pad + kh
            if not (0 <= oh < Hout):
                continue
            for iw in range(Win):
                for kw in range(K):
                    ow = iw * stride - pad + kw
                    if not (0 <= ow < Wout):
                        continue
                    M[:, ih, iw, :, oh, ow] = W[:, :, kh, kw]
    return M.reshape(Cin * Hin * Win, Cout * Hout * Wout), Hout, Wout


def channel_select(C, S):
    """Sel[c*S + s, c] = 1  — sums/broadcasts per-channel column groups."""
    return np.kron(np.eye(C, dtype=np.float32), np.ones((S, 1), dtype=np.float32))


# ----------------------------------------------------------------------------
# Pallas kernel: convT(matmul) -> BN -> ReLU -> convT -> BN -> ReLU -> convT -> tanh
# ----------------------------------------------------------------------------
def _gen_kernel(x_ref, m1_ref, g1_ref, b1_ref, s1_ref, s1t_ref,
                m2_ref, g2_ref, b2_ref, s2_ref, s2t_ref, m3_ref,
                out_ref, *, n_real, s1, s2, eps):
    f32 = jnp.float32
    bf16 = jnp.bfloat16
    npad = x_ref.shape[0]

    # Rows >= n_real are zero padding; keep them zero so they never contribute
    # to BatchNorm batch statistics (no conv bias => zero rows stay zero).
    if n_real < npad:
        row = lax.broadcasted_iota(jnp.int32, (npad, 1), 0)
        row_mask = (row < n_real).astype(f32)
    else:
        row_mask = None

    def bn_relu(h, sel, selt, gamma, beta, spatial):
        # Training-mode BatchNorm2d: batch statistics over (N, H, W), biased var.
        denom = float(n_real * spatial)
        col_sum = jnp.sum(h, axis=0, keepdims=True)            # (1, C*S)
        col_sumsq = jnp.sum(h * h, axis=0, keepdims=True)      # (1, C*S)
        moments = jnp.concatenate([col_sum, col_sumsq], axis=0)  # (2, C*S)
        ch = jnp.dot(moments, sel, preferred_element_type=f32) / denom  # (2, C)
        mean = ch[0:1, :]
        var = jnp.maximum(ch[1:2, :] - mean * mean, 0.0)        # clamp cancellation
        inv = lax.rsqrt(var + eps)
        scale = gamma * inv                                     # (1, C)
        shift = beta - mean * scale                             # (1, C)
        affine = jnp.concatenate([scale, shift], axis=0)        # (2, C)
        # Broadcast per-channel affine back to the (1, C*S) column layout.
        affine_b = jnp.dot(affine, selt, preferred_element_type=f32)  # (2, C*S)
        y = jnp.maximum(h * affine_b[0:1, :] + affine_b[1:2, :], 0.0)
        if row_mask is not None:
            y = y * row_mask
        return y

    # Big matmuls: bf16 operands (native MXU), f32 accumulate.
    x = x_ref[...].astype(bf16)                                           # (N, Zd)
    h1 = jnp.dot(x, m1_ref[...], preferred_element_type=f32)
    h1 = bn_relu(h1, s1_ref[...], s1t_ref[...], g1_ref[...], b1_ref[...], s1)
    h2 = jnp.dot(h1.astype(bf16), m2_ref[...], preferred_element_type=f32)
    h2 = bn_relu(h2, s2_ref[...], s2t_ref[...], g2_ref[...], b2_ref[...], s2)
    h3 = jnp.dot(h2.astype(bf16), m3_ref[...], preferred_element_type=f32)
    out_ref[...] = jnp.tanh(h3)


def generator_pallas(x_flat, m1, g1, b1, sel1, sel1t,
                     m2, g2, b2, sel2, sel2t, m3, *, eps=1e-5):
    n_real = x_flat.shape[0]
    npad = int(-(-n_real // 8) * 8)           # pad batch to a sublane multiple
    if npad != n_real:
        x_flat = jnp.pad(x_flat, ((0, npad - n_real), (0, 0)))

    s1 = sel1.shape[0] // sel1.shape[1]
    s2 = sel2.shape[0] // sel2.shape[1]
    out_cols = m3.shape[1]

    # Tile the last (largest) matmul's output columns: 2 parallel tiles -> one
    # per v7x TensorCore; pipelines the M3 weight stream everywhere else.
    n_tiles = 2 if out_cols % 256 == 0 else 1
    tile = out_cols // n_tiles

    kern = functools.partial(_gen_kernel, n_real=n_real, s1=s1, s2=s2, eps=eps)

    def full2d(a):
        # Whole-array block, same block for every grid step (loaded once).
        return pl.BlockSpec(a.shape, lambda j: (0, 0))

    out = pl.pallas_call(
        kern,
        out_shape=jax.ShapeDtypeStruct((npad, out_cols), jnp.float32),
        grid=(n_tiles,),
        in_specs=[full2d(x_flat),
                  full2d(m1), full2d(g1), full2d(b1), full2d(sel1), full2d(sel1t),
                  full2d(m2), full2d(g2), full2d(b2), full2d(sel2), full2d(sel2t),
                  pl.BlockSpec((m3.shape[0], tile), lambda j: (0, j))],
        out_specs=pl.BlockSpec((npad, tile), lambda j: (0, j)),
        compiler_params=pltpu.CompilerParams(
            dimension_semantics=("parallel",)),
    )(x_flat, m1, g1, b1, sel1, sel1t, m2, g2, b2, sel2, sel2t, m3)
    return out[:n_real]


# ----------------------------------------------------------------------------
# Pure-JAX reference (mirrors the PyTorch module semantics, full f32)
# ----------------------------------------------------------------------------
def reference_forward(x, W1, gamma1, beta1, W2, gamma2, beta2, W3, eps=1e-5):
    hp = lax.Precision.HIGHEST

    def convT(h, W, stride, pad):
        K = W.shape[2]
        Wf = jnp.transpose(W, (1, 0, 2, 3))[:, :, ::-1, ::-1]  # (Cout, Cin, K, K)
        return lax.conv_general_dilated(
            h, Wf, window_strides=(1, 1),
            padding=[(K - 1 - pad, K - 1 - pad)] * 2,
            lhs_dilation=(stride, stride),
            dimension_numbers=('NCHW', 'OIHW', 'NCHW'),
            precision=hp)

    def bn_relu(h, gamma, beta):
        mean = jnp.mean(h, axis=(0, 2, 3), keepdims=True)
        var = jnp.mean(h * h, axis=(0, 2, 3), keepdims=True) - mean * mean
        y = (h - mean) * lax.rsqrt(var + eps)
        y = y * gamma[None, :, None, None] + beta[None, :, None, None]
        return jnp.maximum(y, 0.0)

    h = bn_relu(convT(x, W1, 1, 0), gamma1, beta1)
    h = bn_relu(convT(h, W2, 2, 1), gamma2, beta2)
    return jnp.tanh(convT(h, W3, 2, 1))


# ----------------------------------------------------------------------------
if __name__ == "__main__":
    # Small shapes consistent with the module: Generator(latent_dim=16,
    # img_channels=3, feature_map_size=4) applied to (N, latent_dim, 1, 1).
    latent_dim, img_channels, fm = 16, 3, 4
    C1, C2 = fm * 8, fm * 4          # 32, 16
    N = 2

    key = jax.random.PRNGKey(0)
    k = jax.random.split(key, 8)
    x = jax.random.normal(k[0], (N, latent_dim, 1, 1), jnp.float32)
    W1 = 0.1 * jax.random.normal(k[1], (latent_dim, C1, 4, 4), jnp.float32)
    W2 = 0.1 * jax.random.normal(k[2], (C1, C2, 4, 4), jnp.float32)
    W3 = 0.1 * jax.random.normal(k[3], (C2, img_channels, 4, 4), jnp.float32)
    gamma1 = 1.0 + 0.1 * jax.random.normal(k[4], (C1,), jnp.float32)
    beta1 = 0.1 * jax.random.normal(k[5], (C1,), jnp.float32)
    gamma2 = 1.0 + 0.1 * jax.random.normal(k[6], (C2,), jnp.float32)
    beta2 = 0.1 * jax.random.normal(k[7], (C2,), jnp.float32)

    # Unrolled conv-transpose matrices + channel-selection matrices (setup).
    M1, H1, _ = convT_unroll(np.asarray(W1), 1, 1, 1, 0)     # 1x1  -> 4x4
    M2, H2, _ = convT_unroll(np.asarray(W2), H1, H1, 2, 1)   # 4x4  -> 8x8
    M3, H3, _ = convT_unroll(np.asarray(W3), H2, H2, 2, 1)   # 8x8  -> 16x16
    Sel1 = channel_select(C1, H1 * H1)
    Sel2 = channel_select(C2, H2 * H2)

    x_flat = x.reshape(N, latent_dim)
    out_flat = generator_pallas(
        x_flat,
        jnp.asarray(M1, dtype=jnp.bfloat16), gamma1[None, :], beta1[None, :],
        jnp.asarray(Sel1), jnp.asarray(Sel1.T),
        jnp.asarray(M2, dtype=jnp.bfloat16), gamma2[None, :], beta2[None, :],
        jnp.asarray(Sel2), jnp.asarray(Sel2.T),
        jnp.asarray(M3, dtype=jnp.bfloat16))
    out = out_flat.reshape(N, img_channels, H3, H3)
    out = jax.block_until_ready(out)

    ref = jax.block_until_ready(
        reference_forward(x, W1, gamma1, beta1, W2, gamma2, beta2, W3))

    assert out.shape == (N, img_channels, 16, 16)
    # Tolerance reflects bf16 weight quantization + default (single-pass bf16)
    # MXU precision; structural equivalence to the module was verified at
    # f32/HIGHEST in the previous revision with 3e-3.
    np.testing.assert_allclose(np.asarray(out), np.asarray(ref),
                               atol=2e-2, rtol=2e-2)
    print("KERNEL_OK")
</pallas_src>

<mosaic_0001>
module attributes {stable_mosaic.version = 11 : i64} {
  func.func @_gen_kernel(%arg0: i32, %arg1: memref<8x16xf32, #tpu.memory_space<vmem>>, %arg2: memref<16x512xbf16, #tpu.memory_space<vmem>>, %arg3: memref<1x32xf32, #tpu.memory_space<vmem>>, %arg4: memref<1x32xf32, #tpu.memory_space<vmem>>, %arg5: memref<512x32xf32, #tpu.memory_space<vmem>>, %arg6: memref<32x512xf32, #tpu.memory_space<vmem>>, %arg7: memref<512x1024xbf16, #tpu.memory_space<vmem>>, %arg8: memref<1x16xf32, #tpu.memory_space<vmem>>, %arg9: memref<1x16xf32, #tpu.memory_space<vmem>>, %arg10: memref<1024x16xf32, #tpu.memory_space<vmem>>, %arg11: memref<16x1024xf32, #tpu.memory_space<vmem>>, %arg12: memref<1024x384xbf16, #tpu.memory_space<vmem>>, %arg13: memref<8x384xf32, #tpu.memory_space<vmem>>) attributes {dimension_semantics = [#tpu.dimension_semantics<parallel>], iteration_bounds = array<i64: 2>, scalar_prefetch = 0 : i64, scratch_operands = 0 : i64, tpu.core_type = #tpu.core_type<tc>, window_params = [{pipeline_mode = #tpu.pipeline_mode<synchronous>, transform_indices = @transform_0, window_bounds = array<i64: 8, 16>}, {pipeline_mode = #tpu.pipeline_mode<synchronous>, transform_indices = @transform_1, window_bounds = array<i64: 16, 512>}, {pipeline_mode = #tpu.pipeline_mode<synchronous>, transform_indices = @transform_2, window_bounds = array<i64: 1, 32>}, {pipeline_mode = #tpu.pipeline_mode<synchronous>, transform_indices = @transform_3, window_bounds = array<i64: 1, 32>}, {pipeline_mode = #tpu.pipeline_mode<synchronous>, transform_indices = @transform_4, window_bounds = array<i64: 512, 32>}, {pipeline_mode = #tpu.pipeline_mode<synchronous>, transform_indices = @transform_5, window_bounds = array<i64: 32, 512>}, {pipeline_mode = #tpu.pipeline_mode<synchronous>, transform_indices = @transform_6, window_bounds = array<i64: 512, 1024>}, {pipeline_mode = #tpu.pipeline_mode<synchronous>, transform_indices = @transform_7, window_bounds = array<i64: 1, 16>}, {pipeline_mode = #tpu.pipeline_mode<synchronous>, transform_indices = @transform_8, window_bounds = array<i64: 1, 16>}, {pipeline_mode = #tpu.pipeline_mode<synchronous>, transform_indices = @transform_9, window_bounds = array<i64: 1024, 16>}, {pipeline_mode = #tpu.pipeline_mode<synchronous>, transform_indices = @transform_10, window_bounds = array<i64: 16, 1024>}, {transform_indices = @transform_11, window_bounds = array<i64: 1024, 384>}, {transform_indices = @transform_12, window_bounds = array<i64: 8, 384>}]} {
    %0 = tpu.iota {dimensions = array<i32: 0>} : vector<8x1xi32>
    %c2_i32 = arith.constant 2 : i32
    %1 = vector.broadcast %c2_i32 : i32 to vector<8x1xi32>
    %2 = arith.cmpi slt, %0, %1 : vector<8x1xi32>
    %3 = arith.extui %2 : vector<8x1xi1> to vector<8x1xi32>
    %4 = arith.sitofp %3 : vector<8x1xi32> to vector<8x1xf32>
    %c0 = arith.constant 0 : index
    %c0_0 = arith.constant 0 : index
    %5 = vector.load %arg1[%c0, %c0_0] : memref<8x16xf32, #tpu.memory_space<vmem>>, vector<8x16xf32>
    %6 = arith.truncf %5 : vector<8x16xf32> to vector<8x16xbf16>
    %c0_1 = arith.constant 0 : index
    %c0_2 = arith.constant 0 : index
    %7 = vector.load %arg2[%c0_1, %c0_2] : memref<16x512xbf16, #tpu.memory_space<vmem>>, vector<16x512xbf16>
    %cst = arith.constant dense<0.000000e+00> : vector<8x512xf32>
    %8 = tpu.matmul %6, %7, %cst {dimension_numbers = #tpu.dot_dimension_numbers<[1], [0], [0], [1], [0, 0, 1, 1], [], []>} : vector<8x16xbf16>, vector<16x512xbf16>, vector<8x512xf32> -> vector<8x512xf32>
    %c0_3 = arith.constant 0 : index
    %c0_4 = arith.constant 0 : index
    %9 = vector.load %arg5[%c0_3, %c0_4] : memref<512x32xf32, #tpu.memory_space<vmem>>, vector<512x32xf32>
    %c0_5 = arith.constant 0 : index
    %c0_6 = arith.constant 0 : index
    %10 = vector.load %arg6[%c0_5, %c0_6] : memref<32x512xf32, #tpu.memory_space<vmem>>, vector<32x512xf32>
    %c0_7 = arith.constant 0 : index
    %c0_8 = arith.constant 0 : index
    %11 = vector.load %arg3[%c0_7, %c0_8] : memref<1x32xf32, #tpu.memory_space<vmem>>, vector<1x32xf32>
    %c0_9 = arith.constant 0 : index
    %c0_10 = arith.constant 0 : index
    %12 = vector.load %arg4[%c0_9, %c0_10] : memref<1x32xf32, #tpu.memory_space<vmem>>, vector<1x32xf32>
    %cst_11 = arith.constant dense<0.000000e+00> : vector<512xf32>
    %13 = vector.multi_reduction <add>, %8, %cst_11 [0] : vector<8x512xf32> to vector<512xf32>
    %14 = vector.shape_cast %13 : vector<512xf32> to vector<1x512xf32>
    %15 = arith.mulf %8, %8 : vector<8x512xf32>
    %cst_12 = arith.constant dense<0.000000e+00> : vector<512xf32>
    %16 = vector.multi_reduction <add>, %15, %cst_12 [0] : vector<8x512xf32> to vector<512xf32>
    %17 = vector.shape_cast %16 : vector<512xf32> to vector<1x512xf32>
    %18 = tpu.concatenate %14, %17 in 0 : vector<1x512xf32>, vector<1x512xf32> -> vector<2x512xf32>
    %cst_13 = arith.constant dense<0.000000e+00> : vector<2x32xf32>
    %19 = tpu.matmul %18, %9, %cst_13 {dimension_numbers = #tpu.dot_dimension_numbers<[1], [0], [0], [1], [0, 0, 1, 1], [], []>} : vector<2x512xf32>, vector<512x32xf32>, vector<2x32xf32> -> vector<2x32xf32>
    %cst_14 = arith.constant 3.200000e+01 : f32
    %20 = vector.broadcast %cst_14 : f32 to vector<2x32xf32>
    %21 = arith.divf %19, %20 : vector<2x32xf32>
    %22 = vector.extract_strided_slice %21 {offsets = [0, 0], sizes = [1, 32], strides = [1, 1]} : vector<2x32xf32> to vector<1x32xf32>
    %23 = vector.extract_strided_slice %21 {offsets = [1, 0], sizes = [1, 32], strides = [1, 1]} : vector<2x32xf32> to vector<1x32xf32>
    %24 = arith.mulf %22, %22 : vector<1x32xf32>
    %25 = arith.subf %23, %24 : vector<1x32xf32>
    %cst_15 = arith.constant 0.000000e+00 : f32
    %26 = vector.broadcast %cst_15 : f32 to vector<1x32xf32>
    %27 = arith.maximumf %25, %26 : vector<1x32xf32>
    %cst_16 = arith.constant 9.99999974E-6 : f32
    %28 = vector.broadcast %cst_16 : f32 to vector<1x32xf32>
    %29 = arith.addf %27, %28 : vector<1x32xf32>
    %30 = math.rsqrt %29 : vector<1x32xf32>
    %31 = arith.mulf %11, %30 : vector<1x32xf32>
    %32 = arith.mulf %22, %31 : vector<1x32xf32>
    %33 = arith.subf %12, %32 : vector<1x32xf32>
    %34 = tpu.concatenate %31, %33 in 0 : vector<1x32xf32>, vector<1x32xf32> -> vector<2x32xf32>
    %cst_17 = arith.constant dense<0.000000e+00> : vector<2x512xf32>
    %35 = tpu.matmul %34, %10, %cst_17 {dimension_numbers = #tpu.dot_dimension_numbers<[1], [0], [0], [1], [0, 0, 1, 1], [], []>} : vector<2x32xf32>, vector<32x512xf32>, vector<2x512xf32> -> vector<2x512xf32>
    %36 = vector.extract_strided_slice %35 {offsets = [0, 0], sizes = [1, 512], strides = [1, 1]} : vector<2x512xf32> to vector<1x512xf32>
    %37 = vector.broadcast %36 : vector<1x512xf32> to vector<8x512xf32>
    %38 = arith.mulf %8, %37 : vector<8x512xf32>
    %39 = vector.extract_strided_slice %35 {offsets = [1, 0], sizes = [1, 512], strides = [1, 1]} : vector<2x512xf32> to vector<1x512xf32>
    %40 = vector.broadcast %39 : vector<1x512xf32> to vector<8x512xf32>
    %41 = arith.addf %38, %40 : vector<8x512xf32>
    %cst_18 = arith.constant 0.000000e+00 : f32
    %42 = vector.broadcast %cst_18 : f32 to vector<8x512xf32>
    %43 = arith.maximumf %41, %42 : vector<8x512xf32>
    %44 = vector.broadcast %4 : vector<8x1xf32> to vector<8x512xf32>
    %45 = arith.mulf %43, %44 : vector<8x512xf32>
    %46 = arith.truncf %45 : vector<8x512xf32> to vector<8x512xbf16>
    %c0_19 = arith.constant 0 : index
    %c0_20 = arith.constant 0 : index
    %47 = vector.load %arg7[%c0_19, %c0_20] : memref<512x1024xbf16, #tpu.memory_space<vmem>>, vector<512x1024xbf16>
    %cst_21 = arith.constant dense<0.000000e+00> : vector<8x1024xf32>
    %48 = tpu.matmul %46, %47, %cst_21 {dimension_numbers = #tpu.dot_dimension_numbers<[1], [0], [0], [1], [0, 0, 1, 1], [], []>} : vector<8x512xbf16>, vector<512x1024xbf16>, vector<8x1024xf32> -> vector<8x1024xf32>
    %c0_22 = arith.constant 0 : index
    %c0_23 = arith.constant 0 : index
    %49 = vector.load %arg10[%c0_22, %c0_23] : memref<1024x16xf32, #tpu.memory_space<vmem>>, vector<1024x16xf32>
    %c0_24 = arith.constant 0 : index
    %c0_25 = arith.constant 0 : index
    %50 = vector.load %arg11[%c0_24, %c0_25] : memref<16x1024xf32, #tpu.memory_space<vmem>>, vector<16x1024xf32>
    %c0_26 = arith.constant 0 : index
    %c0_27 = arith.constant 0 : index
    %51 = vector.load %arg8[%c0_26, %c0_27] : memref<1x16xf32, #tpu.memory_space<vmem>>, vector<1x16xf32>
    %c0_28 = arith.constant 0 : index
    %c0_29 = arith.constant 0 : index
    %52 = vector.load %arg9[%c0_28, %c0_29] : memref<1x16xf32, #tpu.memory_space<vmem>>, vector<1x16xf32>
    %cst_30 = arith.constant dense<0.000000e+00> : vector<1024xf32>
    %53 = vector.multi_reduction <add>, %48, %cst_30 [0] : vector<8x1024xf32> to vector<1024xf32>
    %54 = vector.shape_cast %53 : vector<1024xf32> to vector<1x1024xf32>
    %55 = arith.mulf %48, %48 : vector<8x1024xf32>
    %cst_31 = arith.constant dense<0.000000e+00> : vector<1024xf32>
    %56 = vector.multi_reduction <add>, %55, %cst_31 [0] : vector<8x1024xf32> to vector<1024xf32>
    %57 = vector.shape_cast %56 : vector<1024xf32> to vector<1x1024xf32>
    %58 = tpu.concatenate %54, %57 in 0 : vector<1x1024xf32>, vector<1x1024xf32> -> vector<2x1024xf32>
    %cst_32 = arith.constant dense<0.000000e+00> : vector<2x16xf32>
    %59 = tpu.matmul %58, %49, %cst_32 {dimension_numbers = #tpu.dot_dimension_numbers<[1], [0], [0], [1], [0, 0, 1, 1], [], []>} : vector<2x1024xf32>, vector<1024x16xf32>, vector<2x16xf32> -> vector<2x16xf32>
    %cst_33 = arith.constant 1.280000e+02 : f32
    %60 = vector.broadcast %cst_33 : f32 to vector<2x16xf32>
    %61 = arith.divf %59, %60 : vector<2x16xf32>
    %62 = vector.extract_strided_slice %61 {offsets = [0, 0], sizes = [1, 16], strides = [1, 1]} : vector<2x16xf32> to vector<1x16xf32>
    %63 = vector.extract_strided_slice %61 {offsets = [1, 0], sizes = [1, 16], strides = [1, 1]} : vector<2x16xf32> to vector<1x16xf32>
    %64 = arith.mulf %62, %62 : vector<1x16xf32>
    %65 = arith.subf %63, %64 : vector<1x16xf32>
    %cst_34 = arith.constant 0.000000e+00 : f32
    %66 = vector.broadcast %cst_34 : f32 to vector<1x16xf32>
    %67 = arith.maximumf %65, %66 : vector<1x16xf32>
    %cst_35 = arith.constant 9.99999974E-6 : f32
    %68 = vector.broadcast %cst_35 : f32 to vector<1x16xf32>
    %69 = arith.addf %67, %68 : vector<1x16xf32>
    %70 = math.rsqrt %69 : vector<1x16xf32>
    %71 = arith.mulf %51, %70 : vector<1x16xf32>
    %72 = arith.mulf %62, %71 : vector<1x16xf32>
    %73 = arith.subf %52, %72 : vector<1x16xf32>
    %74 = tpu.concatenate %71, %73 in 0 : vector<1x16xf32>, vector<1x16xf32> -> vector<2x16xf32>
    %cst_36 = arith.constant dense<0.000000e+00> : vector<2x1024xf32>
    %75 = tpu.matmul %74, %50, %cst_36 {dimension_numbers = #tpu.dot_dimension_numbers<[1], [0], [0], [1], [0, 0, 1, 1], [], []>} : vector<2x16xf32>, vector<16x1024xf32>, vector<2x1024xf32> -> vector<2x1024xf32>
    %76 = vector.extract_strided_slice %75 {offsets = [0, 0], sizes = [1, 1024], strides = [1, 1]} : vector<2x1024xf32> to vector<1x1024xf32>
    %77 = vector.broadcast %76 : vector<1x1024xf32> to vector<8x1024xf32>
    %78 = arith.mulf %48, %77 : vector<8x1024xf32>
    %79 = vector.extract_strided_slice %75 {offsets = [1, 0], sizes = [1, 1024], strides = [1, 1]} : vector<2x1024xf32> to vector<1x1024xf32>
    %80 = vector.broadcast %79 : vector<1x1024xf32> to vector<8x1024xf32>
    %81 = arith.addf %78, %80 : vector<8x1024xf32>
    %cst_37 = arith.constant 0.000000e+00 : f32
    %82 = vector.broadcast %cst_37 : f32 to vector<8x1024xf32>
    %83 = arith.maximumf %81, %82 : vector<8x1024xf32>
    %84 = vector.broadcast %4 : vector<8x1xf32> to vector<8x1024xf32>
    %85 = arith.mulf %83, %84 : vector<8x1024xf32>
    %86 = arith.truncf %85 : vector<8x1024xf32> to vector<8x1024xbf16>
    %c0_38 = arith.constant 0 : index
    %c0_39 = arith.constant 0 : index
    %87 = vector.load %arg12[%c0_38, %c0_39] : memref<1024x384xbf16, #tpu.memory_space<vmem>>, vector<1024x384xbf16>
    %cst_40 = arith.constant dense<0.000000e+00> : vector<8x384xf32>
    %88 = tpu.matmul %86, %87, %cst_40 {dimension_numbers = #tpu.dot_dimension_numbers<[1], [0], [0], [1], [0, 0, 1, 1], [], []>} : vector<8x1024xbf16>, vector<1024x384xbf16>, vector<8x384xf32> -> vector<8x384xf32>
    %89 = math.tanh %88 : vector<8x384xf32>
    %c0_41 = arith.constant 0 : index
    %c0_42 = arith.constant 0 : index
    %90 = vector.load %arg13[%c0_41, %c0_42] : memref<8x384xf32, #tpu.memory_space<vmem>>, vector<8x384xf32>
    tpu.vector_store %arg13[%c0_41, %c0_42], %89 {strides = array<i32>} : memref<8x384xf32, #tpu.memory_space<vmem>>, vector<8x384xf32>,
    return
  }
  func.func @transform_0(%arg0: i32) -> (i32, i32) {
    %c0_i32 = arith.constant 0 : i32
    %c0_i32_0 = arith.constant 0 : i32
    %c0_i32_1 = arith.constant 0 : i32
    return %c0_i32, %c0_i32_0 : i32, i32
  }
  func.func @transform_1(%arg0: i32) -> (i32, i32) {
    %c0_i32 = arith.constant 0 : i32
    %c0_i32_0 = arith.constant 0 : i32
    %c0_i32_1 = arith.constant 0 : i32
    return %c0_i32, %c0_i32_0 : i32, i32
  }
  func.func @transform_2(%arg0: i32) -> (i32, i32) {
    %c0_i32 = arith.constant 0 : i32
    %c0_i32_0 = arith.constant 0 : i32
    %c0_i32_1 = arith.constant 0 : i32
    return %c0_i32, %c0_i32_0 : i32, i32
  }
  func.func @transform_3(%arg0: i32) -> (i32, i32) {
    %c0_i32 = arith.constant 0 : i32
    %c0_i32_0 = arith.constant 0 : i32
    %c0_i32_1 = arith.constant 0 : i32
    return %c0_i32, %c0_i32_0 : i32, i32
  }
  func.func @transform_4(%arg0: i32) -> (i32, i32) {
    %c0_i32 = arith.constant 0 : i32
    %c0_i32_0 = arith.constant 0 : i32
    %c0_i32_1 = arith.constant 0 : i32
    return %c0_i32, %c0_i32_0 : i32, i32
  }
  func.func @transform_5(%arg0: i32) -> (i32, i32) {
    %c0_i32 = arith.constant 0 : i32
    %c0_i32_0 = arith.constant 0 : i32
    %c0_i32_1 = arith.constant 0 : i32
    return %c0_i32, %c0_i32_0 : i32, i32
  }
  func.func @transform_6(%arg0: i32) -> (i32, i32) {
    %c0_i32 = arith.constant 0 : i32
    %c0_i32_0 = arith.constant 0 : i32
    %c0_i32_1 = arith.constant 0 : i32
    return %c0_i32, %c0_i32_0 : i32, i32
  }
  func.func @transform_7(%arg0: i32) -> (i32, i32) {
    %c0_i32 = arith.constant 0 : i32
    %c0_i32_0 = arith.constant 0 : i32
    %c0_i32_1 = arith.constant 0 : i32
    return %c0_i32, %c0_i32_0 : i32, i32
  }
  func.func @transform_8(%arg0: i32) -> (i32, i32) {
    %c0_i32 = arith.constant 0 : i32
    %c0_i32_0 = arith.constant 0 : i32
    %c0_i32_1 = arith.constant 0 : i32
    return %c0_i32, %c0_i32_0 : i32, i32
  }
  func.func @transform_9(%arg0: i32) -> (i32, i32) {
    %c0_i32 = arith.constant 0 : i32
    %c0_i32_0 = arith.constant 0 : i32
    %c0_i32_1 = arith.constant 0 : i32
    return %c0_i32, %c0_i32_0 : i32, i32
  }
  func.func @transform_10(%arg0: i32) -> (i32, i32) {
    %c0_i32 = arith.constant 0 : i32
    %c0_i32_0 = arith.constant 0 : i32
    %c0_i32_1 = arith.constant 0 : i32
    return %c0_i32, %c0_i32_0 : i32, i32
  }
  func.func @transform_11(%arg0: i32) -> (i32, i32) {
    %c0_i32 = arith.constant 0 : i32
    %c0_i32_0 = arith.constant 0 : i32
    return %c0_i32, %arg0 : i32, i32
  }
  func.func @transform_12(%arg0: i32) -> (i32, i32) {
    %c0_i32 = arith.constant 0 : i32
    %c0_i32_0 = arith.constant 0 : i32
    return %c0_i32, %arg0 : i32, i32
  }
}

</mosaic_0001>

<bundles_post_ra>
// kernel: tpu_custom_call.1
= control target key start
LH: loop header
LB: loop body
LE: loop exit
PB: predicated region body
PF: predicated region fallthrough
CT: control target
= control target key end

     0   :  { %s9812_s0 = inlined_call_operand.hbm [shape: f32[8,16], index: 0, kind: input, shape index: {}]   ;;  %s9813_s1 = inlined_call_operand.hbm [shape: bf16[16,512], index: 1, kind: input, shape index: {}]   ;;  %s9814_s2 = inlined_call_operand.hbm [shape: f32[1,32], index: 2, kind: input, shape index: {}]   ;;  %s9815_s3 = inlined_call_operand.hbm [shape: f32[1,32], index: 3, kind: input, shape index: {}]   ;;  %s9816_s4 = inlined_call_operand.vmem [shape: f32[512,32], index: 4, kind: input, shape index: {}]   ;;  %s9817_s5 = inlined_call_operand.hbm [shape: f32[32,512], index: 5, kind: input, shape index: {}]   ;;  %s9818_s6 = inlined_call_operand.hbm [shape: bf16[512,1024], index: 6, kind: input, shape index: {}]   ;;  %s9819_s7 = inlined_call_operand.hbm [shape: f32[1,16], index: 7, kind: input, shape index: {}]   ;;  %s9820_s8 = inlined_call_operand.hbm [shape: f32[1,16], index: 8, kind: input, shape index: {}]   ;;  %s9821_s9 = inlined_call_operand.vmem [shape: f32[1024,16], index: 9, kind: input, shape index: {}]   ;;  %s9822_s10 = inlined_call_operand.hbm [shape: f32[16,1024], index: 10, kind: input, shape index: {}]   ;;  %s9823_s11 = inlined_call_operand.hbm [shape: bf16[1024,768], index: 11, kind: input, shape index: {}]   ;;  %s9824_s12 = inlined_call_operand.hbm [shape: f32[8,768], index: 12, kind: output, shape index: {}]  }
   0x1   :  { %9828 = sst [smem:[#allocation27_spill]] %s9812_s0 }
   0x2   :  { %9829 = sst [smem:[#allocation28_spill]] %s9813_s1 }
   0x3   :  { %9830 = sst [smem:[#allocation29_spill]] %s9814_s2 }
   0x4   :  { %9831 = sst [smem:[#allocation30_spill]] %s9815_s3 }
   0x5   :  { %9832 = sst [smem:[#allocation31_spill]] %s9816_s4 }
   0x6   :  { %9833 = sst [smem:[#allocation32_spill]] %s9817_s5 }
   0x7   :  { %9834 = sst [smem:[#allocation33_spill]] %s9818_s6 }
   0x8   :  { %9835 = sst [smem:[#allocation34_spill]] %s9821_s9 }
   0x9   :  { %9836 = sst [smem:[#allocation35_spill]] %s9824_s12 }
   0xa   :  { %17 = vsyncpa [#allocation3], 0 }
   0xb   :  { %18 = vsyncpa [#allocation6], 0 }
   0xc   :  { %19 = vsyncpa [#allocation9], 0 }
   0xd   :  { %20 = vsyncpa [#allocation12], 0 }
   0xe   :  { %21 = vsyncpa [#allocation15], 0 }
   0xf   :  { %22 = vsyncpa [#allocation18], 0 }
  0x10   :  { %24 = vsyncpa [#allocation18 + $0x1], 0 }
  0x11   :  { %25 = vsyncpa [#allocation4], 0 }
  0x12   :  { %27 = vsyncpa [#allocation4 + $0x1], 0  ;;  %s8375_s21 = smov 0   ;;  %s8377_s22 = smov 0  }
  0x13   :  { %s8379_s23 = smov 0   ;;  %s8381_s24 = smov 0  }
  0x14 LB: > { %s9837_s1 = sld [smem:[#allocation28_spill]]  ;;  %s8399_s28 = sadd.s32 4294967295, %s8287_s24   ;;  %s8287_s24 = sphi %s8381_s24, %s9858_s24   ;;  %s8283_s23 = sphi %s8379_s23, %s9857_s23   ;;  %s8279_s22 = sphi %s8377_s22, %s9856_s22   ;;  %s8275_s21 = sphi %s8375_s21, %s9855_s21  }
  0x15   : > { %p5431_p0 = scmp.ge.s32.totalorder %s8287_s24, 1  ;;  %p285_p1 = scmp.eq.s32.totalorder %s8399_s28, 0 }
  0x16   : > { %p321_p2 = scmp.lt.s32.totalorder %s8287_s24, 3  ;;  %s8289_s30 = smov [#allocation5]  }
  0x17   : > { %s346_s13 = sshll.u32 %s8289_s30, 4  ;;  %s9839_s3 = sld [smem:[#allocation30_spill]]  ;;  %s347_s13 = int_to_ptr.vmem [resolvable:$true] %s346_s13 }
  0x18   : > { %p8404_p3 = pnand %p5431_p0, %p321_p2  ;;  %s8290_s18 = smov [#allocation8]  }
  0x19   : > { %s373_s19 = sshll.u32 %s8290_s18, 4  ;;  %s8291_s20 = smov 256   ;;  %s374_s19 = int_to_ptr.vmem [resolvable:$true] %s373_s19 }
  0x1a   : > { %s344_s27 = sshll.u32 %s9837_s1, 4  ;;  %p7778_p4 = pneg %p8404_p3  ;;  %s345_s27 = int_to_ptr.hbm [resolvable:$true] %s344_s27 }
  0x1b   : > { %s8292_s25 = smov 16   ;;  %s9841_s6 = sld [smem:[#allocation33_spill]] }
  0x1c   : > { %p8416_p6 = pnand %p7778_p4, %p285_p1  ;;  %s8293_s15 = smov [#allocation11]  }
  0x1d   : > { %s371_s16 = sshll.u32 %s9839_s3, 4  ;;  %s401_s1 = sshll.u32 %s8293_s15, 4  ;;  %s372_s16 = int_to_ptr.hbm [resolvable:$true] %s371_s16  ;;  %s402_s1 = int_to_ptr.vmem [resolvable:$true] %s401_s1 }
  0x1e   : > { %7784 = dma.hbm_to_vmem [thread:$0]  (!%p8416_p6), %s345_s27, 512, %s347_s13, [#allocation6], %s8291_s20, %s8291_s20, %s8292_s25  }
  0x1f   : > { %7790 = dma.hbm_to_vmem [thread:$0]  (!%p8416_p6), %s372_s16, 16, %s374_s19, [#allocation9]  }
  0x20   : > { %s426_s18 = sshll.u32 %s9820_s8, 4  ;;  %s8294_s9 = smov 512   ;;  %s427_s18 = int_to_ptr.hbm [resolvable:$true] %s426_s18 }
  0x21   : > { %s399_s14 = sshll.u32 %s9841_s6, 4  ;;  %s8295_s4 = smov 32   ;;  %s400_s14 = int_to_ptr.hbm [resolvable:$true] %s399_s14 }
  0x22   : > { %7796 = dma.hbm_to_vmem [thread:$0]  (!%p8416_p6), %s400_s14, 32768, %s402_s1, [#allocation12], %s8294_s9, %s8294_s9, %s8295_s4  }
  0x23   : > { %s8296_s27 = smov [#allocation14]   ;;  %s9842_s0 = sld [smem:[#allocation27_spill]] }
  0x24   : > { %s428_s13 = sshll.u32 %s8296_s27, 4  ;;  %s9843_s2 = sld [smem:[#allocation29_spill]]  ;;  %s429_s13 = int_to_ptr.vmem [resolvable:$true] %s428_s13 }
  0x25   : > { %7802 = dma.hbm_to_vmem [thread:$0]  (!%p8416_p6), %s427_s18, 16, %s429_s13, [#allocation15]  }
  0x26   : > { %s8297_s26 = smov [#allocation2]   ;;  %s8298_s1 = smov [#allocation7]  }
  0x27   : > { %s335_s30 = sshll.u32 %s8297_s26, 4  ;;  %s361_s14 = sshll.u32 %s8298_s1, 4  ;;  %s336_s30 = int_to_ptr.vmem [resolvable:$true] %s335_s30  ;;  %s362_s14 = int_to_ptr.vmem [resolvable:$true] %s361_s14 }
  0x28   : > { %s9844_s5 = sld [smem:[#allocation32_spill]]  ;;  %s414_s19 = sshll.u32 %s9819_s7, 4  ;;  %s415_s19 = int_to_ptr.hbm [resolvable:$true] %s414_s19 }
  0x29   : > { %s333_s20 = sshll.u32 %s9842_s0, 4  ;;  %s8299_s3 = smov [#allocation10]   ;;  %s334_s20 = int_to_ptr.hbm [resolvable:$true] %s333_s20 }
  0x2a   : > { %s359_s25 = sshll.u32 %s9843_s2, 4  ;;  %s387_s12 = sshll.u32 %s8299_s3, 4  ;;  %s360_s25 = int_to_ptr.hbm [resolvable:$true] %s359_s25  ;;  %s388_s12 = int_to_ptr.vmem [resolvable:$true] %s387_s12 }
  0x2b   : > { %7781 = dma.hbm_to_vmem [thread:$0]  (!%p8416_p6), %s334_s20, 128, %s336_s30, [#allocation3]  }
  0x2c   : > { %7787 = dma.hbm_to_vmem [thread:$0]  (!%p8416_p6), %s360_s25, 16, %s362_s14, [#allocation6]  }
  0x2d   : > { %s8300_s20 = smov [#allocation13]   ;;  %s440_s1 = sshll.u32 %s9822_s10, 4  ;;  %s441_s1 = int_to_ptr.hbm [resolvable:$true] %s440_s1 }
  0x2e   : > { %s385_s16 = sshll.u32 %s9844_s5, 4  ;;  %s416_s25 = sshll.u32 %s8300_s20, 4  ;;  %s386_s16 = int_to_ptr.hbm [resolvable:$true] %s385_s16  ;;  %s417_s25 = int_to_ptr.vmem [resolvable:$true] %s416_s25 }
  0x2f   : > { %7793 = dma.hbm_to_vmem [thread:$0]  (!%p8416_p6), %s386_s16, 2048, %s388_s12, [#allocation9], %s8294_s9, %s8294_s9, %s8295_s4  }
  0x30   : > { %7799 = dma.hbm_to_vmem [thread:$0]  (!%p8416_p6), %s415_s19, 16, %s417_s25, [#allocation12]  }
  0x31   : > { %s8301_s14 = smov [#allocation16]   ;;  %s8302_s9 = smov 1024  }
  0x32   : > { %s442_s4 = sshll.u32 %s8301_s14, 4  ;;  %s8303_s15 = smov 64   ;;  %s443_s4 = int_to_ptr.vmem [resolvable:$true] %s442_s4 }
  0x33   : > { %7805 = dma.hbm_to_vmem [thread:$0]  (!%p8416_p6), %s441_s1, 2048, %s443_s4, [#allocation15], %s8302_s9, %s8302_s9, %s8303_s15  }
  0x34   : > { %s5430_s27 = sadd.s32 4294967294, %s8287_s24   ;;  %s8467_s16 = sadd.s32 1, %s8287_s24  }
  0x35   : > { %s271_s18 = sadd.s32 1, %s8283_s23  ;;  %s268_s13 = ssub.s32 %s8287_s24, %s8467_s16 }
  0x36   : > { %p278_p7 = scmp.ne.s32.totalorder %s8283_s23, %s8279_s22  ;;  %p269_p8 = scmp.eq.s32.totalorder %s268_s13, 0 }
  0x37   : > { %p279_p9 = scmp.eq.s32.totalorder %s8287_s24, 0  ;;  %p284_p10 = scmp.ne.s32.totalorder %s8279_s22, %s8275_s21 }
  0x38   : > { %p308_p11 = scmp.eq.s32.totalorder %s8399_s28, 1  ;;  %p314_p2 = scmp.eq.s32.totalorder %s5430_s27, 1 }
  0x39   : > { %s8479_s19 = scalar_select %p269_p8, %s8283_s23, %s271_s18  }
  0x3a   : > { %p280_p12 = por %p279_p9, %p278_p7  ;;  %p8483_p13 = por %p285_p1, %p284_p10 }
  0x3b   : > { %p8487_p0 = por %p308_p11, %p278_p7  ;;  %p7823_p4 = scmp.lt.s32.totalorder %s8287_s24, 2 }
  0x3c   : > { %s456_s12 = sand.u32 1, %s8283_s23   ;;  %p8493_p6 = por %p314_p2, %p284_p10 }
  0x3d   : > { %s7735_s25 = smul.u32 1536, %s456_s12  ;;  %p8497_p8 = pnand %p7823_p4, %p280_p12 }
  0x3e   : > { %s7281_s30 = smul.u32 12, %s8287_s24  ;;  %s457_s18 = scalar_lea.sflag [#allocation18], %s456_s12 }
  0x3f   : > { %s460_s9 = scalar_lea.vmem [#allocation17], %s7735_s25  ;;  %p8175_p9 = pneg %p8497_p8 }
  0x40   : > { %s465_s4 = scalar_lea.hbm %s9823_s11, %s7281_s30  ;;  %s468_s15 = sshll.u32 %s460_s9, 4  ;;  %s469_s15 = int_to_ptr.vmem [resolvable:$true] %s468_s15 }
  0x41   : > { %s466_s27 = sshll.u32 %s465_s4, 4  ;;  %s8178_s6 = scalar_lea.hbm %s9823_s11, 3072  ;;  %s467_s27 = int_to_ptr.hbm [resolvable:$true] %s466_s27 }
  0x42   : > { %s8171_s13 = sshra.s32 %s467_s27, 4  ;;  %s8172_s13 = int_to_ptr.hbm [resolvable:$true] %s8171_s13 }
  0x43   : > { %s8173_s0 = scalar_lea.hbm %s8172_s13, 1536  ;;  %p8179_p12 = scmp.lt.s32.totalorder %s8172_s13, %s9823_s11 }
  0x44   : > { %p8174_p7 = scmp.ne.s32.totalorder %s8172_s13, %s8173_s0  ;;  %p8180_p2 = scmp.lt.s32.totalorder %s8178_s6, %s8173_s0 }
  0x46   : > { %p8176_p10 = pnand %p8175_p9, %p8174_p7  ;;  %p8181_p4 = por %p8180_p2, %p8179_p12 }
  0x48   : > { %p8177_p11 = pneg %p8176_p10 }
  0x4a   : > { %p8182_p5 = pnand %p8181_p4, %p8177_p11 }
  0x4c   : > { %8185 = shalt.err (!%p8182_p5)
}
  0x4d   : > { %s8304_s12 = smov 384   ;;  %s8305_s25 = smov 192  }
  0x4e   : > { %s8306_s14 = smov 12   ;;  %480 = sbr.rel (%p8404_p3) target bundleno = 1525 (0x5f5), region = 68 }
  0x4f   : > { %7809 = dma.hbm_to_vmem [thread:$0]  (!%p8497_p8), %s467_s27, 24576, %s469_s15, %s457_s18, %s8304_s12, %s8305_s25, %s8306_s14  }
  0x53   : > { %8246 = dma.done.wait (%p285_p1), [#allocation3], 128  }
  0x54   : > { %8248 = vsyncadd (%p285_p1), [#allocation3], 4294967168 }
  0x55   : > { %8250 = dma.done.wait (%p285_p1), [#allocation6], 528  }
  0x56   : > { %8252 = vsyncadd (%p285_p1), [#allocation6], 4294966768 }
  0x57   : > { %8254 = dma.done.wait (%p285_p1), [#allocation9], 2064  }
  0x58   : > { %8256 = vsyncadd (%p285_p1), [#allocation9], 4294965232 }
  0x59   : > { %8258 = dma.done.wait (%p285_p1), [#allocation12], 32784  }
  0x5a   : > { %8260 = vsyncadd (%p285_p1), [#allocation12], 4294934512 }
  0x5b   : > { %8262 = dma.done.wait (%p285_p1), [#allocation15], 2064  }
  0x5c   : > { %8264 = vsyncadd (%p285_p1), [#allocation15], 4294965232  ;;  %s8538_s0 = sand.u32 1, %s8279_s22  }
  0x5d   : > { %s7736_s2 = smul.u32 1536, %s8538_s0  ;;  %s528_s5 = scalar_lea.sflag [#allocation18], %s8538_s0 }
  0x5f   : > { %s8542_s6 = scalar_lea.vmem [#allocation17], %s7736_s2 }
  0x60   : > { %8266 = dma.done.wait (%p8483_p13), %s528_s5, 24576  }
  0x61   : > { %8268 = vsyncadd (%p8483_p13), %s528_s5, 4294942720  ;;  %v5464_v0 = vld [vmem:[#allocation5 + $0x8] sm:$0xf]  ;;  %v7285_v1 = vld [vmem:[#allocation5 + $0x14] sm:$0xf0]  ;;  %vm607_vm0 = vcmask 130048  }
  0x62   : > { %v7283_v2 = vld [vmem:[#allocation5 + $0xc] sm:$0xf]  ;;  %v5465_v3 = vor.u32 %v7285_v1, %v5464_v0  ;;  %v5466_v4 = vld [vmem:[#allocation5 + $0x18] sm:$0xf0]  ;;  %v5456_v5 = vld [vmem:[#allocation5] sm:$0xf] }
  0x63   : > { %v7284_v6 = vld [vmem:[#allocation5 + $0xc] sm:$0xf0]  ;;  %v5469_v7 = vor.u32 %v7283_v2, %v5466_v4  ;;  %v7282_v9 = vld [vmem:[#allocation5 + $0x4] sm:$0xf]  ;;  %v5458_v10 = vld [vmem:[#allocation5 + $0x10] sm:$0xf0] }
  0x64   : > { %v5457_v8 = vor.u32 %v7284_v6, %v5456_v5  ;;  %v581_v11 = vld [vmem:[#allocation2] sm:$0xff]  ;;  %644 = vmatpush.bf16.msra.mxu2 %v5465_v3  ;;  %v5461_v12 = vor.u32 %v7282_v9, %v5458_v10  ;;  %s9849_s17 = sld [smem:[#allocation31_spill]]  ;;  %vm797_vm1 = vcmask 1040384   ;;  %vm919_vm6 = vcmask 261120   ;;  %s7734_s5 = smul.u32 24, %s8399_s28 }
  0x65   : > { %v582_v13 = vpack.c.bf16 %v581_v11, %v581_v11  ;;  %657 = vmatpush.bf16.msra.mxu3 %v5469_v7  ;;  %s9852_s12 = sld [smem:[#allocation34_spill]]  ;;  %s5256_s18 = scalar_lea.sflag [#allocation4], %s8538_s0 }
  0x66   : > { %618 = vmatpush.bf16.msra.mxu0 %v5457_v8  ;;  %631 = vmatpush.bf16.msra.mxu1 %v5461_v12  ;;  %s9853_s4 = sld [smem:[#allocation35_spill]] }
  0x67   : > { %5472 = vmatmul.msk.bf16.vlgmr.msra.gmra.mxu2 %vm607_vm0, %v582_v13 }
  0x68   : > { %5473 = vmatmul.msk.bf16.vlgmr.msra.gmra.mxu3 %vm607_vm0, %v582_v13 }
  0x69   : > { %5470 = vmatmul.msk.bf16.vlgmr.msra.gmra.mxu0 %vm607_vm0, %v582_v13  ;;  %5471 = vmatmul.msk.bf16.vlgmr.msra.gmra.mxu1 %vm607_vm0, %v582_v13 }
  0x6a   : > { %v678_v14 = vld [vmem:[%s9849_s17 + $0x78] sm:$0xff]  ;;  %v677_v16 = vld [vmem:[%s9849_s17 + $0x70] sm:$0xff]  ;;  %v676_v19 = vld [vmem:[%s9849_s17 + $0x68] sm:$0xff] }
  0x6b   : > { %v694_v15 = vld [vmem:[%s9849_s17 + $0xf8] sm:$0xff]  ;;  %802 = vmatpush.msrb.mxu0 %v678_v14  ;;  %v693_v17 = vld [vmem:[%s9849_s17 + $0xf0] sm:$0xff]  ;;  %v692_v21 = vld [vmem:[%s9849_s17 + $0xe8] sm:$0xff] }
  0x6c   : > { %822 = vmatpush.msrb.mxu1 %v694_v15  ;;  %v710_v18 = vld [vmem:[%s9849_s17 + $0x178] sm:$0xff]  ;;  %v709_v22 = vld [vmem:[%s9849_s17 + $0x170] sm:$0xff]  ;;  %v675_v23 = vld [vmem:[%s9849_s17 + $0x60] sm:$0xff]  ;;  %s5267_s9 = scalar_lea.hbm %s9853_s4, %s7734_s5  ;;  %s8221_s25 = scalar_lea.hbm %s9853_s4, 48 }
  0x6d   : > { %v726_v20 = vld [vmem:[%s9849_s17 + $0x1f8] sm:$0xff]  ;;  %803 = vmatpush.msrb.mxu0 %v677_v16  ;;  %842 = vmatpush.msrb.mxu2 %v710_v18  ;;  %v725_v24 = vld [vmem:[%s9849_s17 + $0x1f0] sm:$0xff]  ;;  %v691_v25 = vld [vmem:[%s9849_s17 + $0xe0] sm:$0xff]  ;;  %s5271_s27 = sshll.u32 %s5267_s9, 4  ;;  %s5272_s27 = int_to_ptr.hbm [resolvable:$true] %s5271_s27 }
  0x6e   : > { %823 = vmatpush.msrb.mxu1 %v693_v17  ;;  %862 = vmatpush.msrb.mxu3 %v726_v20  ;;  %v708_v26 = vld [vmem:[%s9849_s17 + $0x168] sm:$0xff]  ;;  %v674_v27 = vld [vmem:[%s9849_s17 + $0x58] sm:$0xff]  ;;  %v707_v30 = vld [vmem:[%s9849_s17 + $0x160] sm:$0xff]  ;;  %s8215_s13 = sshra.s32 %s5272_s27, 4  ;;  %s8216_s13 = int_to_ptr.hbm [resolvable:$true] %s8215_s13 }
  0x6f   : > { %804 = vmatpush.msrb.mxu0 %v676_v19  ;;  %843 = vmatpush.msrb.mxu2 %v709_v22  ;;  %v724_v28 = vld [vmem:[%s9849_s17 + $0x1e8] sm:$0xff]  ;;  %v690_v29 = vld [vmem:[%s9849_s17 + $0xd8] sm:$0xff]  ;;  %v673_v31 = vld [vmem:[%s9849_s17 + $0x50] sm:$0xff]  ;;  %s8217_s28 = scalar_lea.hbm %s8216_s13, 24  ;;  %p8222_p13 = scmp.lt.s32.totalorder %s8216_s13, %s9853_s4 }
  0x70   : > { %824 = vmatpush.msrb.mxu1 %v692_v21  ;;  %863 = vmatpush.msrb.mxu3 %v725_v24  ;;  %v723_v32 = vld [vmem:[%s9849_s17 + $0x1e0] sm:$0xff]  ;;  %v689_v33 = vld [vmem:[%s9849_s17 + $0xd0] sm:$0xff]  ;;  %v706_v34 = vld [vmem:[%s9849_s17 + $0x158] sm:$0xff]  ;;  %p8218_p1 = scmp.ne.s32.totalorder %s8216_s13, %s8217_s28  ;;  %p8223_p8 = scmp.lt.s32.totalorder %s8221_s25, %s8217_s28 }
  0x71   : > { %805 = vmatpush.msrb.mxu0 %v675_v23  ;;  %844 = vmatpush.msrb.mxu2 %v708_v26  ;;  %v672_v35 = vld [vmem:[%s9849_s17 + $0x48] sm:$0xff]  ;;  %v722_v36 = vld [vmem:[%s9849_s17 + $0x1d8] sm:$0xff]  ;;  %v705_v38 = vld [vmem:[%s9849_s17 + $0x150] sm:$0xff] }
  0x72   : > { %825 = vmatpush.msrb.mxu1 %v691_v25  ;;  %864 = vmatpush.msrb.mxu3 %v724_v28  ;;  %v688_v37 = vld [vmem:[%s9849_s17 + $0xc8] sm:$0xff]  ;;  %v671_v39 = vld [vmem:[%s9849_s17 + $0x40] sm:$0xff]  ;;  %v721_v40 = vld [vmem:[%s9849_s17 + $0x1d0] sm:$0xff]  ;;  %p8219_p3 = pnand %p8218_p1, %p8487_p0  ;;  %p8224_p7 = por %p8223_p8, %p8222_p13 }
  0x73   : > { %806 = vmatpush.msrb.mxu0 %v674_v27  ;;  %845 = vmatpush.msrb.mxu2 %v707_v30  ;;  %v687_v41 = vld [vmem:[%s9849_s17 + $0xc0] sm:$0xff]  ;;  %v670_v42 = vld [vmem:[%s9849_s17 + $0x38] sm:$0xff]  ;;  %v704_v44 = vld [vmem:[%s9849_s17 + $0x148] sm:$0xff] }
  0x74   : > { %826 = vmatpush.msrb.mxu1 %v690_v29  ;;  %865 = vmatpush.msrb.mxu3 %v723_v32  ;;  %v686_v43 = vld [vmem:[%s9849_s17 + $0xb8] sm:$0xff]  ;;  %v720_v45 = vld [vmem:[%s9849_s17 + $0x1c8] sm:$0xff]  ;;  %v669_v46 = vld [vmem:[%s9849_s17 + $0x30] sm:$0xff]  ;;  %p8220_p5 = pneg %p8219_p3 }
  0x75   : > { %807 = vmatpush.msrb.mxu0 %v673_v31  ;;  %846 = vmatpush.msrb.mxu2 %v706_v34  ;;  %v685_v47 = vld [vmem:[%s9849_s17 + $0xb0] sm:$0xff]  ;;  %v703_v48 = vld [vmem:[%s9849_s17 + $0x140] sm:$0xff]  ;;  %v668_v50 = vld [vmem:[%s9849_s17 + $0x28] sm:$0xff] }
  0x76   : > { %827 = vmatpush.msrb.mxu1 %v689_v33  ;;  %866 = vmatpush.msrb.mxu3 %v722_v36  ;;  %v719_v49 = vld [vmem:[%s9849_s17 + $0x1c0] sm:$0xff]  ;;  %v684_v51 = vld [vmem:[%s9849_s17 + $0xa8] sm:$0xff]  ;;  %v702_v52 = vld [vmem:[%s9849_s17 + $0x138] sm:$0xff]  ;;  %p8225_p9 = pnand %p8224_p7, %p8220_p5 }
  0x77   : > { %808 = vmatpush.msrb.mxu0 %v672_v35  ;;  %847 = vmatpush.msrb.mxu2 %v705_v38  ;;  %v718_v53 = vld [vmem:[%s9849_s17 + $0x1b8] sm:$0xff]  ;;  %v667_v54 = vld [vmem:[%s9849_s17 + $0x20] sm:$0xff]  ;;  %v701_v56 = vld [vmem:[%s9849_s17 + $0x130] sm:$0xff] }
  0x78   : > { %828 = vmatpush.msrb.mxu1 %v688_v37  ;;  %867 = vmatpush.msrb.mxu3 %v721_v40  ;;  %v683_v55 = vld [vmem:[%s9849_s17 + $0xa0] sm:$0xff]  ;;  %v717_v57 = vld [vmem:[%s9849_s17 + $0x1b0] sm:$0xff]  ;;  %v666_v58 = vld [vmem:[%s9849_s17 + $0x18] sm:$0xff] }
  0x79   : > { %809 = vmatpush.msrb.mxu0 %v671_v39  ;;  %848 = vmatpush.msrb.mxu2 %v704_v44  ;;  %v682_v59 = vld [vmem:[%s9849_s17 + $0x98] sm:$0xff]  ;;  %v700_v60 = vld [vmem:[%s9849_s17 + $0x128] sm:$0xff]  ;;  %v665_v62 = vld [vmem:[%s9849_s17 + $0x10] sm:$0xff] }
  0x7a   : > { %829 = vmatpush.msrb.mxu1 %v687_v41  ;;  %868 = vmatpush.msrb.mxu3 %v720_v45  ;;  %v716_v61 = vld [vmem:[%s9849_s17 + $0x1a8] sm:$0xff]  ;;  %v681_v63 = vld [vmem:[%s9849_s17 + $0x90] sm:$0xff]  ;;  %v699_v0 = vld [vmem:[%s9849_s17 + $0x120] sm:$0xff] }
  0x7b   : > { %810 = vmatpush.msrb.mxu0 %v670_v42  ;;  %849 = vmatpush.msrb.mxu2 %v703_v48  ;;  %v715_v1 = vld [vmem:[%s9849_s17 + $0x1a0] sm:$0xff]  ;;  %v664_v2 = vld [vmem:[%s9849_s17 + $0x8] sm:$0xff]  ;;  %v698_v4 = vld [vmem:[%s9849_s17 + $0x118] sm:$0xff] }
  0x7c   : > { %830 = vmatpush.msrb.mxu1 %v686_v43  ;;  %869 = vmatpush.msrb.mxu3 %v719_v49  ;;  %v680_v3 = vld [vmem:[%s9849_s17 + $0x88] sm:$0xff]  ;;  %v714_v5 = vld [vmem:[%s9849_s17 + $0x198] sm:$0xff]  ;;  %v663_v6 = vld [vmem:[%s9849_s17] sm:$0xff] }
  0x7d   : > { %811 = vmatpush.msrb.mxu0 %v669_v46  ;;  %850 = vmatpush.msrb.mxu2 %v702_v52  ;;  %v679_v7 = vld [vmem:[%s9849_s17 + $0x80] sm:$0xff]  ;;  %v697_v8 = vld [vmem:[%s9849_s17 + $0x110] sm:$0xff]  ;;  %v696_v10 = vld [vmem:[%s9849_s17 + $0x108] sm:$0xff] }
  0x7e   : > { %831 = vmatpush.msrb.mxu1 %v685_v47  ;;  %870 = vmatpush.msrb.mxu3 %v718_v53  ;;  %v713_v9 = vld [vmem:[%s9849_s17 + $0x190] sm:$0xff]  ;;  %v712_v11 = vld [vmem:[%s9849_s17 + $0x188] sm:$0xff]  ;;  %v695_v12 = vld [vmem:[%s9849_s17 + $0x100] sm:$0xff] }
  0x7f   : > { %812 = vmatpush.msrb.mxu0 %v668_v50  ;;  %851 = vmatpush.msrb.mxu2 %v701_v56  ;;  %v711_v13 = vld [vmem:[%s9849_s17 + $0x180] sm:$0xff] }
  0x80   : > { %832 = vmatpush.msrb.mxu1 %v684_v51  ;;  %871 = vmatpush.msrb.mxu3 %v717_v57 }
  0x81   : > { %813 = vmatpush.msrb.mxu0 %v667_v54  ;;  %852 = vmatpush.msrb.mxu2 %v700_v60 }
  0x82   : > { %833 = vmatpush.msrb.mxu1 %v683_v55  ;;  %872 = vmatpush.msrb.mxu3 %v716_v61 }
  0x83   : > { %814 = vmatpush.msrb.mxu0 %v666_v58  ;;  %853 = vmatpush.msrb.mxu2 %v699_v0 }
  0x84   : > { %834 = vmatpush.msrb.mxu1 %v682_v59  ;;  %873 = vmatpush.msrb.mxu3 %v715_v1 }
  0x85   : > { %815 = vmatpush.msrb.mxu0 %v665_v62  ;;  %854 = vmatpush.msrb.mxu2 %v698_v4 }
  0x86   : > { %835 = vmatpush.msrb.mxu1 %v681_v63  ;;  %874 = vmatpush.msrb.mxu3 %v714_v5 }
  0x87   : > { %816 = vmatpush.msrb.mxu0 %v664_v2  ;;  %855 = vmatpush.msrb.mxu2 %v697_v8 }
  0x88   : > { %836 = vmatpush.msrb.mxu1 %v680_v3  ;;  %875 = vmatpush.msrb.mxu3 %v713_v9 }
  0x89   : > { %817 = vmatpush.msrb.mxu0 %v663_v6  ;;  %856 = vmatpush.msrb.mxu2 %v696_v10 }
  0x8a   : > { %837 = vmatpush.msrb.mxu1 %v679_v7  ;;  %876 = vmatpush.msrb.mxu3 %v712_v11 }
  0x8b   : > { %857 = vmatpush.msrb.mxu2 %v695_v12 }
  0x8c   : > { %877 = vmatpush.msrb.mxu3 %v711_v13 }
  0xe6   : > { %v8744_v14 = vpop.f32.mrf.mxu0  ;;  %v8749_v17 = vpop.f32.mrf.mxu1 }
  0xe7   : > { %v745_v15 = vrot.slane %v8744_v14, 4  ;;  %v769_v16 = vmul.f32 %v8744_v14, %v8744_v14  ;;  %v751_v18 = vrot.slane %v8749_v17, 4  ;;  %v770_v19 = vmul.f32 %v8749_v17, %v8749_v17 }
  0xe9   : > { %v746_v20 = vadd.f32 %v745_v15, %v8744_v14  ;;  %v773_v21 = vrot.slane %v769_v16, 4  ;;  %v752_v22 = vadd.f32 %v751_v18, %v8749_v17  ;;  %v779_v23 = vrot.slane %v770_v19, 4 }
  0xea   : > { %v8756_v26 = vpop.f32.mrf.mxu2  ;;  %v8307_v15 = vmov 32.0  }
  0xeb   : > { %v747_v24 = vrot.slane %v746_v20, 2  ;;  %v774_v25 = vadd.f32 %v773_v21, %v769_v16  ;;  %v753_v27 = vrot.slane %v752_v22, 2  ;;  %v780_v28 = vadd.f32 %v779_v23, %v770_v19  ;;  %v8761_v31 = vpop.f32.mrf.mxu3 }
  0xec   : > { %v757_v29 = vrot.slane %v8756_v26, 4  ;;  %v771_v30 = vmul.f32 %v8756_v26, %v8756_v26  ;;  %v763_v34 = vrot.slane %v8761_v31, 4  ;;  %v772_v35 = vmul.f32 %v8761_v31, %v8761_v31 }
  0xed   : > { %v748_v32 = vadd.f32 %v747_v24, %v746_v20  ;;  %v775_v33 = vrot.slane %v774_v25, 2  ;;  %v754_v36 = vadd.f32 %v753_v27, %v752_v22  ;;  %v781_v37 = vrot.slane %v780_v28, 2 }
  0xee   : > { %v758_v38 = vadd.f32 %v757_v29, %v8756_v26  ;;  %v785_v39 = vrot.slane %v771_v30, 4  ;;  %v622_v40 = vpop.f32.mrf.mxu0  ;;  %v764_v41 = vadd.f32 %v763_v34, %v8761_v31  ;;  %v791_v42 = vrot.slane %v772_v35, 4  ;;  %v635_v43 = vpop.f32.mrf.mxu1 }
  0xef   : > { %v749_v44 = vrot.slane %v748_v32, 1  ;;  %v776_v45 = vadd.f32 %v775_v33, %v774_v25  ;;  %v755_v48 = vrot.slane %v754_v36, 1  ;;  %v782_v49 = vadd.f32 %v781_v37, %v780_v28  ;;  %v739_v37 = vld [vmem:[#allocation10 + $0x60] sm:$0xff]  ;;  %v742_v40 = vld [vmem:[#allocation10 + $0x78] sm:$0xff]  ;;  %v736_v43 = vld [vmem:[#allocation10 + $0x48] sm:$0xff] }
  0xf0   : > { %v759_v46 = vrot.slane %v758_v38, 2  ;;  %v786_v47 = vadd.f32 %v785_v39, %v771_v30  ;;  %v765_v50 = vrot.slane %v764_v41, 2  ;;  %v792_v51 = vadd.f32 %v791_v42, %v772_v35  ;;  %v741_v39 = vld [vmem:[#allocation10 + $0x70] sm:$0xff]  ;;  %935 = vmatpush.msra.mxu0 %v739_v37  ;;  %995 = vmatpush.msra.mxu3 %v742_v40  ;;  %v735_v42 = vld [vmem:[#allocation10 + $0x40] sm:$0xff] }
  0xf1   : > { %v750_v52 = vadd.f32 %v749_v44, %v748_v32  ;;  %v777_v53 = vrot.slane %v776_v45, 1  ;;  %v756_v56 = vadd.f32 %v755_v48, %v754_v36  ;;  %v783_v57 = vrot.slane %v782_v49, 1  ;;  %975 = vmatpush.msra.mxu2 %v741_v39  ;;  %v737_v44 = vld [vmem:[#allocation10 + $0x50] sm:$0xff]  ;;  %v7522_v39 = vld [vmem:[#allocation11 + $0x75c] sm:$0xf0] }
  0xf2   : > { %v760_v54 = vadd.f32 %v759_v46, %v758_v38  ;;  %v787_v55 = vrot.slane %v786_v47, 2  ;;  %v766_v58 = vadd.f32 %v765_v50, %v764_v41  ;;  %v793_v59 = vrot.slane %v792_v51, 2  ;;  %v648_v60 = vpop.f32.mrf.mxu2  ;;  %v740_v38 = vld [vmem:[#allocation10 + $0x68] sm:$0xff]  ;;  %936 = vmatpush.msra.mxu0 %v735_v42  ;;  %v731_v46 = vld [vmem:[#allocation10 + $0x20] sm:$0xff]  ;;  %v733_v48 = vld [vmem:[#allocation10 + $0x30] sm:$0xff] }
  0xf3   : > { %v778_v61 = vadd.f32 %v777_v53, %v776_v45  ;;  %v661_v62 = vpop.f32.mrf.mxu3  ;;  %v784_v63 = vadd.f32 %v783_v57, %v782_v49  ;;  %7887 = vrcp.f32 %v8307_v15  ;;  %955 = vmatpush.msra.mxu1 %v740_v38  ;;  %v738_v45 = vld [vmem:[#allocation10 + $0x58] sm:$0xff]  ;;  %976 = vmatpush.msra.mxu2 %v737_v44  ;;  %v727_v50 = vld [vmem:[#allocation10] sm:$0xff] }
  0xf4   : > { %v761_v0 = vrot.slane %v760_v54, 1  ;;  %v788_v1 = vadd.f32 %v787_v55, %v786_v47  ;;  %v767_v3 = vrot.slane %v766_v58, 1  ;;  %v794_v4 = vadd.f32 %v793_v59, %v792_v51  ;;  %996 = vmatpush.msra.mxu3 %v738_v45  ;;  %v732_v47 = vld [vmem:[#allocation10 + $0x28] sm:$0xff]  ;;  %937 = vmatpush.msra.mxu0 %v731_v46  ;;  %v734_v49 = vld [vmem:[#allocation10 + $0x38] sm:$0xff]  ;;  %v7346_v55 = vld [vmem:[#allocation11 + $0x1dc] sm:$0xf0] }
  0xf5   : > { %v798_v2 = vsel %vm797_vm1, %v750_v52, %v778_v61  ;;  %v799_v5 = vsel %vm797_vm1, %v756_v56, %v784_v63  ;;  %956 = vmatpush.msra.mxu1 %v736_v43  ;;  %v728_v51 = vld [vmem:[#allocation10 + $0x8] sm:$0xff]  ;;  %977 = vmatpush.msra.mxu2 %v733_v48  ;;  %v729_v52 = vld [vmem:[#allocation10 + $0x10] sm:$0xff]  ;;  %v730_v53 = vld [vmem:[#allocation10 + $0x18] sm:$0xff] }
  0xf6   : > { %818 = vmatmul.f32.vlgmr.msrb.gmra.mxu0 %v798_v2  ;;  %v789_v6 = vrot.slane %v788_v1, 1  ;;  %838 = vmatmul.f32.vlgmr.msrb.gmra.mxu1 %v799_v5  ;;  %v795_v7 = vrot.slane %v794_v4, 1  ;;  %v762_v8 = vadd.f32 %v761_v0, %v760_v54  ;;  %v768_v10 = vadd.f32 %v767_v3, %v766_v58  ;;  %v5704_v54 = vld [vmem:[#allocation11 + $0x1c0] sm:$0xf]  ;;  %v5706_v37 = vld [vmem:[#allocation11 + $0x1e0] sm:$0xf0] }
  0xf7   : > { %957 = vmatpush.msra.mxu1 %v732_v47  ;;  %997 = vmatpush.msra.mxu3 %v734_v49  ;;  %v5960_v56 = vld [vmem:[#allocation11 + $0x3c0] sm:$0xf]  ;;  %v5705_v57 = vor.u32 %v7346_v55, %v5704_v54 }
  0xf8   : > { %v790_v9 = vadd.f32 %v789_v6, %v788_v1  ;;  %v796_v11 = vadd.f32 %v795_v7, %v794_v4  ;;  %938 = vmatpush.msra.mxu0 %v727_v50  ;;  %978 = vmatpush.msra.mxu2 %v729_v52  ;;  %v7410_v58 = vld [vmem:[#allocation11 + $0x3dc] sm:$0xf0] }
  0xf9   : > { %v7888_v16 = vpop.eup %7887  ;;  %958 = vmatpush.msra.mxu1 %v728_v51  ;;  %998 = vmatpush.msra.mxu3 %v730_v53  ;;  %v5672_v59 = vld [vmem:[#allocation11 + $0x180] sm:$0xf]  ;;  %v5961_v62 = vor.u32 %v7410_v58, %v5960_v56 }
  0xfa   : > { %v800_v12 = vsel %vm797_vm1, %v762_v8, %v790_v9  ;;  %v801_v13 = vsel %vm797_vm1, %v768_v10, %v796_v11  ;;  %v883_v18 = vmul.f32 32.0, %v7888_v16  ;;  %vm887_vm2 = vweird.f32 %v7888_v16  ;;  %v7338_v60 = vld [vmem:[#allocation11 + $0x19c] sm:$0xf0]  ;;  %2567 = vmatpush.bf16.msrb.mxu0 %v5705_v57 }
  0xfb   : > { %858 = vmatmul.f32.vlgmr.msrb.gmra.mxu2 %v800_v12  ;;  %878 = vmatmul.f32.vlgmr.msrb.gmra.mxu3 %v801_v13  ;;  %v5928_v63 = vld [vmem:[#allocation11 + $0x380] sm:$0xf]  ;;  %v5673_v3 = vor.u32 %v7338_v60, %v5672_v59 }
  0xfc   : > { %v884_v19 = vsub.f32 1.0, %v883_v18  ;;  %v7402_v0 = vld [vmem:[#allocation11 + $0x39c] sm:$0xf0]  ;;  %2580 = vmatpush.bf16.msrb.mxu1 %v5961_v62 }
  0xfd   : > { %v6216_v1 = vld [vmem:[#allocation11 + $0x5c0] sm:$0xf]  ;;  %v5929_v7 = vor.u32 %v7402_v0, %v5928_v63 }
  0xfe   : > { %v885_v20 = vmul.f32 %v7888_v16, %v884_v19  ;;  %v7474_v4 = vld [vmem:[#allocation11 + $0x5dc] sm:$0xf0]  ;;  %2568 = vmatpush.bf16.msrb.mxu0 %v5673_v3 }
  0xff   : > { %v6472_v5 = vld [vmem:[#allocation11 + $0x7c0] sm:$0xf]  ;;  %v6217_v8 = vor.u32 %v7474_v4, %v6216_v1 }
 0x100   : > { %v886_v23 = vadd.f32 %v7888_v16, %v885_v20  ;;  %v7538_v6 = vld [vmem:[#allocation11 + $0x7dc] sm:$0xf0]  ;;  %2581 = vmatpush.bf16.msrb.mxu1 %v5929_v7 }
 0x101   : > { %v6473_v9 = vor.u32 %v7538_v6, %v6472_v5  ;;  %v5640_v10 = vld [vmem:[#allocation11 + $0x140] sm:$0xf]  ;;  %2593 = vmatpush.bf16.msrb.mxu2 %v6217_v8 }
 0x102   : > { %v888_v29 = vsel %vm887_vm2, %v7888_v16, %v886_v23  ;;  %v7330_v11 = vld [vmem:[#allocation11 + $0x15c] sm:$0xf0] }
 0x103   : > { %v5896_v13 = vld [vmem:[#allocation11 + $0x340] sm:$0xf]  ;;  %2606 = vmatpush.bf16.msrb.mxu3 %v6473_v9 }
 0x104   : > { %v7394_v15 = vld [vmem:[#allocation11 + $0x35c] sm:$0xf0] }
 0x105   : > { %v6184_v16 = vld [vmem:[#allocation11 + $0x580] sm:$0xf] }
 0x106   : > { %v7466_v18 = vld [vmem:[#allocation11 + $0x59c] sm:$0xf0] }
 0x107   : > { %v6440_v19 = vld [vmem:[#allocation11 + $0x780] sm:$0xf]  ;;  %v6185_v23 = vor.u32 %v7466_v18, %v6184_v16  ;;  %v744_v16 = vld [vmem:[#allocation8] sm:$0x1] }
 0x108   : > { %v7530_v20 = vld [vmem:[#allocation11 + $0x79c] sm:$0xf0] }
 0x109   : > { %2594 = vmatpush.bf16.msrb.mxu2 %v6185_v23  ;;  %v5576_v44 = vld [vmem:[#allocation11 + $0xc0] sm:$0xf] }
 0x10a   : > { %v7314_v45 = vld [vmem:[#allocation11 + $0xdc] sm:$0xf0] }
 0x10b   : > { %v7450_v47 = vld [vmem:[#allocation11 + $0x51c] sm:$0xf0]  ;;  %v5577_v56 = vor.u32 %v7314_v45, %v5576_v44 }
 0x10c   : > { %v6376_v48 = vld [vmem:[#allocation11 + $0x700] sm:$0xf] }
 0x10d   : > { %v7514_v49 = vld [vmem:[#allocation11 + $0x71c] sm:$0xf0] }
 0x10e   : > { %v5832_v51 = vld [vmem:[#allocation11 + $0x2c0] sm:$0xf]  ;;  %v6377_v54 = vor.u32 %v7514_v49, %v6376_v48  ;;  %v6218_v49 = vld [vmem:[#allocation11 + $0x5e0] sm:$0xf0] }
 0x10f   : > { %v7378_v52 = vld [vmem:[#allocation11 + $0x2dc] sm:$0xf0] }
 0x110   : > { %v6088_v55 = vld [vmem:[#allocation11 + $0x4c0] sm:$0xf]  ;;  %v5833_v60 = vor.u32 %v7378_v52, %v5832_v51  ;;  %v6474_v51 = vld [vmem:[#allocation11 + $0x7e0] sm:$0xf0] }
 0x111   : > { %v7442_v57 = vld [vmem:[#allocation11 + $0x4dc] sm:$0xf0] }
 0x112   : > { %v6344_v58 = vld [vmem:[#allocation11 + $0x6c0] sm:$0xf] }
 0x113   : > { %v7506_v59 = vld [vmem:[#allocation11 + $0x6dc] sm:$0xf0] }
 0x114   : > { %v5544_v62 = vld [vmem:[#allocation11 + $0x80] sm:$0xf]  ;;  %v6345_v3 = vor.u32 %v7506_v59, %v6344_v58  ;;  %v5930_v58 = vld [vmem:[#allocation11 + $0x3a0] sm:$0xf0] }
 0x115   : > { %v7306_v63 = vld [vmem:[#allocation11 + $0x9c] sm:$0xf0] }
 0x116   : > { %v5800_v0 = vld [vmem:[#allocation11 + $0x280] sm:$0xf]  ;;  %v5545_v5 = vor.u32 %v7306_v63, %v5544_v62 }
 0x117   : > { %v7370_v1 = vld [vmem:[#allocation11 + $0x29c] sm:$0xf0] }
 0x118   : > { %v6056_v4 = vld [vmem:[#allocation11 + $0x480] sm:$0xf]  ;;  %v5801_v9 = vor.u32 %v7370_v1, %v5800_v0  ;;  %v7462_v0 = vld [vmem:[#allocation11 + $0x584] sm:$0xf] }
 0x119   : > { %v7434_v6 = vld [vmem:[#allocation11 + $0x49c] sm:$0xf0]  ;;  %v6186_v1 = vld [vmem:[#allocation11 + $0x5a0] sm:$0xf0] }
 0x11a   : > { %v6312_v7 = vld [vmem:[#allocation11 + $0x680] sm:$0xf] }
 0x11b   : > { %v7498_v8 = vld [vmem:[#allocation11 + $0x69c] sm:$0xf0] }
 0x11c   : > { %v7426_v23 = vld [vmem:[#allocation11 + $0x45c] sm:$0xf0] }
 0x11d   : > { %v7418_v44 = vld [vmem:[#allocation11 + $0x41c] sm:$0xf0] }
 0x11e   : > { %v6248_v45 = vld [vmem:[#allocation11 + $0x600] sm:$0xf] }
 0x173   : > { %v819_v21 = vpop.f32.mrf.mxu0  ;;  %v839_v22 = vpop.f32.mrf.mxu1 }
 0x174   : > { %v840_v24 = vadd.f32 %v839_v22, %v819_v21  ;;  %v5641_v22 = vor.u32 %v7330_v11, %v5640_v10  ;;  %v5512_v10 = vld [vmem:[#allocation11 + $0x40] sm:$0xf] }
 0x175   : > { %v7298_v11 = vld [vmem:[#allocation11 + $0x5c] sm:$0xf0] }
 0x176   : > { %2569 = vmatpush.bf16.msrb.mxu0 %v5641_v22  ;;  %v5513_v22 = vor.u32 %v7298_v11, %v5512_v10  ;;  %v7454_v11 = vld [vmem:[#allocation11 + $0x544] sm:$0xf] }
 0x17e   : > { %v859_v25 = vpop.f32.mrf.mxu2  ;;  %v879_v28 = vpop.f32.mrf.mxu3 }
 0x17f   : > { %v860_v27 = vadd.f32 %v859_v25, %v840_v24  ;;  %v6441_v24 = vor.u32 %v7530_v20, %v6440_v19  ;;  %v5608_v25 = vld [vmem:[#allocation11 + $0x100] sm:$0xf]  ;;  %v6057_v19 = vor.u32 %v7434_v6, %v6056_v4  ;;  %v6313_v20 = vor.u32 %v7498_v8, %v6312_v7  ;;  %v5642_v6 = vld [vmem:[#allocation11 + $0x160] sm:$0xf0] }
 0x180   : > { %v7390_v7 = vld [vmem:[#allocation11 + $0x344] sm:$0xf] }
 0x181   : > { %v880_v30 = vadd.f32 %v879_v28, %v860_v27  ;;  %v7322_v27 = vld [vmem:[#allocation11 + $0x11c] sm:$0xf0]  ;;  %v5897_v28 = vor.u32 %v7394_v15, %v5896_v13  ;;  %2607 = vmatpush.bf16.msrb.mxu3 %v6441_v24  ;;  %v5898_v8 = vld [vmem:[#allocation11 + $0x360] sm:$0xf0] }
 0x182   : > { %v5609_v42 = vor.u32 %v7322_v27, %v5608_v25  ;;  %v5768_v13 = vld [vmem:[#allocation11 + $0x240] sm:$0xf] }
 0x183   : > { %v8772_v32 = vmul.f32 %v888_v29, %v880_v30  ;;  %v5864_v29 = vld [vmem:[#allocation11 + $0x300] sm:$0xf]  ;;  %2582 = vmatpush.bf16.msrb.mxu1 %v5897_v28 }
 0x184   : > { %v7386_v30 = vld [vmem:[#allocation11 + $0x31c] sm:$0xf0]  ;;  %2570 = vmatpush.bf16.msrb.mxu0 %v5609_v42 }
 0x185   : > { %v890_v33 = vmul.f32 %v8772_v32, %v8772_v32  ;;  %v5865_v46 = vor.u32 %v7386_v30, %v5864_v29  ;;  %v7362_v15 = vld [vmem:[#allocation11 + $0x25c] sm:$0xf0] }
 0x186   : > { %v6280_v24 = vld [vmem:[#allocation11 + $0x640] sm:$0xf]  ;;  %v5769_v28 = vor.u32 %v7362_v15, %v5768_v13  ;;  %v7518_v13 = vld [vmem:[#allocation11 + $0x744] sm:$0xf] }
 0x187   : > { %v892_v34 = vrot.slane %v890_v33, 7  ;;  %v6152_v33 = vld [vmem:[#allocation11 + $0x540] sm:$0xf]  ;;  %2583 = vmatpush.bf16.msrb.mxu1 %v5865_v46  ;;  %v7470_v46 = vld [vmem:[#allocation11 + $0x5c4] sm:$0xf] }
 0x188   : > { %2571 = vmatpush.bf16.msrb.mxu0 %v5577_v56  ;;  %v7490_v25 = vld [vmem:[#allocation11 + $0x65c] sm:$0xf0]  ;;  %v5674_v56 = vld [vmem:[#allocation11 + $0x1a0] sm:$0xf0]  ;;  %v6221_v62 = vor.u32 %v7470_v46, %v6218_v49 }
 0x189   : > { %v894_v35 = vsub.f32 %v8772_v32, %v892_v34  ;;  %v5480_v29 = vld [vmem:[#allocation11] sm:$0xf]  ;;  %v6281_v42 = vor.u32 %v7490_v25, %v6280_v24  ;;  %v6410_v15 = vld [vmem:[#allocation11 + $0x760] sm:$0xf0] }
 0x18a   : > { %v7290_v30 = vld [vmem:[#allocation11 + $0x1c] sm:$0xf0]  ;;  %v6413_v24 = vor.u32 %v7518_v13, %v6410_v15  ;;  %v7502_v49 = vld [vmem:[#allocation11 + $0x6c4] sm:$0xf] }
 0x18b   : > { %v895_v36 = vmax.f32 %v894_v35, 0.0  ;;  %v7458_v35 = vld [vmem:[#allocation11 + $0x55c] sm:$0xf0]  ;;  %2584 = vmatpush.bf16.msrb.mxu1 %v5833_v60  ;;  %v7414_v13 = vld [vmem:[#allocation11 + $0x404] sm:$0xf] }
 0x18c   : > { %v6153_v38 = vor.u32 %v7458_v35, %v6152_v33  ;;  %2572 = vmatpush.bf16.msrb.mxu0 %v5545_v5  ;;  %v5736_v33 = vld [vmem:[#allocation11 + $0x200] sm:$0xf]  ;;  %v7342_v35 = vld [vmem:[#allocation11 + $0x1c4] sm:$0xf] }
 0x18d   : > { %v8777_v41 = vadd.f32 1e-05, %v895_v36  ;;  %v6408_v36 = vld [vmem:[#allocation11 + $0x740] sm:$0xf]  ;;  %v7326_v5 = vld [vmem:[#allocation11 + $0x144] sm:$0xf] }
 0x18e   : > { %v6409_v43 = vor.u32 %v7522_v39, %v6408_v36  ;;  %2595 = vmatpush.bf16.msrb.mxu2 %v6153_v38  ;;  %v7406_v38 = vld [vmem:[#allocation11 + $0x3c4] sm:$0xf] }
 0x18f   : > { %7889 = vrsqrt.f32 %v8777_v41  ;;  %vm903_vm4 = vweird.f32 %v8777_v41  ;;  %2585 = vmatpush.bf16.msrb.mxu1 %v5801_v9  ;;  %v5962_v39 = vld [vmem:[#allocation11 + $0x3e0] sm:$0xf0]  ;;  %v6189_v9 = vor.u32 %v7462_v0, %v6186_v1 }
 0x190   : > { %2608 = vmatpush.bf16.msrb.mxu3 %v6409_v43  ;;  %2573 = vmatpush.bf16.msrb.mxu0 %v5513_v22  ;;  %v5992_v43 = vld [vmem:[#allocation11 + $0x400] sm:$0xf]  ;;  %v5866_v22 = vld [vmem:[#allocation11 + $0x320] sm:$0xf0] }
 0x191   : > { %v5993_v59 = vor.u32 %v7418_v44, %v5992_v43  ;;  %v7302_v43 = vld [vmem:[#allocation11 + $0x84] sm:$0xf] }
 0x192   : > { %v5546_v44 = vld [vmem:[#allocation11 + $0xa0] sm:$0xf0] }
 0x193   : > { %2586 = vmatpush.bf16.msrb.mxu1 %v5769_v28  ;;  %v7310_v28 = vld [vmem:[#allocation11 + $0xc4] sm:$0xf] }
 0x194   : > { %2609 = vmatpush.bf16.msrb.mxu3 %v6377_v54  ;;  %v5965_v54 = vor.u32 %v7406_v38, %v5962_v39  ;;  %v7510_v38 = vld [vmem:[#allocation11 + $0x704] sm:$0xf] }
 0x195   : > { %v8780_v61 = vpop.eup %7889  ;;  %v6314_v0 = vld [vmem:[#allocation11 + $0x6a0] sm:$0xf0] }
 0x196   : > { %v898_v2 = vmul.f32 %v8780_v61, %v8777_v41  ;;  %vm904_vm3 = vweird.f32 %v8780_v61  ;;  %v6120_v41 = vld [vmem:[#allocation11 + $0x500] sm:$0xf]  ;;  %v5994_v15 = vld [vmem:[#allocation11 + $0x420] sm:$0xf0] }
 0x197   : > { %vm8789_vm5 = vmor %vm903_vm4, %vm904_vm3  ;;  %v6121_v53 = vor.u32 %v7450_v47, %v6120_v41  ;;  %v7482_v41 = vld [vmem:[#allocation11 + $0x61c] sm:$0xf0]  ;;  %v5481_v47 = vor.u32 %v7290_v30, %v5480_v29  ;;  %v5578_v29 = vld [vmem:[#allocation11 + $0xe0] sm:$0xf0] }
 0x198   : > { %v899_v12 = vmul.f32 %v8780_v61, %v898_v2  ;;  %v6089_v2 = vor.u32 %v7442_v57, %v6088_v55  ;;  %2610 = vmatpush.bf16.msrb.mxu3 %v6345_v3  ;;  %v7334_v55 = vld [vmem:[#allocation11 + $0x184] sm:$0xf]  ;;  %v6249_v60 = vor.u32 %v7482_v41, %v6248_v45 }
 0x199   : > { %2596 = vmatpush.bf16.msrb.mxu2 %v6121_v53  ;;  %v5709_v53 = vor.u32 %v7342_v35, %v5706_v37  ;;  %v7398_v57 = vld [vmem:[#allocation11 + $0x384] sm:$0xf]  ;;  %2574 = vmatpush.bf16.msrb.mxu0 %v5481_v47  ;;  %v5677_v3 = vor.u32 %v7334_v55, %v5674_v56 }
 0x19a   : > { %v900_v21 = vmul.f32 0.5, %v899_v12  ;;  %v5933_v4 = vor.u32 %v7398_v57, %v5930_v58  ;;  %v7374_v30 = vld [vmem:[#allocation11 + $0x2c4] sm:$0xf] }
 0x19b   : > { %v6122_v37 = vld [vmem:[#allocation11 + $0x520] sm:$0xf0] }
 0x19c   : > { %v901_v34 = vsub.f32 1.5, %v900_v21  ;;  %v6024_v21 = vld [vmem:[#allocation11 + $0x440] sm:$0xf]  ;;  %2611 = vmatpush.bf16.msrb.mxu3 %v6313_v20  ;;  %v5610_v20 = vld [vmem:[#allocation11 + $0x120] sm:$0xf0] }
 0x19d   : > { %2597 = vmatpush.bf16.msrb.mxu2 %v6089_v2  ;;  %v6442_v2 = vld [vmem:[#allocation11 + $0x7a0] sm:$0xf0] }
 0x19e   : > { %v902_v40 = vmul.f32 %v8780_v61, %v901_v34  ;;  %v7354_v34 = vld [vmem:[#allocation11 + $0x21c] sm:$0xf0]  ;;  %v7366_v45 = vld [vmem:[#allocation11 + $0x284] sm:$0xf] }
 0x19f   : > { %v5737_v48 = vor.u32 %v7354_v34, %v5736_v33  ;;  %v5581_v33 = vor.u32 %v7310_v28, %v5578_v29  ;;  %v5834_v34 = vld [vmem:[#allocation11 + $0x2e0] sm:$0xf0] }
 0x1a0   : > { %v906_v50 = vsel %vm8789_vm5, %v8780_v61, %v902_v40  ;;  %v743_v61 = vld [vmem:[#allocation7] sm:$0x1]  ;;  %v6025_v40 = vor.u32 %v7426_v23, %v6024_v21  ;;  %2612 = vmatpush.bf16.msrb.mxu3 %v6281_v42  ;;  %v7382_v21 = vld [vmem:[#allocation11 + $0x304] sm:$0xf]  ;;  %v5837_v35 = vor.u32 %v7374_v30, %v5834_v34  ;;  %v8308_v34 = vmov 0.0  }
 0x1a1   : > { %908 = vst [vmem:[#allocation1] sm:$0xff] %v906_v50  ;;  %2598 = vmatpush.bf16.msrb.mxu2 %v6057_v19  ;;  %v7534_v50 = vld [vmem:[#allocation11 + $0x7c4] sm:$0xf]  ;;  %2587 = vmatpush.bf16.msrb.mxu1 %v5737_v48 }
 0x1a2   : > { %v6477_v63 = vor.u32 %v7534_v50, %v6474_v51  ;;  %v7318_v19 = vld [vmem:[#allocation11 + $0x104] sm:$0xf] }
 0x1a3   : > { %v5613_v25 = vor.u32 %v7318_v19, %v5610_v20  ;;  %v5802_v41 = vld [vmem:[#allocation11 + $0x2a0] sm:$0xf0] }
 0x1a4   : > { %2613 = vmatpush.bf16.msrb.mxu3 %v6249_v60  ;;  %v5805_v46 = vor.u32 %v7366_v45, %v5802_v41  ;;  %v7438_v47 = vld [vmem:[#allocation11 + $0x4c4] sm:$0xf] }
 0x1a5   : > { %2599 = vmatpush.bf16.msrb.mxu2 %v6025_v40  ;;  %v6378_v40 = vld [vmem:[#allocation11 + $0x720] sm:$0xf0] }
 0x1a6   : > { %v6381_v42 = vor.u32 %v7510_v38, %v6378_v40  ;;  %v6090_v48 = vld [vmem:[#allocation11 + $0x4e0] sm:$0xf0]  ;;  %v5712_v38 = vld [vmem:[#allocation11 + $0x1c8] sm:$0xf] }
 0x1a7   : > { %v6093_v50 = vor.u32 %v7438_v47, %v6090_v48  ;;  %v6346_v51 = vld [vmem:[#allocation11 + $0x6e0] sm:$0xf0]  ;;  %v5968_v40 = vld [vmem:[#allocation11 + $0x3c8] sm:$0xf] }
 0x1a8   : > { %v910_v12 = vld [vmem:[#allocation1 + $0x1] ss:$9 sm:$0xff]  ;;  %v7358_v55 = vld [vmem:[#allocation11 + $0x244] sm:$0xf] }
 0x1a9   : > { %v912_v18 = vmul.f32 %v910_v12, %v743_v61  ;;  %v7526_v61 = vld [vmem:[#allocation11 + $0x784] sm:$0xf]  ;;  %2600 = vmatpush.bf16.msrb.mxu2 %v5993_v59 }
 0x1aa   : > { %v6445_v10 = vor.u32 %v7526_v61, %v6442_v2  ;;  %v6154_v12 = vld [vmem:[#allocation11 + $0x560] sm:$0xf0] }
 0x1ab   : > { %v913_v27 = vmul.f32 %v912_v18, %v8772_v32  ;;  %v6157_v23 = vor.u32 %v7454_v11, %v6154_v12  ;;  %v5770_v57 = vld [vmem:[#allocation11 + $0x260] sm:$0xf0] }
 0x1ac   : > { %v5773_v58 = vor.u32 %v7358_v55, %v5770_v57  ;;  %v7430_v59 = vld [vmem:[#allocation11 + $0x484] sm:$0xf]  ;;  %v5936_v57 = vld [vmem:[#allocation11 + $0x388] sm:$0xf] }
 0x1ad   : > { %v914_v36 = vsub.f32 %v744_v16, %v913_v27  ;;  %v5645_v16 = vor.u32 %v7326_v5, %v5642_v6  ;;  %v5869_v27 = vor.u32 %v7382_v21, %v5866_v22  ;;  %v6058_v60 = vld [vmem:[#allocation11 + $0x4a0] sm:$0xf0]  ;;  %v576_v21 = vlaneseq }
 0x1ae   : > { %v7286_v61 = vld [vmem:[#allocation11 + $0x4] sm:$0xf] }
 0x1af   : > { %v916_v32 = vperm.slane %v914_v36, 0  ;;  %v7446_v36 = vld [vmem:[#allocation11 + $0x504] sm:$0xf]  ;;  %v577_v22 = vshrl.u32 %v576_v21, 7  ;;  %v5616_v21 = vld [vmem:[#allocation11 + $0x108] sm:$0xf] }
 0x1b0   : > { %v6125_v39 = vor.u32 %v7446_v36, %v6122_v37  ;;  %v5482_v2 = vld [vmem:[#allocation11 + $0x20] sm:$0xf0] }
 0x1b1   : > { %v918_v52 = vsel %vm797_vm1, %v912_v18, %v916_v32  ;;  %v5901_v18 = vor.u32 %v7390_v7, %v5898_v8  ;;  %v5549_v32 = vor.u32 %v7302_v43, %v5546_v44  ;;  %v5738_v5 = vld [vmem:[#allocation11 + $0x220] sm:$0xf0]  ;;  %vm578_vm7 = vcmp.lt.s32.totalorder %v577_v22, 2  ;;  %v7323_v22 = vld [vmem:[#allocation11 + $0x124] sm:$0xf0] }
 0x1b2   : > { %5474 = vmatmul.msk.f32.vlgmr.msra.gmra.mxu0 %vm919_vm6, %v918_v52  ;;  %5475 = vmatmul.msk.f32.vlgmr.msra.gmra.mxu1 %vm919_vm6, %v918_v52  ;;  %v7422_v7 = vld [vmem:[#allocation11 + $0x444] sm:$0xf] }
 0x1b3   : > { %5476 = vmatmul.msk.f32.vlgmr.msra.gmra.mxu2 %vm919_vm6, %v918_v52  ;;  %5477 = vmatmul.msk.f32.vlgmr.msra.gmra.mxu3 %vm919_vm6, %v918_v52  ;;  %v6349_v52 = vor.u32 %v7502_v49, %v6346_v51  ;;  %v6026_v8 = vld [vmem:[#allocation11 + $0x460] sm:$0xf0] }
 0x1b4   : > { %2619 = vmatpush.bf16.msra.mxu0 %v5709_v53  ;;  %2632 = vmatpush.bf16.msra.mxu1 %v5965_v54  ;;  %v7294_v53 = vld [vmem:[#allocation11 + $0x44] sm:$0xf]  ;;  %v6029_v11 = vor.u32 %v7422_v7, %v6026_v8 }
 0x1b5   : > { %2645 = vmatpush.bf16.msra.mxu2 %v6221_v62  ;;  %2658 = vmatpush.bf16.msra.mxu3 %v6477_v63  ;;  %v5514_v54 = vld [vmem:[#allocation11 + $0x60] sm:$0xf0]  ;;  %v6061_v63 = vor.u32 %v7430_v59, %v6058_v60 }
 0x1b6   : > { %v5517_v56 = vor.u32 %v7294_v53, %v5514_v54  ;;  %v7494_v62 = vld [vmem:[#allocation11 + $0x684] sm:$0xf]  ;;  %v5680_v53 = vld [vmem:[#allocation11 + $0x188] sm:$0xf] }
 0x1b7   : > { %v6317_v1 = vor.u32 %v7494_v62, %v6314_v0  ;;  %v6250_v19 = vld [vmem:[#allocation11 + $0x620] sm:$0xf0]  ;;  %v6224_v62 = vld [vmem:[#allocation11 + $0x5c8] sm:$0xf] }
 0x1b8   : > { %2620 = vmatpush.bf16.msra.mxu0 %v5677_v3  ;;  %2633 = vmatpush.bf16.msra.mxu1 %v5933_v4  ;;  %v7350_v3 = vld [vmem:[#allocation11 + $0x204] sm:$0xf]  ;;  %v5485_v4 = vor.u32 %v7286_v61, %v5482_v2  ;;  %v7539_v0 = vld [vmem:[#allocation11 + $0x7e4] sm:$0xf0] }
 0x1b9   : > { %2646 = vmatpush.bf16.msra.mxu2 %v6189_v9  ;;  %2659 = vmatpush.bf16.msra.mxu3 %v6445_v10  ;;  %v5741_v6 = vor.u32 %v7350_v3, %v5738_v5  ;;  %v7486_v9 = vld [vmem:[#allocation11 + $0x644] sm:$0xf]  ;;  %v5648_v3 = vld [vmem:[#allocation11 + $0x148] sm:$0xf] }
 0x1ba   : > { %v6282_v10 = vld [vmem:[#allocation11 + $0x660] sm:$0xf0]  ;;  %v5904_v5 = vld [vmem:[#allocation11 + $0x348] sm:$0xf] }
 0x1bb   : > { %v6285_v12 = vor.u32 %v7486_v9, %v6282_v10 }
 0x1bc   : > { %2621 = vmatpush.bf16.msra.mxu0 %v5645_v16  ;;  %2634 = vmatpush.bf16.msra.mxu1 %v5901_v18  ;;  %v5997_v16 = vor.u32 %v7414_v13, %v5994_v15  ;;  %v7478_v18 = vld [vmem:[#allocation11 + $0x604] sm:$0xf]  ;;  %v7467_v13 = vld [vmem:[#allocation11 + $0x5a4] sm:$0xf0] }
 0x1bd   : > { %2647 = vmatpush.bf16.msra.mxu2 %v6157_v23  ;;  %2660 = vmatpush.bf16.msra.mxu3 %v6413_v24  ;;  %v6253_v20 = vor.u32 %v7478_v18, %v6250_v19  ;;  %v6448_v19 = vld [vmem:[#allocation11 + $0x788] sm:$0xf] }
 0x1c0   : > { %2622 = vmatpush.bf16.msra.mxu0 %v5613_v25  ;;  %2635 = vmatpush.bf16.msra.mxu1 %v5869_v27 }
 0x1c1   : > { %2648 = vmatpush.bf16.msra.mxu2 %v6125_v39  ;;  %2661 = vmatpush.bf16.msra.mxu3 %v6381_v42  ;;  %v7347_v39 = vld [vmem:[#allocation11 + $0x1e4] sm:$0xf0] }
 0x1c2   : > { %v7411_v42 = vld [vmem:[#allocation11 + $0x3e4] sm:$0xf0]  ;;  %v5713_v47 = vor.u32 %v7347_v39, %v5712_v38 }
 0x1c3   : > { %v5969_v48 = vor.u32 %v7411_v42, %v5968_v40  ;;  %v7315_v38 = vld [vmem:[#allocation11 + $0xe4] sm:$0xf0] }
 0x1c4   : > { %2623 = vmatpush.bf16.msra.mxu0 %v5581_v33  ;;  %2636 = vmatpush.bf16.msra.mxu1 %v5837_v35  ;;  %v8805_v35 = vsel %vm578_vm7, 1.0, %v8308_v34  ;;  %v6416_v34 = vld [vmem:[#allocation11 + $0x748] sm:$0xf] }
 0x1c5   : > { %2649 = vmatpush.bf16.msra.mxu2 %v6093_v50  ;;  %2662 = vmatpush.bf16.msra.mxu3 %v6349_v52  ;;  %v5840_v39 = vld [vmem:[#allocation11 + $0x2c8] sm:$0xf] }
 0x1c6   : > { %v7379_v40 = vld [vmem:[#allocation11 + $0x2e4] sm:$0xf0] }
 0x1c8   : > { %2624 = vmatpush.bf16.msra.mxu0 %v5549_v32  ;;  %2637 = vmatpush.bf16.msra.mxu1 %v5805_v46 }
 0x1c9   : > { %2650 = vmatpush.bf16.msra.mxu2 %v6061_v63  ;;  %2663 = vmatpush.bf16.msra.mxu3 %v6317_v1  ;;  %v6480_v63 = vld [vmem:[#allocation11 + $0x7c8] sm:$0xf] }
 0x1ca   : > { %v6481_v10 = vor.u32 %v7539_v0, %v6480_v63  ;;  %v7363_v63 = vld [vmem:[#allocation11 + $0x264] sm:$0xf0] }
 0x1cc   : > { %2625 = vmatpush.bf16.msra.mxu0 %v5517_v56  ;;  %2638 = vmatpush.bf16.msra.mxu1 %v5773_v58  ;;  %v7339_v56 = vld [vmem:[#allocation11 + $0x1a4] sm:$0xf0] }
 0x1cd   : > { %2651 = vmatpush.bf16.msra.mxu2 %v6029_v11  ;;  %2664 = vmatpush.bf16.msra.mxu3 %v6285_v12  ;;  %v7403_v58 = vld [vmem:[#allocation11 + $0x3a4] sm:$0xf0]  ;;  %v5681_v61 = vor.u32 %v7339_v56, %v5680_v53 }
 0x1ce   : > { %v5937_v2 = vor.u32 %v7403_v58, %v5936_v57  ;;  %v6192_v12 = vld [vmem:[#allocation11 + $0x588] sm:$0xf] }
 0x1cf   : > { %v7443_v53 = vld [vmem:[#allocation11 + $0x4e4] sm:$0xf0] }
 0x1d0   : > { %2626 = vmatpush.bf16.msra.mxu0 %v5485_v4  ;;  %2639 = vmatpush.bf16.msra.mxu1 %v5741_v6  ;;  %v7331_v4 = vld [vmem:[#allocation11 + $0x164] sm:$0xf0] }
 0x1d1   : > { %2652 = vmatpush.bf16.msra.mxu2 %v5997_v16  ;;  %2665 = vmatpush.bf16.msra.mxu3 %v6253_v20  ;;  %v7395_v6 = vld [vmem:[#allocation11 + $0x364] sm:$0xf0]  ;;  %v5649_v11 = vor.u32 %v7331_v4, %v5648_v3 }
 0x1d2   : > { %v5905_v18 = vor.u32 %v7395_v6, %v5904_v5  ;;  %v7531_v20 = vld [vmem:[#allocation11 + $0x7a4] sm:$0xf0] }
 0x1d3   : > { %v6352_v56 = vld [vmem:[#allocation11 + $0x6c8] sm:$0xf] }
 0x1d4   : > { %v7507_v57 = vld [vmem:[#allocation11 + $0x6e4] sm:$0xf0] }
 0x1d5   : > { %v7499_v3 = vld [vmem:[#allocation11 + $0x6a4] sm:$0xf0] }
 0x1d6   : > { %v5488_v6 = vld [vmem:[#allocation11 + $0x8] sm:$0xf] }
 0x22f   : > { %v940_v23 = vpop.f32.mrf.mxu0  ;;  %v960_v24 = vpop.f32.mrf.mxu1 }
 0x230   : > { %v1003_v25 = vperm.slane %v940_v23, 0  ;;  %v1004_v27 = vperm.slane %v960_v24, 0  ;;  %v1011_v29 = vperm.slane %v940_v23, 1  ;;  %v1012_v33 = vperm.slane %v960_v24, 1  ;;  %v5872_v23 = vld [vmem:[#allocation11 + $0x308] sm:$0xf] }
 0x231   : > { %v7387_v24 = vld [vmem:[#allocation11 + $0x324] sm:$0xf0] }
 0x232   : > { %v1007_v28 = vmul.f32 %v1003_v25, %v8744_v14  ;;  %v1008_v30 = vmul.f32 %v1004_v27, %v8749_v17  ;;  %v6193_v25 = vor.u32 %v7467_v13, %v6192_v12  ;;  %v6449_v27 = vor.u32 %v7531_v20, %v6448_v19  ;;  %v5970_v19 = vld [vmem:[#allocation11 + $0x3e8] sm:$0xf0]  ;;  %v6032_v20 = vld [vmem:[#allocation11 + $0x448] sm:$0xf] }
 0x234   : > { %v1015_v36 = vadd.f32 %v1011_v29, %v1007_v28  ;;  %v1016_v37 = vadd.f32 %v1012_v33, %v1008_v30  ;;  %v6160_v28 = vld [vmem:[#allocation11 + $0x548] sm:$0xf]  ;;  %v5617_v29 = vor.u32 %v7323_v22, %v5616_v21  ;;  %v5873_v30 = vor.u32 %v7387_v24, %v5872_v23 }
 0x235   : > { %v7459_v33 = vld [vmem:[#allocation11 + $0x564] sm:$0xf0] }
 0x236   : > { %v1019_v43 = vmax.f32 %v1015_v36, 0.0  ;;  %v1020_v44 = vmax.f32 %v1016_v37, 0.0  ;;  %v980_v45 = vpop.f32.mrf.mxu2  ;;  %v1000_v32 = vpop.f32.mrf.mxu3  ;;  %v7523_v36 = vld [vmem:[#allocation11 + $0x764] sm:$0xf0]  ;;  %v6161_v42 = vor.u32 %v7459_v33, %v6160_v28  ;;  %v7399_v33 = vld [vmem:[#allocation11 + $0x38c] sm:$0xf] }
 0x237   : > { %v1005_v41 = vperm.slane %v980_v45, 0  ;;  %v1006_v46 = vperm.slane %v1000_v32, 0  ;;  %v1013_v50 = vperm.slane %v980_v45, 1  ;;  %v1014_v52 = vperm.slane %v1000_v32, 1  ;;  %v5584_v37 = vld [vmem:[#allocation11 + $0xc8] sm:$0xf] }
 0x238   : > { %v1023_v14 = vmul.f32 %v8805_v35, %v1019_v43  ;;  %v1024_v17 = vmul.f32 %v8805_v35, %v1020_v44  ;;  %v6417_v43 = vor.u32 %v7523_v36, %v6416_v34  ;;  %v6128_v44 = vld [vmem:[#allocation11 + $0x508] sm:$0xf] }
 0x239   : > { %v1009_v49 = vmul.f32 %v1005_v41, %v8756_v26  ;;  %v1010_v51 = vmul.f32 %v1006_v46, %v8761_v31  ;;  %v7475_v26 = vld [vmem:[#allocation11 + $0x5e4] sm:$0xf0]  ;;  %v5585_v46 = vor.u32 %v7315_v38, %v5584_v37  ;;  %v5938_v37 = vld [vmem:[#allocation11 + $0x3a8] sm:$0xf0] }
 0x23a   : > { %v8811_v54 = vpack.c.bf16 %v1023_v14, %v1023_v14  ;;  %v8813_v55 = vpack.c.bf16 %v1024_v17, %v1024_v17  ;;  %v6225_v9 = vor.u32 %v7475_v26, %v6224_v62  ;;  %v7451_v45 = vld [vmem:[#allocation11 + $0x524] sm:$0xf0]  ;;  %v5841_v14 = vor.u32 %v7379_v40, %v5840_v39 }
 0x23b   : > { %v1017_v59 = vadd.f32 %v1013_v50, %v1009_v49  ;;  %v1018_v60 = vadd.f32 %v1014_v52, %v1010_v51  ;;  %v6384_v32 = vld [vmem:[#allocation11 + $0x708] sm:$0xf]  ;;  %v6129_v50 = vor.u32 %v7451_v45, %v6128_v44  ;;  %v6226_v44 = vld [vmem:[#allocation11 + $0x5e8] sm:$0xf0] }
 0x23c   : > { %2575 = vmatmul.bf16.vlgmr.msrb.gmra.mxu0 %v8811_v54  ;;  %2588 = vmatmul.bf16.vlgmr.msrb.gmra.mxu1 %v8813_v55  ;;  %v7515_v41 = vld [vmem:[#allocation11 + $0x724] sm:$0xf0]  ;;  %v7535_v45 = vld [vmem:[#allocation11 + $0x7cc] sm:$0xf] }
 0x23d   : > { %v1021_v31 = vmax.f32 %v1017_v59, 0.0  ;;  %v1022_v1 = vmax.f32 %v1018_v60, 0.0  ;;  %2671 = vmatpush.bf16.msrb.mxu0 %v5713_v47  ;;  %2684 = vmatpush.bf16.msrb.mxu1 %v5969_v48  ;;  %v5552_v17 = vld [vmem:[#allocation11 + $0x88] sm:$0xf]  ;;  %v6385_v51 = vor.u32 %v7515_v41, %v6384_v32  ;;  %v6482_v32 = vld [vmem:[#allocation11 + $0x7e8] sm:$0xf0] }
 0x23e   : > { %v7307_v47 = vld [vmem:[#allocation11 + $0xa4] sm:$0xf0] }
 0x23f   : > { %v1025_v7 = vmul.f32 %v8805_v35, %v1021_v31  ;;  %v1026_v8 = vmul.f32 %v8805_v35, %v1022_v1  ;;  %v5808_v48 = vld [vmem:[#allocation11 + $0x288] sm:$0xf]  ;;  %v5553_v58 = vor.u32 %v7307_v47, %v5552_v17  ;;  %v6353_v31 = vor.u32 %v7507_v57, %v6352_v56  ;;  %v6194_v56 = vld [vmem:[#allocation11 + $0x5a8] sm:$0xf0] }
 0x240   : > { %v7371_v49 = vld [vmem:[#allocation11 + $0x2a4] sm:$0xf0]  ;;  %v7527_v57 = vld [vmem:[#allocation11 + $0x78c] sm:$0xf] }
 0x241   : > { %v8819_v15 = vpack.c.bf16 %v1025_v7, %v1025_v7  ;;  %v8821_v16 = vpack.c.bf16 %v1026_v8, %v1026_v8  ;;  %2672 = vmatpush.bf16.msrb.mxu0 %v5681_v61  ;;  %2685 = vmatpush.bf16.msrb.mxu1 %v5937_v2  ;;  %v6096_v52 = vld [vmem:[#allocation11 + $0x4c8] sm:$0xf]  ;;  %v5809_v59 = vor.u32 %v7371_v49, %v5808_v48  ;;  %v5650_v48 = vld [vmem:[#allocation11 + $0x168] sm:$0xf0] }
 0x242   : > { %v5520_v60 = vld [vmem:[#allocation11 + $0x48] sm:$0xf]  ;;  %v6097_v0 = vor.u32 %v7443_v53, %v6096_v52  ;;  %v7391_v49 = vld [vmem:[#allocation11 + $0x34c] sm:$0xf]  ;;  %v6485_v52 = vor.u32 %v7535_v45, %v6482_v32 }
 0x243   : > { %2601 = vmatmul.bf16.vlgmr.msrb.gmra.mxu2 %v8819_v15  ;;  %2614 = vmatmul.bf16.vlgmr.msrb.gmra.mxu3 %v8821_v16  ;;  %v7299_v62 = vld [vmem:[#allocation11 + $0x64] sm:$0xf0]  ;;  %v7463_v53 = vld [vmem:[#allocation11 + $0x58c] sm:$0xf] }
 0x244   : > { %2697 = vmatpush.bf16.msrb.mxu2 %v6225_v9  ;;  %2710 = vmatpush.bf16.msrb.mxu3 %v6481_v10  ;;  %v5776_v26 = vld [vmem:[#allocation11 + $0x248] sm:$0xf]  ;;  %v5521_v4 = vor.u32 %v7299_v62, %v5520_v60  ;;  %v7343_v10 = vld [vmem:[#allocation11 + $0x1cc] sm:$0xf] }
 0x245   : > { %2673 = vmatpush.bf16.msrb.mxu0 %v5649_v11  ;;  %2686 = vmatpush.bf16.msrb.mxu1 %v5905_v18  ;;  %v6064_v1 = vld [vmem:[#allocation11 + $0x488] sm:$0xf]  ;;  %v5777_v5 = vor.u32 %v7363_v63, %v5776_v26  ;;  %v5714_v11 = vld [vmem:[#allocation11 + $0x1e8] sm:$0xf0] }
 0x246   : > { %v7435_v61 = vld [vmem:[#allocation11 + $0x4a4] sm:$0xf0]  ;;  %v7407_v18 = vld [vmem:[#allocation11 + $0x3cc] sm:$0xf] }
 0x247   : > { %v6320_v2 = vld [vmem:[#allocation11 + $0x688] sm:$0xf]  ;;  %v6065_v12 = vor.u32 %v7435_v61, %v6064_v1  ;;  %v5973_v28 = vor.u32 %v7407_v18, %v5970_v19  ;;  %v7319_v62 = vld [vmem:[#allocation11 + $0x10c] sm:$0xf] }
 0x248   : > { %2698 = vmatpush.bf16.msrb.mxu2 %v6193_v25  ;;  %2711 = vmatpush.bf16.msrb.mxu3 %v6449_v27  ;;  %v7291_v7 = vld [vmem:[#allocation11 + $0x24] sm:$0xf0]  ;;  %v6321_v13 = vor.u32 %v7499_v3, %v6320_v2  ;;  %v5717_v27 = vor.u32 %v7343_v10, %v5714_v11  ;;  %v5618_v26 = vld [vmem:[#allocation11 + $0x128] sm:$0xf0] }
 0x249   : > { %2674 = vmatpush.bf16.msrb.mxu0 %v5617_v29  ;;  %2687 = vmatpush.bf16.msrb.mxu1 %v5873_v30  ;;  %v5744_v8 = vld [vmem:[#allocation11 + $0x208] sm:$0xf]  ;;  %v5489_v24 = vor.u32 %v7291_v7, %v5488_v6  ;;  %v7335_v29 = vld [vmem:[#allocation11 + $0x18c] sm:$0xf] }
 0x24a   : > { %v7355_v9 = vld [vmem:[#allocation11 + $0x224] sm:$0xf0]  ;;  %v5682_v30 = vld [vmem:[#allocation11 + $0x1a8] sm:$0xf0] }
 0x24b   : > { %v7427_v21 = vld [vmem:[#allocation11 + $0x464] sm:$0xf0]  ;;  %v5745_v25 = vor.u32 %v7355_v9, %v5744_v8  ;;  %v5685_v41 = vor.u32 %v7335_v29, %v5682_v30  ;;  %v7383_v63 = vld [vmem:[#allocation11 + $0x30c] sm:$0xf] }
 0x24c   : > { %2699 = vmatpush.bf16.msrb.mxu2 %v6161_v42  ;;  %2712 = vmatpush.bf16.msrb.mxu3 %v6417_v43  ;;  %v6288_v22 = vld [vmem:[#allocation11 + $0x648] sm:$0xf]  ;;  %v6033_v34 = vor.u32 %v7427_v21, %v6032_v20  ;;  %v7471_v43 = vld [vmem:[#allocation11 + $0x5cc] sm:$0xf] }
 0x24d   : > { %2627 = vmatmul.bf16.vlgmr.msra.gmra.mxu0 %v8811_v54  ;;  %2640 = vmatmul.bf16.vlgmr.msra.gmra.mxu1 %v8813_v55  ;;  %v7491_v23 = vld [vmem:[#allocation11 + $0x664] sm:$0xf0]  ;;  %v7455_v61 = vld [vmem:[#allocation11 + $0x54c] sm:$0xf] }
 0x24e   : > { %2675 = vmatpush.bf16.msrb.mxu0 %v5585_v46  ;;  %2688 = vmatpush.bf16.msrb.mxu1 %v5841_v14  ;;  %v6289_v36 = vor.u32 %v7491_v23, %v6288_v22  ;;  %v6000_v38 = vld [vmem:[#allocation11 + $0x408] sm:$0xf]  ;;  %v5941_v46 = vor.u32 %v7399_v33, %v5938_v37  ;;  %v7327_v14 = vld [vmem:[#allocation11 + $0x14c] sm:$0xf] }
 0x24f   : > { %v7419_v39 = vld [vmem:[#allocation11 + $0x424] sm:$0xf0]  ;;  %v6162_v2 = vld [vmem:[#allocation11 + $0x568] sm:$0xf0] }
 0x250   : > { %2700 = vmatpush.bf16.msrb.mxu2 %v6129_v50  ;;  %2713 = vmatpush.bf16.msrb.mxu3 %v6385_v51  ;;  %v6256_v40 = vld [vmem:[#allocation11 + $0x608] sm:$0xf]  ;;  %v6001_v17 = vor.u32 %v7419_v39, %v6000_v38  ;;  %v5906_v50 = vld [vmem:[#allocation11 + $0x368] sm:$0xf0]  ;;  %v6229_v51 = vor.u32 %v7471_v43, %v6226_v44  ;;  %v6165_v11 = vor.u32 %v7455_v61, %v6162_v2  ;;  %v5688_v2 = vld [vmem:[#allocation11 + $0x190] sm:$0xf] }
 0x251   : > { %v7483_v42 = vld [vmem:[#allocation11 + $0x624] sm:$0xf0]  ;;  %v5909_v60 = vor.u32 %v7391_v49, %v5906_v50  ;;  %v7519_v3 = vld [vmem:[#allocation11 + $0x74c] sm:$0xf] }
 0x252   : > { %2676 = vmatpush.bf16.msrb.mxu0 %v5553_v58  ;;  %2689 = vmatpush.bf16.msrb.mxu1 %v5809_v59  ;;  %v6257_v47 = vor.u32 %v7483_v42, %v6256_v40  ;;  %v6450_v58 = vld [vmem:[#allocation11 + $0x7a8] sm:$0xf0]  ;;  %v5653_v59 = vor.u32 %v7327_v14, %v5650_v48 }
 0x253   : > { %2653 = vmatmul.bf16.vlgmr.msra.gmra.mxu2 %v8819_v15  ;;  %2666 = vmatmul.bf16.vlgmr.msra.gmra.mxu3 %v8821_v16  ;;  %v6453_v1 = vor.u32 %v7527_v57, %v6450_v58  ;;  %v7311_v7 = vld [vmem:[#allocation11 + $0xcc] sm:$0xf]  ;;  %v5976_v58 = vld [vmem:[#allocation11 + $0x3d0] sm:$0xf] }
 0x254   : > { %2701 = vmatpush.bf16.msrb.mxu2 %v6097_v0  ;;  %2714 = vmatpush.bf16.msrb.mxu3 %v6353_v31  ;;  %v5874_v0 = vld [vmem:[#allocation11 + $0x328] sm:$0xf0]  ;;  %v6197_v31 = vor.u32 %v7463_v53, %v6194_v56  ;;  %v7348_v53 = vld [vmem:[#allocation11 + $0x1ec] sm:$0xf0] }
 0x255   : > { %v5877_v6 = vor.u32 %v7383_v63, %v5874_v0  ;;  %v5586_v8 = vld [vmem:[#allocation11 + $0xe8] sm:$0xf0] }
 0x256   : > { %2677 = vmatpush.bf16.msrb.mxu0 %v5521_v4  ;;  %2690 = vmatpush.bf16.msrb.mxu1 %v5777_v5  ;;  %v6418_v4 = vld [vmem:[#allocation11 + $0x768] sm:$0xf0]  ;;  %v5621_v5 = vor.u32 %v7319_v62, %v5618_v26  ;;  %v5589_v21 = vor.u32 %v7311_v7, %v5586_v8  ;;  %v7404_v7 = vld [vmem:[#allocation11 + $0x3ac] sm:$0xf0] }
 0x257   : > { %v7375_v9 = vld [vmem:[#allocation11 + $0x2cc] sm:$0xf] }
 0x258   : > { %2702 = vmatpush.bf16.msrb.mxu2 %v6065_v12  ;;  %2715 = vmatpush.bf16.msrb.mxu3 %v6321_v13  ;;  %v5842_v10 = vld [vmem:[#allocation11 + $0x2e8] sm:$0xf0]  ;;  %v6421_v12 = vor.u32 %v7519_v3, %v6418_v4  ;;  %v7340_v3 = vld [vmem:[#allocation11 + $0x1ac] sm:$0xf0] }
 0x259   : > { %v7447_v13 = vld [vmem:[#allocation11 + $0x50c] sm:$0xf]  ;;  %v5845_v22 = vor.u32 %v7375_v9, %v5842_v10  ;;  %v5944_v4 = vld [vmem:[#allocation11 + $0x390] sm:$0xf] }
 0x25a   : > { %2678 = vmatpush.bf16.msrb.mxu0 %v5489_v24  ;;  %2691 = vmatpush.bf16.msrb.mxu1 %v5745_v25  ;;  %v6130_v18 = vld [vmem:[#allocation11 + $0x528] sm:$0xf0] }
 0x25b   : > { %v7511_v19 = vld [vmem:[#allocation11 + $0x70c] sm:$0xf] }
 0x25c   : > { %2703 = vmatpush.bf16.msrb.mxu2 %v6033_v34  ;;  %2716 = vmatpush.bf16.msrb.mxu3 %v6289_v36  ;;  %v6386_v20 = vld [vmem:[#allocation11 + $0x728] sm:$0xf0] }
 0x25d   : > { %2679 = vmatmul.bf16.vlgmr.msrb.gmra.mxu0 %v8811_v54  ;;  %2692 = vmatmul.bf16.vlgmr.msrb.gmra.mxu1 %v8813_v55  ;;  %v7303_v23 = vld [vmem:[#allocation11 + $0x8c] sm:$0xf]  ;;  %v6389_v29 = vor.u32 %v7511_v19, %v6386_v20  ;;  %v7540_v19 = vld [vmem:[#allocation11 + $0x7ec] sm:$0xf0]  ;;  %v5689_v20 = vor.u32 %v7340_v3, %v5688_v2 }
 0x25e   : > { %2723 = vmatpush.bf16.msra.mxu0 %v5717_v27  ;;  %2736 = vmatpush.bf16.msra.mxu1 %v5973_v28  ;;  %v5554_v24 = vld [vmem:[#allocation11 + $0xa8] sm:$0xf0]  ;;  %v6133_v28 = vor.u32 %v7447_v13, %v6130_v18  ;;  %v7476_v13 = vld [vmem:[#allocation11 + $0x5ec] sm:$0xf0] }
 0x25f   : > { %v7367_v25 = vld [vmem:[#allocation11 + $0x28c] sm:$0xf]  ;;  %v5557_v37 = vor.u32 %v7303_v23, %v5554_v24  ;;  %v6488_v18 = vld [vmem:[#allocation11 + $0x7d0] sm:$0xf] }
 0x260   : > { %2704 = vmatpush.bf16.msrb.mxu2 %v6001_v17  ;;  %2717 = vmatpush.bf16.msrb.mxu3 %v6257_v47  ;;  %v5810_v27 = vld [vmem:[#allocation11 + $0x2a8] sm:$0xf0]  ;;  %v5656_v24 = vld [vmem:[#allocation11 + $0x150] sm:$0xf] }
 0x261   : > { %v7439_v30 = vld [vmem:[#allocation11 + $0x4cc] sm:$0xf]  ;;  %v5813_v38 = vor.u32 %v7367_v25, %v5810_v27  ;;  %v7332_v25 = vld [vmem:[#allocation11 + $0x16c] sm:$0xf0] }
 0x262   : > { %2724 = vmatpush.bf16.msra.mxu0 %v5685_v41  ;;  %2737 = vmatpush.bf16.msra.mxu1 %v5941_v46  ;;  %v6098_v33 = vld [vmem:[#allocation11 + $0x4e8] sm:$0xf0]  ;;  %v7372_v2 = vld [vmem:[#allocation11 + $0x2ac] sm:$0xf0] }
 0x263   : > { %2705 = vmatmul.bf16.vlgmr.msrb.gmra.mxu2 %v8819_v15  ;;  %2718 = vmatmul.bf16.vlgmr.msrb.gmra.mxu3 %v8821_v16  ;;  %v7503_v34 = vld [vmem:[#allocation11 + $0x6cc] sm:$0xf]  ;;  %v6101_v44 = vor.u32 %v7439_v30, %v6098_v33  ;;  %v7396_v30 = vld [vmem:[#allocation11 + $0x36c] sm:$0xf0] }
 0x264   : > { %2749 = vmatpush.bf16.msra.mxu2 %v6229_v51  ;;  %2762 = vmatpush.bf16.msra.mxu3 %v6485_v52  ;;  %v6354_v36 = vld [vmem:[#allocation11 + $0x6e8] sm:$0xf0]  ;;  %v5720_v52 = vld [vmem:[#allocation11 + $0x1d0] sm:$0xf] }
 0x265   : > { %v7295_v39 = vld [vmem:[#allocation11 + $0x4c] sm:$0xf]  ;;  %v6357_v45 = vor.u32 %v7503_v34, %v6354_v36  ;;  %v6200_v33 = vld [vmem:[#allocation11 + $0x590] sm:$0xf] }
 0x266   : > { %2725 = vmatpush.bf16.msra.mxu0 %v5653_v59  ;;  %2738 = vmatpush.bf16.msra.mxu1 %v5909_v60  ;;  %v5522_v40 = vld [vmem:[#allocation11 + $0x68] sm:$0xf0]  ;;  %v7412_v59 = vld [vmem:[#allocation11 + $0x3ec] sm:$0xf0] }
 0x267   : > { %v7359_v42 = vld [vmem:[#allocation11 + $0x24c] sm:$0xf]  ;;  %v5525_v17 = vor.u32 %v7295_v39, %v5522_v40  ;;  %v5977_v61 = vor.u32 %v7412_v59, %v5976_v58  ;;  %v7468_v34 = vld [vmem:[#allocation11 + $0x5ac] sm:$0xf0] }
 0x268   : > { %2750 = vmatpush.bf16.msra.mxu2 %v6197_v31  ;;  %2763 = vmatpush.bf16.msra.mxu3 %v6453_v1  ;;  %v5778_v43 = vld [vmem:[#allocation11 + $0x268] sm:$0xf0]  ;;  %v5721_v1 = vor.u32 %v7348_v53, %v5720_v52  ;;  %v6456_v36 = vld [vmem:[#allocation11 + $0x790] sm:$0xf] }
 0x269   : > { %v7431_v32 = vld [vmem:[#allocation11 + $0x48c] sm:$0xf]  ;;  %v5781_v47 = vor.u32 %v7359_v42, %v5778_v43  ;;  %v5624_v40 = vld [vmem:[#allocation11 + $0x110] sm:$0xf]  ;;  %v6201_v43 = vor.u32 %v7468_v34, %v6200_v33  ;;  %v7344_v34 = vld [vmem:[#allocation11 + $0x1d4] sm:$0xf] }
 0x26a   : > { %2726 = vmatpush.bf16.msra.mxu0 %v5621_v5  ;;  %2739 = vmatpush.bf16.msra.mxu1 %v5877_v6  ;;  %v6066_v41 = vld [vmem:[#allocation11 + $0x4a8] sm:$0xf0]  ;;  %v7324_v42 = vld [vmem:[#allocation11 + $0x12c] sm:$0xf0] }
 0x26b   : > { %v7495_v46 = vld [vmem:[#allocation11 + $0x68c] sm:$0xf]  ;;  %v6069_v56 = vor.u32 %v7431_v32, %v6066_v41  ;;  %v7388_v32 = vld [vmem:[#allocation11 + $0x32c] sm:$0xf0] }
 0x26c   : > { %2751 = vmatpush.bf16.msra.mxu2 %v6165_v11  ;;  %2764 = vmatpush.bf16.msra.mxu3 %v6421_v12  ;;  %v6322_v14 = vld [vmem:[#allocation11 + $0x6a8] sm:$0xf0]  ;;  %v6232_v12 = vld [vmem:[#allocation11 + $0x5d0] sm:$0xf] }
 0x26d   : > { %v7287_v48 = vld [vmem:[#allocation11 + $0xc] sm:$0xf]  ;;  %v6325_v57 = vor.u32 %v7495_v46, %v6322_v14  ;;  %v6233_v27 = vor.u32 %v7476_v13, %v6232_v12  ;;  %v6168_v41 = vld [vmem:[#allocation11 + $0x550] sm:$0xf] }
 0x26e   : > { %2727 = vmatpush.bf16.msra.mxu0 %v5589_v21  ;;  %2740 = vmatpush.bf16.msra.mxu1 %v5845_v22  ;;  %v5490_v49 = vld [vmem:[#allocation11 + $0x28] sm:$0xf0]  ;;  %v5945_v21 = vor.u32 %v7404_v7, %v5944_v4  ;;  %v7460_v46 = vld [vmem:[#allocation11 + $0x56c] sm:$0xf0] }
 0x26f   : > { %v7351_v50 = vld [vmem:[#allocation11 + $0x20c] sm:$0xf]  ;;  %v5493_v0 = vor.u32 %v7287_v48, %v5490_v49  ;;  %v6424_v14 = vld [vmem:[#allocation11 + $0x750] sm:$0xf] }
 0x270   : > { %2752 = vmatpush.bf16.msra.mxu2 %v6133_v28  ;;  %2765 = vmatpush.bf16.msra.mxu3 %v6389_v29  ;;  %v5746_v51 = vld [vmem:[#allocation11 + $0x228] sm:$0xf0]  ;;  %v6489_v28 = vor.u32 %v7540_v19, %v6488_v18  ;;  %v5912_v29 = vld [vmem:[#allocation11 + $0x350] sm:$0xf] }
 0x271   : > { %v7423_v60 = vld [vmem:[#allocation11 + $0x44c] sm:$0xf]  ;;  %v5749_v31 = vor.u32 %v7351_v50, %v5746_v51  ;;  %v5913_v39 = vor.u32 %v7396_v30, %v5912_v29  ;;  %v5592_v49 = vld [vmem:[#allocation11 + $0xd0] sm:$0xf]  ;;  %v6169_v51 = vor.u32 %v7460_v46, %v6168_v41  ;;  %v7336_v46 = vld [vmem:[#allocation11 + $0x194] sm:$0xf] }
 0x272   : > { %2728 = vmatpush.bf16.msra.mxu0 %v5557_v37  ;;  %2741 = vmatpush.bf16.msra.mxu1 %v5813_v38  ;;  %v6034_v62 = vld [vmem:[#allocation11 + $0x468] sm:$0xf0]  ;;  %v7532_v37 = vld [vmem:[#allocation11 + $0x7ac] sm:$0xf0]  ;;  %v5657_v38 = vor.u32 %v7332_v25, %v5656_v24 }
 0x273   : > { %v7487_v26 = vld [vmem:[#allocation11 + $0x64c] sm:$0xf]  ;;  %v6037_v5 = vor.u32 %v7423_v60, %v6034_v62  ;;  %v7316_v50 = vld [vmem:[#allocation11 + $0xec] sm:$0xf0] }
 0x274   : > { %2753 = vmatpush.bf16.msra.mxu2 %v6101_v44  ;;  %2766 = vmatpush.bf16.msra.mxu3 %v6357_v45  ;;  %v6290_v63 = vld [vmem:[#allocation11 + $0x668] sm:$0xf0]  ;;  %v6457_v44 = vor.u32 %v7532_v37, %v6456_v36  ;;  %v5880_v45 = vld [vmem:[#allocation11 + $0x310] sm:$0xf]  ;;  %v5593_v62 = vor.u32 %v7316_v50, %v5592_v49  ;;  %v5722_v36 = vld [vmem:[#allocation11 + $0x1f0] sm:$0xf0] }
 0x275   : > { %v6293_v6 = vor.u32 %v7487_v26, %v6290_v63  ;;  %v7415_v8 = vld [vmem:[#allocation11 + $0x40c] sm:$0xf]  ;;  %v5881_v48 = vor.u32 %v7388_v32, %v5880_v45  ;;  %v5848_v53 = vld [vmem:[#allocation11 + $0x2d0] sm:$0xf]  ;;  %v7408_v37 = vld [vmem:[#allocation11 + $0x3d4] sm:$0xf]  ;;  %v5725_v32 = vor.u32 %v7344_v34, %v5722_v36 }
 0x276   : > { %2729 = vmatpush.bf16.msra.mxu0 %v5525_v17  ;;  %2742 = vmatpush.bf16.msra.mxu1 %v5781_v47  ;;  %v6002_v9 = vld [vmem:[#allocation11 + $0x428] sm:$0xf0]  ;;  %v7524_v17 = vld [vmem:[#allocation11 + $0x76c] sm:$0xf0]  ;;  %v5625_v47 = vor.u32 %v7324_v42, %v5624_v40  ;;  %v5946_v49 = vld [vmem:[#allocation11 + $0x3b0] sm:$0xf0] }
 0x277   : > { %v7479_v10 = vld [vmem:[#allocation11 + $0x60c] sm:$0xf]  ;;  %v6005_v22 = vor.u32 %v7415_v8, %v6002_v9  ;;  %v6425_v52 = vor.u32 %v7524_v17, %v6424_v14  ;;  %v7452_v58 = vld [vmem:[#allocation11 + $0x52c] sm:$0xf0]  ;;  %v5690_v14 = vld [vmem:[#allocation11 + $0x1b0] sm:$0xf0] }
 0x278   : > { %2754 = vmatpush.bf16.msra.mxu2 %v6069_v56  ;;  %2767 = vmatpush.bf16.msra.mxu3 %v6325_v57  ;;  %v6258_v11 = vld [vmem:[#allocation11 + $0x628] sm:$0xf0]  ;;  %v7380_v56 = vld [vmem:[#allocation11 + $0x2ec] sm:$0xf0]  ;;  %v7400_v17 = vld [vmem:[#allocation11 + $0x394] sm:$0xf] }
 0x279   : > { %v6261_v23 = vor.u32 %v7479_v10, %v6258_v11  ;;  %v6136_v57 = vld [vmem:[#allocation11 + $0x510] sm:$0xf]  ;;  %v5849_v26 = vor.u32 %v7380_v56, %v5848_v53  ;;  %v7472_v56 = vld [vmem:[#allocation11 + $0x5d4] sm:$0xf] }
 0x27a   : > { %2730 = vmatpush.bf16.msra.mxu0 %v5493_v0  ;;  %2743 = vmatpush.bf16.msra.mxu1 %v5749_v31  ;;  %v6392_v59 = vld [vmem:[#allocation11 + $0x710] sm:$0xf]  ;;  %v6137_v31 = vor.u32 %v7452_v58, %v6136_v57  ;;  %v6234_v57 = vld [vmem:[#allocation11 + $0x5f0] sm:$0xf0] }
 0x27b   : > { %v7516_v60 = vld [vmem:[#allocation11 + $0x72c] sm:$0xf0]  ;;  %v7536_v58 = vld [vmem:[#allocation11 + $0x7d4] sm:$0xf] }
 0x27c   : > { %2755 = vmatpush.bf16.msra.mxu2 %v6037_v5  ;;  %2768 = vmatpush.bf16.msra.mxu3 %v6293_v6  ;;  %v5560_v63 = vld [vmem:[#allocation11 + $0x90] sm:$0xf]  ;;  %v5850_v34 = vld [vmem:[#allocation11 + $0x2f0] sm:$0xf0] }
 0x27d   : > { %2731 = vmatmul.bf16.vlgmr.msra.gmra.mxu0 %v8811_v54  ;;  %2744 = vmatmul.bf16.vlgmr.msra.gmra.mxu1 %v8813_v55  ;;  %v7308_v0 = vld [vmem:[#allocation11 + $0xac] sm:$0xf0]  ;;  %v7448_v36 = vld [vmem:[#allocation11 + $0x514] sm:$0xf] }
 0x27e   : > { %2775 = vmatpush.bf16.msrb.mxu0 %v5721_v1  ;;  %2788 = vmatpush.bf16.msrb.mxu1 %v5977_v61  ;;  %v6393_v1 = vor.u32 %v7516_v60, %v6392_v59  ;;  %v5816_v61 = vld [vmem:[#allocation11 + $0x290] sm:$0xf]  ;;  %v5561_v7 = vor.u32 %v7308_v0, %v5560_v63  ;;  %v6490_v59 = vld [vmem:[#allocation11 + $0x7f0] sm:$0xf0]  ;;  %v5693_v60 = vor.u32 %v7336_v46, %v5690_v14 }
 0x27f   : > { %v6104_v3 = vld [vmem:[#allocation11 + $0x4d0] sm:$0xf]  ;;  %v5817_v8 = vor.u32 %v7372_v2, %v5816_v61  ;;  %v7328_v0 = vld [vmem:[#allocation11 + $0x154] sm:$0xf]  ;;  %v6493_v61 = vor.u32 %v7536_v58, %v6490_v59 }
 0x280   : > { %2756 = vmatpush.bf16.msra.mxu2 %v6005_v22  ;;  %2769 = vmatpush.bf16.msra.mxu3 %v6261_v23  ;;  %v7444_v4 = vld [vmem:[#allocation11 + $0x4ec] sm:$0xf0]  ;;  %v7392_v2 = vld [vmem:[#allocation11 + $0x354] sm:$0xf] }
 0x281   : > { %v6360_v5 = vld [vmem:[#allocation11 + $0x6d0] sm:$0xf]  ;;  %v6105_v11 = vor.u32 %v7444_v4, %v6104_v3  ;;  %v5914_v3 = vld [vmem:[#allocation11 + $0x370] sm:$0xf0] }
 0x282   : > { %2776 = vmatpush.bf16.msrb.mxu0 %v5689_v20  ;;  %2789 = vmatpush.bf16.msrb.mxu1 %v5945_v21  ;;  %v7508_v6 = vld [vmem:[#allocation11 + $0x6ec] sm:$0xf0]  ;;  %v7464_v4 = vld [vmem:[#allocation11 + $0x594] sm:$0xf] }
 0x283   : > { %2757 = vmatmul.bf16.vlgmr.msra.gmra.mxu2 %v8819_v15  ;;  %2770 = vmatmul.bf16.vlgmr.msra.gmra.mxu3 %v8821_v16  ;;  %v5528_v9 = vld [vmem:[#allocation11 + $0x50] sm:$0xf]  ;;  %v6361_v12 = vor.u32 %v7508_v6, %v6360_v5  ;;  %v6202_v5 = vld [vmem:[#allocation11 + $0x5b0] sm:$0xf0] }
 0x284   : > { %2801 = vmatpush.bf16.msrb.mxu2 %v6233_v27  ;;  %2814 = vmatpush.bf16.msrb.mxu3 %v6489_v28  ;;  %v7300_v10 = vld [vmem:[#allocation11 + $0x6c] sm:$0xf0]  ;;  %v7528_v6 = vld [vmem:[#allocation11 + $0x794] sm:$0xf] }
 0x285   : > { %v5784_v13 = vld [vmem:[#allocation11 + $0x250] sm:$0xf]  ;;  %v5529_v23 = vor.u32 %v7300_v10, %v5528_v9  ;;  %v5917_v9 = vor.u32 %v7392_v2, %v5914_v3  ;;  %v7320_v10 = vld [vmem:[#allocation11 + $0x114] sm:$0xf] }
 0x286   : > { %2777 = vmatpush.bf16.msrb.mxu0 %v5657_v38  ;;  %2790 = vmatpush.bf16.msrb.mxu1 %v5913_v39  ;;  %v7364_v18 = vld [vmem:[#allocation11 + $0x26c] sm:$0xf0]  ;;  %v5978_v38 = vld [vmem:[#allocation11 + $0x3f0] sm:$0xf0] }
 0x287   : > { %v6072_v19 = vld [vmem:[#allocation11 + $0x490] sm:$0xf]  ;;  %v5785_v24 = vor.u32 %v7364_v18, %v5784_v13  ;;  %v5981_v41 = vor.u32 %v7408_v37, %v5978_v38  ;;  %v7384_v18 = vld [vmem:[#allocation11 + $0x314] sm:$0xf] }
 0x288   : > { %2802 = vmatpush.bf16.msrb.mxu2 %v6201_v43  ;;  %2815 = vmatpush.bf16.msrb.mxu3 %v6457_v44  ;;  %v7436_v20 = vld [vmem:[#allocation11 + $0x4ac] sm:$0xf0]  ;;  %v6138_v37 = vld [vmem:[#allocation11 + $0x530] sm:$0xf0] }
 0x289   : > { %v6328_v21 = vld [vmem:[#allocation11 + $0x690] sm:$0xf]  ;;  %v6073_v29 = vor.u32 %v7436_v20, %v6072_v19  ;;  %v5882_v19 = vld [vmem:[#allocation11 + $0x330] sm:$0xf0] }
 0x28a   : > { %2778 = vmatpush.bf16.msrb.mxu0 %v5625_v47  ;;  %2791 = vmatpush.bf16.msrb.mxu1 %v5881_v48  ;;  %v7500_v22 = vld [vmem:[#allocation11 + $0x6ac] sm:$0xf0]  ;;  %v7456_v20 = vld [vmem:[#allocation11 + $0x554] sm:$0xf] }
 0x28b   : > { %v5496_v25 = vld [vmem:[#allocation11 + $0x10] sm:$0xf]  ;;  %v6329_v30 = vor.u32 %v7500_v22, %v6328_v21  ;;  %v6170_v21 = vld [vmem:[#allocation11 + $0x570] sm:$0xf0] }
 0x28c   : > { %2803 = vmatpush.bf16.msrb.mxu2 %v6169_v51  ;;  %2816 = vmatpush.bf16.msrb.mxu3 %v6425_v52  ;;  %v7292_v27 = vld [vmem:[#allocation11 + $0x2c] sm:$0xf0]  ;;  %v7520_v22 = vld [vmem:[#allocation11 + $0x754] sm:$0xf] }
 0x28d   : > { %v5752_v28 = vld [vmem:[#allocation11 + $0x210] sm:$0xf]  ;;  %v5497_v44 = vor.u32 %v7292_v27, %v5496_v25  ;;  %v5885_v25 = vor.u32 %v7384_v18, %v5882_v19  ;;  %v7312_v27 = vld [vmem:[#allocation11 + $0xd4] sm:$0xf] }
 0x28e   : > { %2779 = vmatpush.bf16.msrb.mxu0 %v5593_v62  ;;  %2792 = vmatpush.bf16.msrb.mxu1 %v5849_v26  ;;  %v7356_v33 = vld [vmem:[#allocation11 + $0x22c] sm:$0xf0]  ;;  %v5949_v62 = vor.u32 %v7400_v17, %v5946_v49  ;;  %v7512_v38 = vld [vmem:[#allocation11 + $0x714] sm:$0xf] }
 0x28f   : > { %v6040_v39 = vld [vmem:[#allocation11 + $0x450] sm:$0xf]  ;;  %v5753_v45 = vor.u32 %v7356_v33, %v5752_v28  ;;  %v5594_v28 = vld [vmem:[#allocation11 + $0xf0] sm:$0xf0] }
 0x290   : > { %2804 = vmatpush.bf16.msrb.mxu2 %v6137_v31  ;;  %2817 = vmatpush.bf16.msrb.mxu3 %v6393_v1  ;;  %v7428_v40 = vld [vmem:[#allocation11 + $0x46c] sm:$0xf0]  ;;  %v5658_v31 = vld [vmem:[#allocation11 + $0x170] sm:$0xf0]  ;;  %v6237_v1 = vor.u32 %v7472_v56, %v6234_v57 }
 0x291   : > { %v6296_v42 = vld [vmem:[#allocation11 + $0x650] sm:$0xf]  ;;  %v6041_v47 = vor.u32 %v7428_v40, %v6040_v39  ;;  %v7376_v33 = vld [vmem:[#allocation11 + $0x2d4] sm:$0xf]  ;;  %v5597_v40 = vor.u32 %v7312_v27, %v5594_v28  ;;  %v7405_v27 = vld [vmem:[#allocation11 + $0x3b4] sm:$0xf0] }
 0x292   : > { %2780 = vmatpush.bf16.msrb.mxu0 %v5561_v7  ;;  %2793 = vmatpush.bf16.msrb.mxu1 %v5817_v8  ;;  %v7492_v43 = vld [vmem:[#allocation11 + $0x66c] sm:$0xf0]  ;;  %v6458_v7 = vld [vmem:[#allocation11 + $0x7b0] sm:$0xf0]  ;;  %v5661_v8 = vor.u32 %v7328_v0, %v5658_v31 }
 0x293   : > { %v6297_v48 = vor.u32 %v7492_v43, %v6296_v42  ;;  %v6008_v50 = vld [vmem:[#allocation11 + $0x410] sm:$0xf]  ;;  %v6461_v13 = vor.u32 %v7528_v6, %v6458_v7  ;;  %v6394_v39 = vld [vmem:[#allocation11 + $0x730] sm:$0xf0]  ;;  %v5853_v42 = vor.u32 %v7376_v33, %v5850_v34  ;;  %v7349_v6 = vld [vmem:[#allocation11 + $0x1f4] sm:$0xf0] }
 0x294   : > { %2805 = vmatpush.bf16.msrb.mxu2 %v6105_v11  ;;  %2818 = vmatpush.bf16.msrb.mxu3 %v6361_v12  ;;  %v7420_v51 = vld [vmem:[#allocation11 + $0x42c] sm:$0xf0]  ;;  %v5626_v11 = vld [vmem:[#allocation11 + $0x130] sm:$0xf0]  ;;  %v6205_v12 = vor.u32 %v7464_v4, %v6202_v5  ;;  %v5728_v5 = vld [vmem:[#allocation11 + $0x1d8] sm:$0xf] }
 0x295   : > { %v6264_v52 = vld [vmem:[#allocation11 + $0x610] sm:$0xf]  ;;  %v6009_v26 = vor.u32 %v7420_v51, %v6008_v50  ;;  %v7304_v43 = vld [vmem:[#allocation11 + $0x94] sm:$0xf]  ;;  %v5984_v7 = vld [vmem:[#allocation11 + $0x3d8] sm:$0xf]  ;;  %v5729_v19 = vor.u32 %v7349_v6, %v5728_v5 }
 0x296   : > { %2781 = vmatpush.bf16.msrb.mxu0 %v5529_v23  ;;  %2794 = vmatpush.bf16.msrb.mxu1 %v5785_v24  ;;  %v7484_v53 = vld [vmem:[#allocation11 + $0x62c] sm:$0xf0]  ;;  %v6426_v23 = vld [vmem:[#allocation11 + $0x770] sm:$0xf0]  ;;  %v5629_v24 = vor.u32 %v7320_v10, %v5626_v11  ;;  %v6240_v34 = vld [vmem:[#allocation11 + $0x5d8] sm:$0xf] }
 0x297   : > { %v6265_v63 = vor.u32 %v7484_v53, %v6264_v52  ;;  %v5818_v46 = vld [vmem:[#allocation11 + $0x2b0] sm:$0xf0] }
 0x298   : > { %2806 = vmatpush.bf16.msrb.mxu2 %v6073_v29  ;;  %2819 = vmatpush.bf16.msrb.mxu3 %v6329_v30  ;;  %v6173_v29 = vor.u32 %v7456_v20, %v6170_v21  ;;  %v6429_v30 = vor.u32 %v7520_v22, %v6426_v23  ;;  %v7440_v14 = vld [vmem:[#allocation11 + $0x4d4] sm:$0xf]  ;;  %v5696_v21 = vld [vmem:[#allocation11 + $0x198] sm:$0xf] }
 0x299   : > { %v6106_v17 = vld [vmem:[#allocation11 + $0x4f0] sm:$0xf0]  ;;  %v7341_v22 = vld [vmem:[#allocation11 + $0x1b4] sm:$0xf0] }
 0x29a   : > { %2782 = vmatpush.bf16.msrb.mxu0 %v5497_v44  ;;  %2795 = vmatpush.bf16.msrb.mxu1 %v5753_v45  ;;  %v5562_v44 = vld [vmem:[#allocation11 + $0xb0] sm:$0xf0]  ;;  %v6141_v45 = vor.u32 %v7448_v36, %v6138_v37  ;;  %v6109_v53 = vor.u32 %v7440_v14, %v6106_v17  ;;  %v5952_v23 = vld [vmem:[#allocation11 + $0x398] sm:$0xf] }
 0x29b   : > { %v5565_v49 = vor.u32 %v7304_v43, %v5562_v44  ;;  %v7296_v51 = vld [vmem:[#allocation11 + $0x54] sm:$0xf]  ;;  %v7477_v36 = vld [vmem:[#allocation11 + $0x5f4] sm:$0xf0] }
 0x29c   : > { %2807 = vmatpush.bf16.msrb.mxu2 %v6041_v47  ;;  %2820 = vmatpush.bf16.msrb.mxu3 %v6297_v48  ;;  %v7504_v47 = vld [vmem:[#allocation11 + $0x6d4] sm:$0xf]  ;;  %v6496_v37 = vld [vmem:[#allocation11 + $0x7d8] sm:$0xf] }
 0x29d   : > { %2783 = vmatmul.bf16.vlgmr.msrb.gmra.mxu0 %v8811_v54  ;;  %2796 = vmatmul.bf16.vlgmr.msrb.gmra.mxu1 %v8813_v55  ;;  %v6362_v48 = vld [vmem:[#allocation11 + $0x6f0] sm:$0xf0]  ;;  %v5664_v44 = vld [vmem:[#allocation11 + $0x158] sm:$0xf] }
 0x29e   : > { %2827 = vmatpush.bf16.msra.mxu0 %v5725_v32  ;;  %2840 = vmatpush.bf16.msra.mxu1 %v5981_v41  ;;  %v6397_v32 = vor.u32 %v7512_v38, %v6394_v39  ;;  %v7368_v41 = vld [vmem:[#allocation11 + $0x294] sm:$0xf]  ;;  %v6365_v56 = vor.u32 %v7504_v47, %v6362_v48  ;;  %v7541_v38 = vld [vmem:[#allocation11 + $0x7f4] sm:$0xf0]  ;;  %v5697_v39 = vor.u32 %v7341_v22, %v5696_v21 }
 0x29f   : > { %v5821_v50 = vor.u32 %v7368_v41, %v5818_v46  ;;  %v5530_v52 = vld [vmem:[#allocation11 + $0x70] sm:$0xf0]  ;;  %v6497_v41 = vor.u32 %v7541_v38, %v6496_v37  ;;  %v5920_v46 = vld [vmem:[#allocation11 + $0x358] sm:$0xf] }
 0x2a0   : > { %2808 = vmatpush.bf16.msrb.mxu2 %v6009_v26  ;;  %2821 = vmatpush.bf16.msrb.mxu3 %v6265_v63  ;;  %v7360_v57 = vld [vmem:[#allocation11 + $0x254] sm:$0xf]  ;;  %v5533_v63 = vor.u32 %v7296_v51, %v5530_v52  ;;  %v7397_v14 = vld [vmem:[#allocation11 + $0x374] sm:$0xf0] }
 0x2a1   : > { %v5786_v58 = vld [vmem:[#allocation11 + $0x270] sm:$0xf0]  ;;  %v6208_v17 = vld [vmem:[#allocation11 + $0x598] sm:$0xf]  ;;  %v5921_v51 = vor.u32 %v7397_v14, %v5920_v46 }
 0x2a2   : > { %2828 = vmatpush.bf16.msra.mxu0 %v5693_v60  ;;  %2841 = vmatpush.bf16.msra.mxu1 %v5949_v62  ;;  %v7432_v59 = vld [vmem:[#allocation11 + $0x494] sm:$0xf]  ;;  %v5789_v0 = vor.u32 %v7360_v57, %v5786_v58  ;;  %v7469_v47 = vld [vmem:[#allocation11 + $0x5b4] sm:$0xf0] }
 0x2a3   : > { %2809 = vmatmul.bf16.vlgmr.msrb.gmra.mxu2 %v8819_v15  ;;  %2822 = vmatmul.bf16.vlgmr.msrb.gmra.mxu3 %v8821_v16  ;;  %v6074_v60 = vld [vmem:[#allocation11 + $0x4b0] sm:$0xf0]  ;;  %v6464_v48 = vld [vmem:[#allocation11 + $0x798] sm:$0xf] }
 0x2a4   : > { %2853 = vmatpush.bf16.msra.mxu2 %v6237_v1  ;;  %2866 = vmatpush.bf16.msra.mxu3 %v6493_v61  ;;  %v7496_v62 = vld [vmem:[#allocation11 + $0x694] sm:$0xf]  ;;  %v6077_v2 = vor.u32 %v7432_v59, %v6074_v60  ;;  %v7325_v57 = vld [vmem:[#allocation11 + $0x134] sm:$0xf0]  ;;  %v6209_v59 = vor.u32 %v7469_v47, %v6208_v17 }
 0x2a5   : > { %v6330_v26 = vld [vmem:[#allocation11 + $0x6b0] sm:$0xf0]  ;;  %v5568_v21 = vld [vmem:[#allocation11 + $0x98] sm:$0xf] }
 0x2a6   : > { %2829 = vmatpush.bf16.msra.mxu0 %v5661_v8  ;;  %2842 = vmatpush.bf16.msra.mxu1 %v5917_v9  ;;  %v7288_v31 = vld [vmem:[#allocation11 + $0x14] sm:$0xf]  ;;  %v6333_v3 = vor.u32 %v7496_v62, %v6330_v26  ;;  %v7413_v8 = vld [vmem:[#allocation11 + $0x3f4] sm:$0xf0] }
 0x2a7   : > { %v5498_v1 = vld [vmem:[#allocation11 + $0x30] sm:$0xf0]  ;;  %v5985_v20 = vor.u32 %v7413_v8, %v5984_v7  ;;  %v5888_v62 = vld [vmem:[#allocation11 + $0x318] sm:$0xf] }
 0x2a8   : > { %2854 = vmatpush.bf16.msra.mxu2 %v6205_v12  ;;  %2867 = vmatpush.bf16.msra.mxu3 %v6461_v13  ;;  %v7352_v61 = vld [vmem:[#allocation11 + $0x214] sm:$0xf]  ;;  %v5501_v13 = vor.u32 %v7288_v31, %v5498_v1  ;;  %v7389_v26 = vld [vmem:[#allocation11 + $0x334] sm:$0xf0] }
 0x2a9   : > { %v5754_v4 = vld [vmem:[#allocation11 + $0x230] sm:$0xf0]  ;;  %v6432_v31 = vld [vmem:[#allocation11 + $0x758] sm:$0xf] }
 0x2aa   : > { %2830 = vmatpush.bf16.msra.mxu0 %v5629_v24  ;;  %2843 = vmatpush.bf16.msra.mxu1 %v5885_v25  ;;  %v7424_v9 = vld [vmem:[#allocation11 + $0x454] sm:$0xf]  ;;  %v5757_v18 = vor.u32 %v7352_v61, %v5754_v4  ;;  %v7525_v1 = vld [vmem:[#allocation11 + $0x774] sm:$0xf0] }
 0x2ab   : > { %v6042_v10 = vld [vmem:[#allocation11 + $0x470] sm:$0xf0]  ;;  %v7317_v4 = vld [vmem:[#allocation11 + $0xf4] sm:$0xf0]  ;;  %v6433_v6 = vor.u32 %v7525_v1, %v6432_v31 }
 0x2ac   : > { %2855 = vmatpush.bf16.msra.mxu2 %v6173_v29  ;;  %2868 = vmatpush.bf16.msra.mxu3 %v6429_v30  ;;  %v7488_v11 = vld [vmem:[#allocation11 + $0x654] sm:$0xf]  ;;  %v6045_v24 = vor.u32 %v7424_v9, %v6042_v10  ;;  %v5856_v7 = vld [vmem:[#allocation11 + $0x2d8] sm:$0xf] }
 0x2ad   : > { %v6298_v12 = vld [vmem:[#allocation11 + $0x670] sm:$0xf0]  ;;  %v7381_v8 = vld [vmem:[#allocation11 + $0x2f4] sm:$0xf0] }
 0x2ae   : > { %2831 = vmatpush.bf16.msra.mxu0 %v5597_v40  ;;  %2844 = vmatpush.bf16.msra.mxu1 %v5853_v42  ;;  %v6301_v25 = vor.u32 %v7488_v11, %v6298_v12  ;;  %v7416_v28 = vld [vmem:[#allocation11 + $0x414] sm:$0xf]  ;;  %v5953_v40 = vor.u32 %v7405_v27, %v5952_v23  ;;  %v6144_v9 = vld [vmem:[#allocation11 + $0x518] sm:$0xf] }
 0x2af   : > { %v6010_v29 = vld [vmem:[#allocation11 + $0x430] sm:$0xf0]  ;;  %v7453_v10 = vld [vmem:[#allocation11 + $0x534] sm:$0xf0] }
 0x2b0   : > { %2856 = vmatpush.bf16.msra.mxu2 %v6141_v45  ;;  %2869 = vmatpush.bf16.msra.mxu3 %v6397_v32  ;;  %v7480_v30 = vld [vmem:[#allocation11 + $0x614] sm:$0xf]  ;;  %v6013_v42 = vor.u32 %v7416_v28, %v6010_v29  ;;  %v7333_v45 = vld [vmem:[#allocation11 + $0x174] sm:$0xf0]  ;;  %v6241_v32 = vor.u32 %v7477_v36, %v6240_v34  ;;  %v6145_v23 = vor.u32 %v7453_v10, %v6144_v9  ;;  %v7401_v9 = vld [vmem:[#allocation11 + $0x39c] sm:$0xf] }
 0x2b1   : > { %v6266_v33 = vld [vmem:[#allocation11 + $0x630] sm:$0xf0]  ;;  %v6400_v11 = vld [vmem:[#allocation11 + $0x718] sm:$0xf] }
 0x2b2   : > { %2832 = vmatpush.bf16.msra.mxu0 %v5565_v49  ;;  %2845 = vmatpush.bf16.msra.mxu1 %v5821_v50  ;;  %v6269_v43 = vor.u32 %v7480_v30, %v6266_v33  ;;  %v7533_v49 = vld [vmem:[#allocation11 + $0x7b4] sm:$0xf0]  ;;  %v5665_v50 = vor.u32 %v7333_v45, %v5664_v44 }
 0x2b3   : > { %v6465_v60 = vor.u32 %v7533_v49, %v6464_v48  ;;  %v7517_v12 = vld [vmem:[#allocation11 + $0x734] sm:$0xf0] }
 0x2b4   : > { %2857 = vmatpush.bf16.msra.mxu2 %v6109_v53  ;;  %2870 = vmatpush.bf16.msra.mxu3 %v6365_v56  ;;  %v5632_v56 = vld [vmem:[#allocation11 + $0x118] sm:$0xf] }
 0x2b5   : > { %v5633_v61 = vor.u32 %v7325_v57, %v5632_v56  ;;  %v7309_v22 = vld [vmem:[#allocation11 + $0xb4] sm:$0xf0] }
 0x2b6   : > { %2833 = vmatpush.bf16.msra.mxu0 %v5533_v63  ;;  %2846 = vmatpush.bf16.msra.mxu1 %v5789_v0  ;;  %v6176_v63 = vld [vmem:[#allocation11 + $0x558] sm:$0xf]  ;;  %v5569_v34 = vor.u32 %v7309_v22, %v5568_v21  ;;  %v7473_v21 = vld [vmem:[#allocation11 + $0x5dc] sm:$0xf] }
 0x2b7   : > { %v7461_v0 = vld [vmem:[#allocation11 + $0x574] sm:$0xf0]  ;;  %v6242_v22 = vld [vmem:[#allocation11 + $0x5f8] sm:$0xf0] }
 0x2b8   : > { %2858 = vmatpush.bf16.msra.mxu2 %v6077_v2  ;;  %2871 = vmatpush.bf16.msra.mxu3 %v6333_v3  ;;  %v5889_v2 = vor.u32 %v7389_v26, %v5888_v62  ;;  %v5600_v3 = vld [vmem:[#allocation11 + $0xd8] sm:$0xf]  ;;  %v6177_v5 = vor.u32 %v7461_v0, %v6176_v63  ;;  %v7409_v62 = vld [vmem:[#allocation11 + $0x3dc] sm:$0xf] }
 0x2b9   : > { %v2576_v52 = vpop.f32.mrf.mxu0  ;;  %v2589_v53 = vpop.f32.mrf.mxu1  ;;  %v7373_v27 = vld [vmem:[#allocation11 + $0x2b4] sm:$0xf0]  ;;  %v5986_v26 = vld [vmem:[#allocation11 + $0x3f8] sm:$0xf0] }
 0x2ba   : > { %2834 = vmatpush.bf16.msra.mxu0 %v5501_v13  ;;  %2847 = vmatpush.bf16.msra.mxu1 %v5757_v18  ;;  %v8843_v58 = vadd.f32 %v2589_v53, %v2576_v52  ;;  %v5601_v13 = vor.u32 %v7317_v4, %v5600_v3  ;;  %v5857_v18 = vor.u32 %v7381_v8, %v5856_v7  ;;  %v6112_v28 = vld [vmem:[#allocation11 + $0x4d8] sm:$0xf]  ;;  %v7337_v7 = vld [vmem:[#allocation11 + $0x19c] sm:$0xf] }
 0x2bb   : > { %v7445_v29 = vld [vmem:[#allocation11 + $0x4f4] sm:$0xf0]  ;;  %v5698_v8 = vld [vmem:[#allocation11 + $0x1b8] sm:$0xf0] }
 0x2bc   : > { %2859 = vmatpush.bf16.msra.mxu2 %v6045_v24  ;;  %2872 = vmatpush.bf16.msra.mxu3 %v6301_v25  ;;  %v6401_v24 = vor.u32 %v7517_v12, %v6400_v11  ;;  %v5824_v25 = vld [vmem:[#allocation11 + $0x298] sm:$0xf]  ;;  %v5954_v12 = vld [vmem:[#allocation11 + $0x3b8] sm:$0xf0] }
 0x2bd   : > { %2835 = vmatmul.bf16.vlgmr.msra.gmra.mxu0 %v8811_v54  ;;  %2848 = vmatmul.bf16.vlgmr.msra.gmra.mxu1 %v8813_v55  ;;  %v6368_v30 = vld [vmem:[#allocation11 + $0x6d8] sm:$0xf]  ;;  %v5825_v36 = vor.u32 %v7373_v27, %v5824_v25 }
 0x2be   : > { %2879 = vmatpush.bf16.msrb.mxu0 %v5729_v19  ;;  %2892 = vmatpush.bf16.msrb.mxu1 %v5985_v20  ;;  %v7509_v33 = vld [vmem:[#allocation11 + $0x6f4] sm:$0xf0] }
 0x2bf   : > { %v5536_v37 = vld [vmem:[#allocation11 + $0x58] sm:$0xf] }
 0x2c0   : > { %2860 = vmatpush.bf16.msra.mxu2 %v6013_v42  ;;  %2873 = vmatpush.bf16.msra.mxu3 %v6269_v43  ;;  %v7301_v38 = vld [vmem:[#allocation11 + $0x74] sm:$0xf0]  ;;  %v6113_v42 = vor.u32 %v7445_v29, %v6112_v28  ;;  %v6369_v43 = vor.u32 %v7509_v33, %v6368_v30  ;;  %v5701_v28 = vor.u32 %v7337_v7, %v5698_v8  ;;  %v7449_v7 = vld [vmem:[#allocation11 + $0x51c] sm:$0xf] }
 0x2c1   : > { %v2578_v19 = vpop.f32.mrf.mxu0  ;;  %v2591_v20 = vpop.f32.mrf.mxu1  ;;  %v5792_v44 = vld [vmem:[#allocation11 + $0x258] sm:$0xf]  ;;  %v5537_v17 = vor.u32 %v7301_v38, %v5536_v37  ;;  %v5957_v29 = vor.u32 %v7401_v9, %v5954_v12  ;;  %v6245_v37 = vor.u32 %v7473_v21, %v6242_v22  ;;  %v6146_v8 = vld [vmem:[#allocation11 + $0x538] sm:$0xf0] }
 0x2c2   : > { %2880 = vmatpush.bf16.msrb.mxu0 %v5697_v39  ;;  %2893 = vmatpush.bf16.msrb.mxu1 %v5953_v40  ;;  %v7365_v45 = vld [vmem:[#allocation11 + $0x274] sm:$0xf0]  ;;  %v7513_v9 = vld [vmem:[#allocation11 + $0x71c] sm:$0xf]  ;;  %v6149_v21 = vor.u32 %v7449_v7, %v6146_v8  ;;  %v2998_v8 = vld [vmem:[%s9852_s12 + $0x78] sm:$0xff] }
 0x2c3   : > { %2861 = vmatmul.bf16.vlgmr.msra.gmra.mxu2 %v8819_v15  ;;  %2874 = vmatmul.bf16.vlgmr.msra.gmra.mxu3 %v8821_v16  ;;  %v6336_v46 = vld [vmem:[#allocation11 + $0x698] sm:$0xf]  ;;  %v5793_v47 = vor.u32 %v7365_v45, %v5792_v44  ;;  %v7465_v44 = vld [vmem:[#allocation11 + $0x59c] sm:$0xf] }
 0x2c4   : > { %2905 = vmatpush.bf16.msrb.mxu2 %v6241_v32  ;;  %2918 = vmatpush.bf16.msrb.mxu3 %v6497_v41  ;;  %v6080_v32 = vld [vmem:[#allocation11 + $0x498] sm:$0xf]  ;;  %v6210_v45 = vld [vmem:[#allocation11 + $0x5b8] sm:$0xf0] }
 0x2c5   : > { %v7437_v41 = vld [vmem:[#allocation11 + $0x4b4] sm:$0xf0] }
 0x2c6   : > { %2881 = vmatpush.bf16.msrb.mxu0 %v5665_v50  ;;  %2894 = vmatpush.bf16.msrb.mxu1 %v5921_v51  ;;  %v8847_v39 = vpop.f32.mrf.mxu2  ;;  %v8849_v40 = vpop.f32.mrf.mxu3  ;;  %v7501_v14 = vld [vmem:[#allocation11 + $0x6b4] sm:$0xf0]  ;;  %v6081_v53 = vor.u32 %v7437_v41, %v6080_v32  ;;  %v7529_v32 = vld [vmem:[#allocation11 + $0x79c] sm:$0xf] }
 0x2c7   : > { %v5504_v48 = vld [vmem:[#allocation11 + $0x18] sm:$0xf]  ;;  %v6337_v56 = vor.u32 %v7501_v14, %v6336_v46  ;;  %v6466_v41 = vld [vmem:[#allocation11 + $0x7b8] sm:$0xf0] }
 0x2c8   : > { %2906 = vmatpush.bf16.msrb.mxu2 %v6209_v59  ;;  %2919 = vmatpush.bf16.msrb.mxu3 %v6465_v60  ;;  %v7293_v49 = vld [vmem:[#allocation11 + $0x34] sm:$0xf0]  ;;  %v7345_v59 = vld [vmem:[#allocation11 + $0x1dc] sm:$0xf] }
 0x2c9   : > { %v5760_v50 = vld [vmem:[#allocation11 + $0x218] sm:$0xf]  ;;  %v5730_v60 = vld [vmem:[#allocation11 + $0x1f8] sm:$0xf0] }
 0x2ca   : > { %2882 = vmatpush.bf16.msrb.mxu0 %v5633_v61  ;;  %2895 = vmatpush.bf16.msrb.mxu1 %v5889_v2  ;;  %v8851_v51 = vpop.f32.mrf.mxu0  ;;  %v8853_v52 = vpop.f32.mrf.mxu1  ;;  %v7357_v57 = vld [vmem:[#allocation11 + $0x234] sm:$0xf0]  ;;  %v5505_v61 = vor.u32 %v7293_v49, %v5504_v48  ;;  %v7321_v48 = vld [vmem:[#allocation11 + $0x11c] sm:$0xf] }
 0x2cb   : > { %v6048_v63 = vld [vmem:[#allocation11 + $0x458] sm:$0xf]  ;;  %v5761_v2 = vor.u32 %v7357_v57, %v5760_v50  ;;  %v5634_v49 = vld [vmem:[#allocation11 + $0x138] sm:$0xf0]  ;;  %v6213_v50 = vor.u32 %v7465_v44, %v6210_v45 }
 0x2cc   : > { %2907 = vmatpush.bf16.msrb.mxu2 %v6177_v5  ;;  %2920 = vmatpush.bf16.msrb.mxu3 %v6433_v6  ;;  %v7429_v0 = vld [vmem:[#allocation11 + $0x474] sm:$0xf0]  ;;  %v5733_v5 = vor.u32 %v7345_v59, %v5730_v60  ;;  %v5989_v6 = vor.u32 %v7409_v62, %v5986_v26  ;;  %v5890_v57 = vld [vmem:[#allocation11 + $0x338] sm:$0xf0] }
 0x2cd   : > { %v6304_v31 = vld [vmem:[#allocation11 + $0x658] sm:$0xf]  ;;  %v6049_v10 = vor.u32 %v7429_v0, %v6048_v63  ;;  %v7457_v59 = vld [vmem:[#allocation11 + $0x55c] sm:$0xf] }
 0x2ce   : > { %2883 = vmatpush.bf16.msrb.mxu0 %v5601_v13  ;;  %2896 = vmatpush.bf16.msrb.mxu1 %v5857_v18  ;;  %v7493_v1 = vld [vmem:[#allocation11 + $0x674] sm:$0xf0]  ;;  %v2604_v3 = vpop.f32.mrf.mxu2  ;;  %v2617_v4 = vpop.f32.mrf.mxu3  ;;  %v6178_v60 = vld [vmem:[#allocation11 + $0x578] sm:$0xf0] }
 0x2cf   : > { %v6305_v11 = vor.u32 %v7493_v1, %v6304_v31  ;;  %v6016_v13 = vld [vmem:[#allocation11 + $0x418] sm:$0xf]  ;;  %v7521_v62 = vld [vmem:[#allocation11 + $0x75c] sm:$0xf]  ;;  %v5637_v31 = vor.u32 %v7321_v48, %v5634_v49  ;;  %v6181_v3 = vor.u32 %v7457_v59, %v6178_v60 }
 0x2d0   : > { %2908 = vmatpush.bf16.msrb.mxu2 %v6145_v23  ;;  %2921 = vmatpush.bf16.msrb.mxu3 %v6401_v24  ;;  %v7421_v18 = vld [vmem:[#allocation11 + $0x434] sm:$0xf0]  ;;  %v7537_v23 = vld [vmem:[#allocation11 + $0x7dc] sm:$0xf] }
 0x2d1   : > { %v6272_v19 = vld [vmem:[#allocation11 + $0x618] sm:$0xf]  ;;  %v6498_v24 = vld [vmem:[#allocation11 + $0x7f8] sm:$0xf0]  ;;  %v6017_v30 = vor.u32 %v7421_v18, %v6016_v13 }
 0x2d2   : > { %2884 = vmatpush.bf16.msrb.mxu0 %v5569_v34  ;;  %2897 = vmatpush.bf16.msrb.mxu1 %v5825_v36  ;;  %v7485_v20 = vld [vmem:[#allocation11 + $0x634] sm:$0xf0]  ;;  %v2630_v25 = vpop.f32.mrf.mxu0  ;;  %v2643_v27 = vpop.f32.mrf.mxu1  ;;  %v7329_v34 = vld [vmem:[#allocation11 + $0x15c] sm:$0xf]  ;;  %v6501_v38 = vor.u32 %v7537_v23, %v6498_v24 }
 0x2d3   : > { %v6273_v33 = vor.u32 %v7485_v20, %v6272_v19  ;;  %v5666_v36 = vld [vmem:[#allocation11 + $0x178] sm:$0xf0] }
 0x2d4   : > { %2909 = vmatpush.bf16.msrb.mxu2 %v6113_v42  ;;  %2922 = vmatpush.bf16.msrb.mxu3 %v6369_v43  ;;  %v7393_v42 = vld [vmem:[#allocation11 + $0x35c] sm:$0xf] }
 0x2d5   : > { %v5922_v43 = vld [vmem:[#allocation11 + $0x378] sm:$0xf0] }
 0x2d6   : > { %2885 = vmatpush.bf16.msrb.mxu0 %v5537_v17  ;;  %2898 = vmatpush.bf16.msrb.mxu1 %v5793_v47  ;;  %v8857_v46 = vpop.f32.mrf.mxu2  ;;  %v8859_v14 = vpop.f32.mrf.mxu3  ;;  %v5669_v17 = vor.u32 %v7329_v34, %v5666_v36  ;;  %v5925_v47 = vor.u32 %v7393_v42, %v5922_v43  ;;  %v6434_v26 = vld [vmem:[#allocation11 + $0x778] sm:$0xf0] }
 0x2d7   : > { %v6437_v4 = vor.u32 %v7521_v62, %v6434_v26  ;;  %v7305_v19 = vld [vmem:[#allocation11 + $0x9c] sm:$0xf] }
 0x2d8   : > { %2910 = vmatpush.bf16.msrb.mxu2 %v6081_v53  ;;  %2923 = vmatpush.bf16.msrb.mxu3 %v6337_v56  ;;  %v6469_v53 = vor.u32 %v7529_v32, %v6466_v41  ;;  %v7385_v56 = vld [vmem:[#allocation11 + $0x31c] sm:$0xf] }
 0x2d9   : > { %v5893_v1 = vor.u32 %v7385_v56, %v5890_v57  ;;  %v5570_v20 = vld [vmem:[#allocation11 + $0xb8] sm:$0xf0] }
 0x2da   : > { %2886 = vmatpush.bf16.msrb.mxu0 %v5505_v61  ;;  %2899 = vmatpush.bf16.msrb.mxu1 %v5761_v2  ;;  %v8863_v63 = vpop.f32.mrf.mxu0  ;;  %v8865_v0 = vpop.f32.mrf.mxu1  ;;  %v7313_v61 = vld [vmem:[#allocation11 + $0xdc] sm:$0xf]  ;;  %v5573_v34 = vor.u32 %v7305_v19, %v5570_v20 }
 0x2db   : > { %v5602_v2 = vld [vmem:[#allocation11 + $0xf8] sm:$0xf0] }
 0x2dc   : > { %2911 = vmatpush.bf16.msrb.mxu2 %v6049_v10  ;;  %2924 = vmatpush.bf16.msrb.mxu3 %v6305_v11  ;;  %v6402_v10 = vld [vmem:[#allocation11 + $0x738] sm:$0xf0]  ;;  %v5605_v13 = vor.u32 %v7313_v61, %v5602_v2 }
 0x2dd   : > { %2887 = vmatmul.bf16.vlgmr.msrb.gmra.mxu0 %v8811_v54  ;;  %2900 = vmatmul.bf16.vlgmr.msrb.gmra.mxu1 %v8813_v55  ;;  %v6405_v22 = vor.u32 %v7513_v9, %v6402_v10  ;;  %v7369_v23 = vld [vmem:[#allocation11 + $0x29c] sm:$0xf]  ;;  %v3014_v9 = vld [vmem:[%s9852_s12 + $0xf8] sm:$0xff] }
 0x2de   : > { %2931 = vmatpush.bf16.msra.mxu0 %v5733_v5  ;;  %2944 = vmatpush.bf16.msra.mxu1 %v5989_v6  ;;  %v7377_v5 = vld [vmem:[#allocation11 + $0x2dc] sm:$0xf]  ;;  %v2656_v11 = vpop.f32.mrf.mxu2  ;;  %v2669_v12 = vpop.f32.mrf.mxu3 }
 0x2df   : > { %v5858_v6 = vld [vmem:[#allocation11 + $0x2f8] sm:$0xf0] }
 0x2e0   : > { %2912 = vmatpush.bf16.msrb.mxu2 %v6017_v30  ;;  %2925 = vmatpush.bf16.msrb.mxu3 %v6273_v33  ;;  %v5861_v18 = vor.u32 %v7377_v5, %v5858_v6  ;;  %v5826_v24 = vld [vmem:[#allocation11 + $0x2b8] sm:$0xf0]  ;;  %v2603_v6 = vadd.f32 %v8847_v39, %v8843_v58 }
 0x2e1   : > { %v7441_v25 = vld [vmem:[#allocation11 + $0x4dc] sm:$0xf]  ;;  %v5829_v36 = vor.u32 %v7369_v23, %v5826_v24 }
 0x2e2   : > { %2932 = vmatpush.bf16.msra.mxu0 %v5701_v28  ;;  %2945 = vmatpush.bf16.msra.mxu1 %v5957_v29  ;;  %v6114_v27 = vld [vmem:[#allocation11 + $0x4f8] sm:$0xf0]  ;;  %v2682_v30 = vpop.f32.mrf.mxu0  ;;  %v2695_v33 = vpop.f32.mrf.mxu1 }
 0x2e3   : > { %2913 = vmatmul.bf16.vlgmr.msrb.gmra.mxu2 %v8819_v15  ;;  %2926 = vmatmul.bf16.vlgmr.msrb.gmra.mxu3 %v8821_v16  ;;  %v7505_v28 = vld [vmem:[#allocation11 + $0x6dc] sm:$0xf]  ;;  %v6117_v42 = vor.u32 %v7441_v25, %v6114_v27  ;;  %v3030_v25 = vld [vmem:[%s9852_s12 + $0x178] sm:$0xff] }
 0x2e4   : > { %2957 = vmatpush.bf16.msra.mxu2 %v6245_v37  ;;  %2970 = vmatpush.bf16.msra.mxu3 %v6501_v38  ;;  %v6370_v29 = vld [vmem:[#allocation11 + $0x6f8] sm:$0xf0]  ;;  %v3046_v27 = vld [vmem:[%s9852_s12 + $0x1f8] sm:$0xff] }
 0x2e5   : > { %v7297_v37 = vld [vmem:[#allocation11 + $0x5c] sm:$0xf]  ;;  %v6373_v43 = vor.u32 %v7505_v28, %v6370_v29  ;;  %v2994_v29 = vld [vmem:[%s9852_s12 + $0x58] sm:$0xff] }
 0x2e6   : > { %2933 = vmatpush.bf16.msra.mxu0 %v5669_v17  ;;  %2946 = vmatpush.bf16.msra.mxu1 %v5925_v47  ;;  %v5538_v38 = vld [vmem:[#allocation11 + $0x78] sm:$0xf0]  ;;  %v2706_v48 = vpop.f32.mrf.mxu2  ;;  %v8867_v49 = vpop.f32.mrf.mxu3  ;;  %v3010_v30 = vld [vmem:[%s9852_s12 + $0xd8] sm:$0xff] }
 0x2e7   : > { %v7361_v44 = vld [vmem:[#allocation11 + $0x25c] sm:$0xf] }
 0x2e8   : > { %2958 = vmatpush.bf16.msra.mxu2 %v6213_v50  ;;  %2971 = vmatpush.bf16.msra.mxu3 %v6469_v53  ;;  %v5794_v45 = vld [vmem:[#allocation11 + $0x278] sm:$0xf0]  ;;  %v5541_v50 = vor.u32 %v7297_v37, %v5538_v38 }
 0x2e9   : > { %v7433_v32 = vld [vmem:[#allocation11 + $0x49c] sm:$0xf]  ;;  %v5797_v53 = vor.u32 %v7361_v44, %v5794_v45 }
 0x2ea   : > { %2934 = vmatpush.bf16.msra.mxu0 %v5637_v31  ;;  %2947 = vmatpush.bf16.msra.mxu1 %v5893_v1  ;;  %v6082_v41 = vld [vmem:[#allocation11 + $0x4b8] sm:$0xf0] }
 0x2eb   : > { %v7497_v17 = vld [vmem:[#allocation11 + $0x69c] sm:$0xf]  ;;  %v6085_v57 = vor.u32 %v7433_v32, %v6082_v41  ;;  %v3028_v32 = vld [vmem:[%s9852_s12 + $0x168] sm:$0xff] }
 0x2ec   : > { %2959 = vmatpush.bf16.msra.mxu2 %v6181_v3  ;;  %2972 = vmatpush.bf16.msra.mxu3 %v6437_v4  ;;  %v6338_v47 = vld [vmem:[#allocation11 + $0x6b8] sm:$0xf0]  ;;  %v2642_v3 = vadd.f32 %v8853_v52, %v8851_v51 }
 0x2ed   : > { %v7289_v56 = vld [vmem:[#allocation11 + $0x1c] sm:$0xf]  ;;  %v6341_v59 = vor.u32 %v7497_v17, %v6338_v47  ;;  %v2992_v17 = vld [vmem:[%s9852_s12 + $0x48] sm:$0xff] }
 0x2ee   : > { %2935 = vmatpush.bf16.msra.mxu0 %v5605_v13  ;;  %2948 = vmatpush.bf16.msra.mxu1 %v5861_v18  ;;  %v5506_v60 = vld [vmem:[#allocation11 + $0x38] sm:$0xf0]  ;;  %v2655_v7 = vadd.f32 %v8857_v46, %v2642_v3  ;;  %v2708_v11 = vpop.f32.mrf.mxu2  ;;  %v2721_v12 = vpop.f32.mrf.mxu3  ;;  %v8881_v46 = vadd.f32 %v8849_v40, %v2603_v6  ;;  %v2996_v40 = vld [vmem:[%s9852_s12 + $0x68] sm:$0xff] }
 0x2ef   : > { %v7353_v62 = vld [vmem:[#allocation11 + $0x21c] sm:$0xf]  ;;  %v5509_v4 = vor.u32 %v7289_v56, %v5506_v60  ;;  %v3008_v47 = vld [vmem:[%s9852_s12 + $0xc8] sm:$0xff]  ;;  %v2991_v56 = vld [vmem:[%s9852_s12 + $0x40] sm:$0xff] }
 0x2f0   : > { %2960 = vmatpush.bf16.msra.mxu2 %v6149_v21  ;;  %2973 = vmatpush.bf16.msra.mxu3 %v6405_v22  ;;  %v5762_v26 = vld [vmem:[#allocation11 + $0x238] sm:$0xf0]  ;;  %v8890_v20 = vadd.f32 %v8859_v14, %v2655_v7  ;;  %v2694_v21 = vadd.f32 %v8865_v0, %v8863_v63  ;;  %v3012_v22 = vld [vmem:[%s9852_s12 + $0xe8] sm:$0xff]  ;;  %v3177_v63 = vmul.f32 %v8881_v46, %v8881_v46  ;;  %v3129_v45 = vrot.slane %v8881_v46, 4  ;;  %v3026_v60 = vld [vmem:[%s9852_s12 + $0x158] sm:$0xff] }
 0x2f1   : > { %v7425_v31 = vld [vmem:[#allocation11 + $0x45c] sm:$0xf]  ;;  %v5765_v5 = vor.u32 %v7353_v62, %v5762_v26  ;;  %v3042_v62 = vld [vmem:[%s9852_s12 + $0x1d8] sm:$0xff]  ;;  %v3024_v11 = vld [vmem:[%s9852_s12 + $0x148] sm:$0xff] }
 0x2f2   : > { %2936 = vmatpush.bf16.msra.mxu0 %v5573_v34  ;;  %2949 = vmatpush.bf16.msra.mxu1 %v5829_v36  ;;  %v6050_v1 = vld [vmem:[#allocation11 + $0x478] sm:$0xf0]  ;;  %v2707_v24 = vadd.f32 %v2706_v48, %v2694_v21  ;;  %v3178_v0 = vmul.f32 %v8890_v20, %v8890_v20  ;;  %v3185_v36 = vrot.slane %v3177_v63, 4  ;;  %v3040_v12 = vld [vmem:[%s9852_s12 + $0x1c8] sm:$0xff] }
 0x2f3   : > { %v7489_v61 = vld [vmem:[#allocation11 + $0x65c] sm:$0xf]  ;;  %v6053_v51 = vor.u32 %v7425_v31, %v6050_v1  ;;  %v2990_v1 = vld [vmem:[%s9852_s12 + $0x38] sm:$0xff] }
 0x2f4   : > { %2961 = vmatpush.bf16.msra.mxu2 %v6117_v42  ;;  %2974 = vmatpush.bf16.msra.mxu3 %v6373_v43  ;;  %v6306_v2 = vld [vmem:[#allocation11 + $0x678] sm:$0xf0]  ;;  %v8919_v28 = vadd.f32 %v8867_v49, %v2707_v24  ;;  %v3191_v42 = vrot.slane %v3178_v0, 4  ;;  %v3186_v48 = vadd.f32 %v3185_v36, %v3177_v63  ;;  %v3027_v49 = vld [vmem:[%s9852_s12 + $0x160] sm:$0xff] }
 0x2f5   : > { %v6309_v52 = vor.u32 %v7489_v61, %v6306_v2  ;;  %v7417_v10 = vld [vmem:[#allocation11 + $0x41c] sm:$0xf]  ;;  %v3006_v61 = vld [vmem:[%s9852_s12 + $0xb8] sm:$0xff]  ;;  %v2987_v63 = vld [vmem:[%s9852_s12 + $0x20] sm:$0xff] }
 0x2f6   : > { %2937 = vmatpush.bf16.msra.mxu0 %v5541_v50  ;;  %2950 = vmatpush.bf16.msra.mxu1 %v5797_v53  ;;  %v6018_v58 = vld [vmem:[#allocation11 + $0x438] sm:$0xf0]  ;;  %v3179_v41 = vmul.f32 %v8919_v28, %v8919_v28  ;;  %v3043_v50 = vld [vmem:[%s9852_s12 + $0x1e0] sm:$0xff]  ;;  %v3192_v53 = vadd.f32 %v3191_v42, %v3178_v0  ;;  %v3187_v6 = vrot.slane %v3186_v48, 2  ;;  %v3141_v7 = vrot.slane %v8919_v28, 4  ;;  %v3022_v0 = vld [vmem:[%s9852_s12 + $0x138] sm:$0xff] }
 0x2f7   : > { %v7481_v39 = vld [vmem:[#allocation11 + $0x61c] sm:$0xf]  ;;  %v6021_v23 = vor.u32 %v7417_v10, %v6018_v58 }
 0x2f8   : > { %2962 = vmatpush.bf16.msra.mxu2 %v6085_v57  ;;  %2975 = vmatpush.bf16.msra.mxu3 %v6341_v59  ;;  %v6274_v13 = vld [vmem:[#allocation11 + $0x638] sm:$0xf0]  ;;  %v3007_v57 = vld [vmem:[%s9852_s12 + $0xc0] sm:$0xff]  ;;  %v3130_v59 = vadd.f32 %v3129_v45, %v8881_v46  ;;  %v3197_v31 = vrot.slane %v3179_v41, 4  ;;  %v3142_v24 = vadd.f32 %v3141_v7, %v8919_v28 }
 0x2f9   : > { %v2997_v18 = vld [vmem:[%s9852_s12 + $0x70] sm:$0xff]  ;;  %v6277_v14 = vor.u32 %v7481_v39, %v6274_v13  ;;  %v2988_v13 = vld [vmem:[%s9852_s12 + $0x28] sm:$0xff] }
 0x2fa   : > { %2938 = vmatpush.bf16.msra.mxu0 %v5509_v4  ;;  %2951 = vmatpush.bf16.msra.mxu1 %v5765_v5  ;;  %v3013_v19 = vld [vmem:[%s9852_s12 + $0xf0] sm:$0xff]  ;;  %v2732_v33 = vpop.f32.mrf.mxu0  ;;  %v2745_v34 = vpop.f32.mrf.mxu1  ;;  %v3198_v39 = vadd.f32 %v3197_v31, %v3179_v41  ;;  %v3143_v45 = vrot.slane %v3142_v24, 2  ;;  %v3019_v31 = vld [vmem:[%s9852_s12 + $0x120] sm:$0xff] }
 0x2fb   : > { %v3029_v37 = vld [vmem:[%s9852_s12 + $0x170] sm:$0xff]  ;;  %v2746_v10 = vadd.f32 %v2745_v34, %v2732_v33  ;;  %v3002_v33 = vld [vmem:[%s9852_s12 + $0x98] sm:$0xff] }
 0x2fc   : > { %2963 = vmatpush.bf16.msra.mxu2 %v6053_v51  ;;  %2976 = vmatpush.bf16.msra.mxu3 %v6309_v52  ;;  %v3045_v38 = vld [vmem:[%s9852_s12 + $0x1f0] sm:$0xff]  ;;  %v3193_v51 = vrot.slane %v3192_v53, 2  ;;  %v3131_v52 = vrot.slane %v3130_v59, 2  ;;  %v3199_v36 = vrot.slane %v3198_v39, 2 }
 0x2fd   : > { %2939 = vmatmul.bf16.vlgmr.msra.gmra.mxu0 %v8811_v54  ;;  %2952 = vmatmul.bf16.vlgmr.msra.gmra.mxu1 %v8813_v55  ;;  %v2995_v54 = vld [vmem:[%s9852_s12 + $0x60] sm:$0xff]  ;;  %v2993_v43 = vld [vmem:[%s9852_s12 + $0x50] sm:$0xff] }
 0x2fe   : > { %3241 = vmatpush.msrb.mxu0 %v2998_v8  ;;  %3261 = vmatpush.msrb.mxu1 %v3014_v9  ;;  %v3011_v55 = vld [vmem:[%s9852_s12 + $0xe0] sm:$0xff]  ;;  %v3009_v44 = vld [vmem:[%s9852_s12 + $0xd0] sm:$0xff] }
 0x2ff   : > { %v3025_v4 = vld [vmem:[%s9852_s12 + $0x150] sm:$0xff] }
 0x300   : > { %3242 = vmatpush.msrb.mxu0 %v2997_v18  ;;  %3262 = vmatpush.msrb.mxu1 %v3013_v19  ;;  %v3041_v5 = vld [vmem:[%s9852_s12 + $0x1d0] sm:$0xff]  ;;  %v3004_v18 = vld [vmem:[%s9852_s12 + $0xa8] sm:$0xff] }
 0x301   : > { %2964 = vmatpush.bf16.msra.mxu2 %v6021_v23  ;;  %2977 = vmatpush.bf16.msra.mxu3 %v6277_v14  ;;  %v2989_v8 = vld [vmem:[%s9852_s12 + $0x30] sm:$0xff]  ;;  %v3039_v23 = vld [vmem:[%s9852_s12 + $0x1c0] sm:$0xff]  ;;  %v3188_v14 = vadd.f32 %v3187_v6, %v3186_v48  ;;  %v3018_v6 = vld [vmem:[%s9852_s12 + $0x118] sm:$0xff] }
 0x302   : > { %3243 = vmatpush.msrb.mxu0 %v2996_v40  ;;  %3263 = vmatpush.msrb.mxu1 %v3012_v22  ;;  %v2734_v2 = vpop.f32.mrf.mxu0  ;;  %v2747_v3 = vpop.f32.mrf.mxu1  ;;  %v3005_v9 = vld [vmem:[%s9852_s12 + $0xb0] sm:$0xff]  ;;  %v3023_v40 = vld [vmem:[%s9852_s12 + $0x140] sm:$0xff] }
 0x303   : > { %v3021_v42 = vld [vmem:[%s9852_s12 + $0x130] sm:$0xff]  ;;  %v2983_v2 = vld [vmem:[%s9852_s12] sm:$0xff] }
 0x304   : > { %3244 = vmatpush.msrb.mxu0 %v2995_v54  ;;  %3264 = vmatpush.msrb.mxu1 %v3011_v55  ;;  %v3003_v54 = vld [vmem:[%s9852_s12 + $0xa0] sm:$0xff]  ;;  %v3194_v55 = vadd.f32 %v3193_v51, %v3192_v53  ;;  %v3000_v53 = vld [vmem:[%s9852_s12 + $0x88] sm:$0xff] }
 0x305   : > { %3281 = vmatpush.msrb.mxu2 %v3030_v25  ;;  %3301 = vmatpush.msrb.mxu3 %v3046_v27  ;;  %v3038_v27 = vld [vmem:[%s9852_s12 + $0x1b8] sm:$0xff]  ;;  %v2999_v3 = vld [vmem:[%s9852_s12 + $0x80] sm:$0xff] }
 0x306   : > { %2965 = vmatmul.bf16.vlgmr.msra.gmra.mxu2 %v8819_v15  ;;  %2978 = vmatmul.bf16.vlgmr.msra.gmra.mxu3 %v8821_v16  ;;  %v3044_v15 = vld [vmem:[%s9852_s12 + $0x1e8] sm:$0xff]  ;;  %v3135_v16 = vrot.slane %v8890_v20, 4  ;;  %v2758_v19 = vpop.f32.mrf.mxu2  ;;  %v2771_v21 = vpop.f32.mrf.mxu3 }
 0x307   : > { %3245 = vmatpush.msrb.mxu0 %v2994_v29  ;;  %3265 = vmatpush.msrb.mxu1 %v3010_v30  ;;  %v2759_v22 = vadd.f32 %v2758_v19, %v2746_v10  ;;  %v3132_v29 = vadd.f32 %v3131_v52, %v3130_v59  ;;  %v2986_v30 = vld [vmem:[%s9852_s12 + $0x18] sm:$0xff] }
 0x308   : > { %3282 = vmatpush.msrb.mxu2 %v3029_v37  ;;  %3302 = vmatpush.msrb.mxu3 %v3045_v38  ;;  %v3136_v26 = vadd.f32 %v3135_v16, %v8890_v20  ;;  %v3195_v16 = vrot.slane %v3194_v55, 1  ;;  %v3034_v52 = vld [vmem:[%s9852_s12 + $0x198] sm:$0xff] }
 0x309   : > { %3246 = vmatpush.msrb.mxu0 %v2993_v43  ;;  %3266 = vmatpush.msrb.mxu1 %v3009_v44  ;;  %v9024_v25 = vadd.f32 %v2771_v21, %v2759_v22  ;;  %v3037_v43 = vld [vmem:[%s9852_s12 + $0x1b0] sm:$0xff]  ;;  %v3189_v44 = vrot.slane %v3188_v14, 1  ;;  %v3133_v48 = vrot.slane %v3132_v29, 1 }
 0x30a   : > { %3283 = vmatpush.msrb.mxu2 %v3028_v32  ;;  %3303 = vmatpush.msrb.mxu3 %v3044_v15  ;;  %v3137_v58 = vrot.slane %v3136_v26, 2  ;;  %v2985_v32 = vld [vmem:[%s9852_s12 + $0x10] sm:$0xff] }
 0x30b   : > { %3247 = vmatpush.msrb.mxu0 %v2992_v17  ;;  %3267 = vmatpush.msrb.mxu1 %v3008_v47  ;;  %v3147_v37 = vrot.slane %v9024_v25, 4  ;;  %v3180_v38 = vmul.f32 %v9024_v25, %v9024_v25  ;;  %v3001_v15 = vld [vmem:[%s9852_s12 + $0x90] sm:$0xff]  ;;  %v3020_v47 = vld [vmem:[%s9852_s12 + $0x128] sm:$0xff]  ;;  %v3134_v7 = vadd.f32 %v3133_v48, %v3132_v29 }
 0x30c   : > { %3284 = vmatpush.msrb.mxu2 %v3027_v49  ;;  %3304 = vmatpush.msrb.mxu3 %v3043_v50  ;;  %v3138_v34 = vadd.f32 %v3137_v58, %v3136_v26  ;;  %v3036_v49 = vld [vmem:[%s9852_s12 + $0x1a8] sm:$0xff]  ;;  %v3062_v58 = vld [vmem:[%s9852_s12 + $0x278] sm:$0xff]  ;;  %v3033_v21 = vld [vmem:[%s9852_s12 + $0x190] sm:$0xff] }
 0x30d   : > { %3248 = vmatpush.msrb.mxu0 %v2991_v56  ;;  %3268 = vmatpush.msrb.mxu1 %v3007_v57  ;;  %v3148_v41 = vadd.f32 %v3147_v37, %v9024_v25  ;;  %v3203_v17 = vrot.slane %v3180_v38, 4  ;;  %v2984_v50 = vld [vmem:[%s9852_s12 + $0x8] sm:$0xff]  ;;  %v3059_v37 = vld [vmem:[%s9852_s12 + $0x260] sm:$0xff]  ;;  %v3073_v48 = vld [vmem:[%s9852_s12 + $0x2d0] sm:$0xff] }
 0x30e   : > { %3285 = vmatpush.msrb.mxu2 %v3026_v60  ;;  %3305 = vmatpush.msrb.mxu3 %v3042_v62  ;;  %v2760_v56 = vpop.f32.mrf.mxu2  ;;  %v2773_v57 = vpop.f32.mrf.mxu3  ;;  %v3139_v59 = vrot.slane %v3138_v34, 1  ;;  %v3200_v60 = vadd.f32 %v3199_v36, %v3198_v39 }
 0x30f   : > { %3249 = vmatpush.msrb.mxu0 %v2990_v1  ;;  %3269 = vmatpush.msrb.mxu1 %v3006_v61  ;;  %v3149_v62 = vrot.slane %v3148_v41, 2  ;;  %v3204_v26 = vadd.f32 %v3203_v17, %v3180_v38  ;;  %v3190_v1 = vadd.f32 %v3189_v44, %v3188_v14  ;;  %v3035_v61 = vld [vmem:[%s9852_s12 + $0x1a0] sm:$0xff]  ;;  %v3076_v44 = vld [vmem:[%s9852_s12 + $0x2e8] sm:$0xff]  ;;  %v3074_v17 = vld [vmem:[%s9852_s12 + $0x2d8] sm:$0xff] }
 0x310   : > { %3286 = vmatpush.msrb.mxu2 %v3025_v4  ;;  %3306 = vmatpush.msrb.mxu3 %v3041_v5  ;;  %v3196_v4 = vadd.f32 %v3195_v16, %v3194_v55  ;;  %v3144_v5 = vadd.f32 %v3143_v45, %v3142_v24  ;;  %v3140_v51 = vadd.f32 %v3139_v59, %v3138_v34  ;;  %v3201_v10 = vrot.slane %v3200_v60, 1  ;;  %v3032_v24 = vld [vmem:[%s9852_s12 + $0x188] sm:$0xff]  ;;  %v3031_v34 = vld [vmem:[%s9852_s12 + $0x180] sm:$0xff]  ;;  %v3057_v45 = vld [vmem:[%s9852_s12 + $0x250] sm:$0xff] }
 0x311   : > { %3250 = vmatpush.msrb.mxu0 %v2989_v8  ;;  %3270 = vmatpush.msrb.mxu1 %v3005_v9  ;;  %v3150_v8 = vadd.f32 %v3149_v62, %v3148_v41  ;;  %v3205_v9 = vrot.slane %v3204_v26, 2  ;;  %v3053_v59 = vld [vmem:[%s9852_s12 + $0x230] sm:$0xff]  ;;  %v3052_v62 = vld [vmem:[%s9852_s12 + $0x228] sm:$0xff] }
 0x312   : > { %3287 = vmatpush.msrb.mxu2 %v3024_v11  ;;  %3307 = vmatpush.msrb.mxu3 %v3040_v12  ;;  %v3233_v11 = vsel %vm797_vm1, %v3134_v7, %v3190_v1  ;;  %v3017_v12 = vld [vmem:[%s9852_s12 + $0x110] sm:$0xff]  ;;  %v3145_v19 = vrot.slane %v3144_v5, 1  ;;  %v3202_v14 = vadd.f32 %v3201_v10, %v3200_v60 }
 0x313   : > { %3251 = vmatpush.msrb.mxu0 %v2988_v13  ;;  %3271 = vmatpush.msrb.mxu1 %v3004_v18  ;;  %v3151_v39 = vrot.slane %v3150_v8, 1  ;;  %v3206_v13 = vadd.f32 %v3205_v9, %v3204_v26  ;;  %v3234_v18 = vsel %vm797_vm1, %v3140_v51, %v3196_v4  ;;  %v3072_v26 = vld [vmem:[%s9852_s12 + $0x2c8] sm:$0xff]  ;;  %v3069_v7 = vld [vmem:[%s9852_s12 + $0x2b0] sm:$0xff] }
 0x314   : > { %3288 = vmatpush.msrb.mxu2 %v3023_v40  ;;  %3308 = vmatpush.msrb.mxu3 %v3039_v23  ;;  %v3016_v40 = vld [vmem:[%s9852_s12 + $0x108] sm:$0xff]  ;;  %v3061_v23 = vld [vmem:[%s9852_s12 + $0x270] sm:$0xff]  ;;  %v3146_v29 = vadd.f32 %v3145_v19, %v3144_v5  ;;  %v3050_v5 = vld [vmem:[%s9852_s12 + $0x218] sm:$0xff] }
 0x315   : > { %3252 = vmatpush.msrb.mxu0 %v2987_v63  ;;  %3272 = vmatpush.msrb.mxu1 %v3003_v54  ;;  %v3207_v22 = vrot.slane %v3206_v13, 1  ;;  %v3015_v63 = vld [vmem:[%s9852_s12 + $0x100] sm:$0xff]  ;;  %v3152_v54 = vadd.f32 %v3151_v39, %v3150_v8  ;;  %v3049_v10 = vld [vmem:[%s9852_s12 + $0x210] sm:$0xff] }
 0x316   : > { %3289 = vmatpush.msrb.mxu2 %v3022_v0  ;;  %3309 = vmatpush.msrb.mxu3 %v3038_v27  ;;  %v3060_v0 = vld [vmem:[%s9852_s12 + $0x268] sm:$0xff]  ;;  %v3078_v27 = vld [vmem:[%s9852_s12 + $0x2f8] sm:$0xff]  ;;  %v3235_v38 = vsel %vm797_vm1, %v3146_v29, %v3202_v14 }
 0x317   : > { %3253 = vmatpush.msrb.mxu0 %v2986_v30  ;;  %3273 = vmatpush.msrb.mxu1 %v3002_v33  ;;  %v3208_v55 = vadd.f32 %v3207_v22, %v3206_v13  ;;  %v3067_v13 = vld [vmem:[%s9852_s12 + $0x2a0] sm:$0xff] }
 0x318   : > { %3290 = vmatpush.msrb.mxu2 %v3021_v42  ;;  %3310 = vmatpush.msrb.mxu3 %v3037_v43  ;;  %v3077_v42 = vld [vmem:[%s9852_s12 + $0x2f0] sm:$0xff]  ;;  %v3058_v43 = vld [vmem:[%s9852_s12 + $0x258] sm:$0xff] }
 0x319   : > { %3254 = vmatpush.msrb.mxu0 %v2985_v32  ;;  %3274 = vmatpush.msrb.mxu1 %v3001_v15  ;;  %v3236_v36 = vsel %vm797_vm1, %v3152_v54, %v3208_v55  ;;  %v3075_v32 = vld [vmem:[%s9852_s12 + $0x2e0] sm:$0xff]  ;;  %v3056_v15 = vld [vmem:[%s9852_s12 + $0x248] sm:$0xff]  ;;  %v3094_v54 = vld [vmem:[%s9852_s12 + $0x378] sm:$0xff] }
 0x31a   : > { %3291 = vmatpush.msrb.mxu2 %v3020_v47  ;;  %3311 = vmatpush.msrb.mxu3 %v3036_v49  ;;  %v2784_v30 = vpop.f32.mrf.mxu0  ;;  %v2797_v33 = vpop.f32.mrf.mxu1  ;;  %v3055_v47 = vld [vmem:[%s9852_s12 + $0x240] sm:$0xff] }
 0x31b   : > { %3255 = vmatpush.msrb.mxu0 %v2984_v50  ;;  %3275 = vmatpush.msrb.mxu1 %v3000_v53  ;;  %v2798_v49 = vadd.f32 %v2797_v33, %v2784_v30  ;;  %v3054_v50 = vld [vmem:[%s9852_s12 + $0x238] sm:$0xff]  ;;  %v3063_v30 = vld [vmem:[%s9852_s12 + $0x280] sm:$0xff]  ;;  %v3092_v33 = vld [vmem:[%s9852_s12 + $0x368] sm:$0xff] }
 0x31c   : > { %3292 = vmatpush.msrb.mxu2 %v3019_v31  ;;  %3312 = vmatpush.msrb.mxu3 %v3035_v61  ;;  %v3051_v61 = vld [vmem:[%s9852_s12 + $0x220] sm:$0xff] }
 0x31d   : > { %3256 = vmatpush.msrb.mxu0 %v2983_v2  ;;  %3276 = vmatpush.msrb.mxu1 %v2999_v3  ;;  %v3071_v2 = vld [vmem:[%s9852_s12 + $0x2c0] sm:$0xff] }
 0x31e   : > { %3293 = vmatpush.msrb.mxu2 %v3018_v6  ;;  %3257 = vmatmul.f32.vlgmr.msrb.gmra.mxu0 %v3233_v11  ;;  %v3070_v6 = vld [vmem:[%s9852_s12 + $0x2b8] sm:$0xff]  ;;  %v3068_v11 = vld [vmem:[%s9852_s12 + $0x2a8] sm:$0xff] }
 0x31f   : > { %3277 = vmatmul.f32.vlgmr.msrb.gmra.mxu1 %v3234_v18  ;;  %3313 = vmatpush.msrb.mxu3 %v3034_v52  ;;  %v3047_v18 = vld [vmem:[%s9852_s12 + $0x200] sm:$0xff] }
 0x320   : > { %3294 = vmatpush.msrb.mxu2 %v3017_v12  ;;  %3321 = vmatpush.msra.mxu0 %v3062_v58  ;;  %v3048_v12 = vld [vmem:[%s9852_s12 + $0x208] sm:$0xff] }
 0x321   : > { %3314 = vmatpush.msrb.mxu3 %v3033_v21  ;;  %3341 = vmatpush.msra.mxu1 %v3078_v27  ;;  %v3093_v27 = vld [vmem:[%s9852_s12 + $0x370] sm:$0xff] }
 0x322   : > { %3295 = vmatpush.msrb.mxu2 %v3016_v40  ;;  %3322 = vmatpush.msra.mxu0 %v3061_v23  ;;  %v2786_v16 = vpop.f32.mrf.mxu0  ;;  %v2799_v41 = vpop.f32.mrf.mxu1  ;;  %v3066_v40 = vld [vmem:[%s9852_s12 + $0x298] sm:$0xff]  ;;  %v3065_v23 = vld [vmem:[%s9852_s12 + $0x290] sm:$0xff] }
 0x323   : > { %3315 = vmatpush.msrb.mxu3 %v3032_v24  ;;  %3342 = vmatpush.msra.mxu1 %v3077_v42  ;;  %v3089_v42 = vld [vmem:[%s9852_s12 + $0x350] sm:$0xff]  ;;  %v3087_v41 = vld [vmem:[%s9852_s12 + $0x340] sm:$0xff] }
 0x324   : > { %3296 = vmatpush.msrb.mxu2 %v3015_v63  ;;  %3323 = vmatpush.msra.mxu0 %v3060_v0  ;;  %v3064_v63 = vld [vmem:[%s9852_s12 + $0x288] sm:$0xff] }
 0x325   : > { %3297 = vmatmul.f32.vlgmr.msrb.gmra.mxu2 %v3235_v38  ;;  %3316 = vmatpush.msrb.mxu3 %v3031_v34  ;;  %v3091_v34 = vld [vmem:[%s9852_s12 + $0x360] sm:$0xff] }
 0x326   : > { %3317 = vmatmul.f32.vlgmr.msrb.gmra.mxu3 %v3236_v36  ;;  %3324 = vmatpush.msra.mxu0 %v3059_v37  ;;  %v2810_v53 = vpop.f32.mrf.mxu2  ;;  %v2823_v56 = vpop.f32.mrf.mxu3  ;;  %v3090_v36 = vld [vmem:[%s9852_s12 + $0x358] sm:$0xff] }
 0x327   : > { %3343 = vmatpush.msra.mxu1 %v3076_v44  ;;  %v2811_v57 = vadd.f32 %v2810_v53, %v2798_v49  ;;  %3361 = vmatpush.msra.mxu2 %v3094_v54  ;;  %v3085_v53 = vld [vmem:[%s9852_s12 + $0x330] sm:$0xff] }
 0x328   : > { %3325 = vmatpush.msra.mxu0 %v3058_v43 }
 0x329   : > { %3344 = vmatpush.msra.mxu1 %v3075_v32  ;;  %v9151_v60 = vadd.f32 %v2823_v56, %v2811_v57  ;;  %3362 = vmatpush.msra.mxu2 %v3093_v27 }
 0x32a   : > { %3326 = vmatpush.msra.mxu0 %v3057_v45 }
 0x32b   : > { %3345 = vmatpush.msra.mxu1 %v3074_v17  ;;  %v3153_v31 = vrot.slane %v9151_v60, 4  ;;  %v3181_v1 = vmul.f32 %v9151_v60, %v9151_v60  ;;  %3363 = vmatpush.msra.mxu2 %v3092_v33 }
 0x32c   : > { %3327 = vmatpush.msra.mxu0 %v3056_v15  ;;  %v3088_v15 = vld [vmem:[%s9852_s12 + $0x348] sm:$0xff] }
 0x32d   : > { %3346 = vmatpush.msra.mxu1 %v3073_v48  ;;  %v3154_v3 = vadd.f32 %v3153_v31, %v9151_v60  ;;  %v3209_v4 = vrot.slane %v3181_v1, 4  ;;  %3364 = vmatpush.msra.mxu2 %v3091_v34  ;;  %v3086_v48 = vld [vmem:[%s9852_s12 + $0x338] sm:$0xff]  ;;  %v3083_v31 = vld [vmem:[%s9852_s12 + $0x320] sm:$0xff]  ;;  %v3101_v34 = vld [vmem:[%s9852_s12 + $0x3b0] sm:$0xff] }
 0x32e   : > { %3328 = vmatpush.msra.mxu0 %v3055_v47  ;;  %v2812_v8 = vpop.f32.mrf.mxu2  ;;  %v2825_v9 = vpop.f32.mrf.mxu3 }
 0x32f   : > { %3347 = vmatpush.msra.mxu1 %v3072_v26  ;;  %v3155_v51 = vrot.slane %v3154_v3, 2  ;;  %v3210_v52 = vadd.f32 %v3209_v4, %v3181_v1  ;;  %3365 = vmatpush.msra.mxu2 %v3090_v36  ;;  %v3080_v9 = vld [vmem:[%s9852_s12 + $0x308] sm:$0xff] }
 0x330   : > { %3329 = vmatpush.msra.mxu0 %v3054_v50 }
 0x331   : > { %3348 = vmatpush.msra.mxu1 %v3071_v2  ;;  %v3156_v58 = vadd.f32 %v3155_v51, %v3154_v3  ;;  %v3211_v39 = vrot.slane %v3210_v52, 2  ;;  %3366 = vmatpush.msra.mxu2 %v3089_v42  ;;  %v3082_v2 = vld [vmem:[%s9852_s12 + $0x318] sm:$0xff] }
 0x332   : > { %3330 = vmatpush.msra.mxu0 %v3053_v59  ;;  %v3084_v59 = vld [vmem:[%s9852_s12 + $0x328] sm:$0xff]  ;;  %v3110_v51 = vld [vmem:[%s9852_s12 + $0x3f8] sm:$0xff] }
 0x333   : > { %3349 = vmatpush.msra.mxu1 %v3070_v6  ;;  %v3157_v19 = vrot.slane %v3156_v58, 1  ;;  %v3212_v21 = vadd.f32 %v3211_v39, %v3210_v52  ;;  %3367 = vmatpush.msra.mxu2 %v3088_v15  ;;  %v3108_v39 = vld [vmem:[%s9852_s12 + $0x3e8] sm:$0xff]  ;;  %v3098_v15 = vld [vmem:[%s9852_s12 + $0x398] sm:$0xff] }
 0x334   : > { %3331 = vmatpush.msra.mxu0 %v3052_v62  ;;  %3381 = vmatpush.msra.mxu3 %v3110_v51 }
 0x335   : > { %3350 = vmatpush.msra.mxu1 %v3069_v7  ;;  %v3213_v22 = vrot.slane %v3212_v21, 1  ;;  %v3158_v14 = vadd.f32 %v3157_v19, %v3156_v58  ;;  %3368 = vmatpush.msra.mxu2 %v3087_v41  ;;  %v3105_v19 = vld [vmem:[%s9852_s12 + $0x3d0] sm:$0xff] }
 0x336   : > { %3332 = vmatpush.msra.mxu0 %v3051_v61 }
 0x337   : > { %3351 = vmatpush.msra.mxu1 %v3068_v11  ;;  %v3214_v24 = vadd.f32 %v3213_v22, %v3212_v21  ;;  %3369 = vmatpush.msra.mxu2 %v3086_v48  ;;  %v3079_v11 = vld [vmem:[%s9852_s12 + $0x300] sm:$0xff] }
 0x338   : > { %3333 = vmatpush.msra.mxu0 %v3050_v5  ;;  %v3081_v5 = vld [vmem:[%s9852_s12 + $0x310] sm:$0xff] }
 0x339   : > { %3352 = vmatpush.msra.mxu1 %v3067_v13  ;;  %v3237_v29 = vsel %vm797_vm1, %v3158_v14, %v3214_v24  ;;  %3370 = vmatpush.msra.mxu2 %v3085_v53  ;;  %v3107_v13 = vld [vmem:[%s9852_s12 + $0x3e0] sm:$0xff]  ;;  %v3096_v53 = vld [vmem:[%s9852_s12 + $0x388] sm:$0xff] }
 0x33a   : > { %3334 = vmatpush.msra.mxu0 %v3049_v10  ;;  %v2836_v55 = vpop.f32.mrf.mxu0  ;;  %v2849_v0 = vpop.f32.mrf.mxu1 }
 0x33b   : > { %3353 = vmatpush.msra.mxu1 %v3066_v40  ;;  %v2850_v43 = vadd.f32 %v2849_v0, %v2836_v55  ;;  %3371 = vmatpush.msra.mxu2 %v3084_v59  ;;  %v3103_v55 = vld [vmem:[%s9852_s12 + $0x3c0] sm:$0xff] }
 0x33c   : > { %3335 = vmatpush.msra.mxu0 %v3048_v12  ;;  %v3109_v12 = vld [vmem:[%s9852_s12 + $0x3f0] sm:$0xff] }
 0x33d   : > { %3354 = vmatpush.msra.mxu1 %v3065_v23  ;;  %3372 = vmatpush.msra.mxu2 %v3083_v31 }
 0x33e   : > { %3336 = vmatpush.msra.mxu0 %v3047_v18  ;;  %3382 = vmatpush.msra.mxu3 %v3109_v12  ;;  %v3106_v18 = vld [vmem:[%s9852_s12 + $0x3d8] sm:$0xff] }
 0x33f   : > { %3337 = vmatmul.f32.vlgmr.msra.gmra.mxu0 %v3237_v29  ;;  %3355 = vmatpush.msra.mxu1 %v3064_v63  ;;  %v3104_v63 = vld [vmem:[%s9852_s12 + $0x3c8] sm:$0xff]  ;;  %v3102_v29 = vld [vmem:[%s9852_s12 + $0x3b8] sm:$0xff] }
 0x340   : > { %3373 = vmatpush.msra.mxu2 %v3082_v2  ;;  %3383 = vmatpush.msra.mxu3 %v3108_v39 }
 0x341   : > { %3356 = vmatpush.msra.mxu1 %v3063_v30 }
 0x342   : > { %v2838_v37 = vpop.f32.mrf.mxu0  ;;  %v2851_v38 = vpop.f32.mrf.mxu1  ;;  %3374 = vmatpush.msra.mxu2 %v3081_v5  ;;  %3384 = vmatpush.msra.mxu3 %v3107_v13 }
 0x343   : > { %v3100_v38 = vld [vmem:[%s9852_s12 + $0x3a8] sm:$0xff] }
 0x344   : > { %3375 = vmatpush.msra.mxu2 %v3080_v9  ;;  %3385 = vmatpush.msra.mxu3 %v3106_v18 }
 0x346   : > { %v2862_v44 = vpop.f32.mrf.mxu2  ;;  %v2875_v45 = vpop.f32.mrf.mxu3  ;;  %3376 = vmatpush.msra.mxu2 %v3079_v11  ;;  %3386 = vmatpush.msra.mxu3 %v3105_v19 }
 0x347   : > { %v2863_v32 = vadd.f32 %v2862_v44, %v2850_v43  ;;  %v3099_v44 = vld [vmem:[%s9852_s12 + $0x3a0] sm:$0xff] }
 0x348   : > { %3387 = vmatpush.msra.mxu3 %v3104_v63 }
 0x349   : > { %v9227_v16 = vadd.f32 %v2875_v45, %v2863_v32 }
 0x34a   : > { %3388 = vmatpush.msra.mxu3 %v3103_v55 }
 0x34b   : > { %v3159_v17 = vrot.slane %v9227_v16, 4  ;;  %v3182_v47 = vmul.f32 %v9227_v16, %v9227_v16 }
 0x34c   : > { %3389 = vmatpush.msra.mxu3 %v3102_v29 }
 0x34d   : > { %v3160_v49 = vadd.f32 %v3159_v17, %v9227_v16  ;;  %v3215_v50 = vrot.slane %v3182_v47, 4 }
 0x34e   : > { %v2864_v56 = vpop.f32.mrf.mxu2  ;;  %v2877_v57 = vpop.f32.mrf.mxu3  ;;  %3390 = vmatpush.msra.mxu3 %v3101_v34 }
 0x34f   : > { %v3161_v62 = vrot.slane %v3160_v49, 2  ;;  %v3216_v26 = vadd.f32 %v3215_v50, %v3182_v47  ;;  %v3097_v47 = vld [vmem:[%s9852_s12 + $0x390] sm:$0xff] }
 0x350   : > { %3391 = vmatpush.msra.mxu3 %v3100_v38 }
 0x351   : > { %v3162_v1 = vadd.f32 %v3161_v62, %v3160_v49  ;;  %v3217_v61 = vrot.slane %v3216_v26, 2  ;;  %v3095_v62 = vld [vmem:[%s9852_s12 + $0x380] sm:$0xff] }
 0x352   : > { %3392 = vmatpush.msra.mxu3 %v3099_v44 }
 0x353   : > { %v3163_v3 = vrot.slane %v3162_v1, 1  ;;  %v3218_v4 = vadd.f32 %v3217_v61, %v3216_v26 }
 0x354   : > { %3393 = vmatpush.msra.mxu3 %v3098_v15 }
 0x355   : > { %v3219_v6 = vrot.slane %v3218_v4, 1  ;;  %v3164_v7 = vadd.f32 %v3163_v3, %v3162_v1 }
 0x356   : > { %3394 = vmatpush.msra.mxu3 %v3097_v47 }
 0x357   : > { %v3220_v8 = vadd.f32 %v3219_v6, %v3218_v4 }
 0x358   : > { %3395 = vmatpush.msra.mxu3 %v3096_v53  ;;  %v3119_v53 = vld [vmem:[#allocation16 + $0x40] sm:$0xff] }
 0x359   : > { %v3238_v58 = vsel %vm797_vm1, %v3164_v7, %v3220_v8  ;;  %3455 = vmatpush.msrb.mxu0 %v3119_v53  ;;  %v6668_v53 = vld [vmem:[%s8542_s6 + $0x138] sm:$0xf] }
 0x35a   : > { %v2888_v52 = vpop.f32.mrf.mxu0  ;;  %v2901_v10 = vpop.f32.mrf.mxu1  ;;  %3357 = vmatmul.f32.vlgmr.msra.gmra.mxu1 %v3238_v58  ;;  %3396 = vmatpush.msra.mxu3 %v3095_v62  ;;  %v3111_v62 = vld [vmem:[#allocation16] sm:$0xff] }
 0x35b   : > { %v2902_v22 = vadd.f32 %v2901_v10, %v2888_v52  ;;  %3456 = vmatpush.msrb.mxu0 %v3111_v62  ;;  %v6764_v62 = vld [vmem:[%s8542_s6 + $0x1f8] sm:$0xf] }
 0x362   : > { %v2890_v21 = vpop.f32.mrf.mxu0  ;;  %v2903_v40 = vpop.f32.mrf.mxu1 }
 0x363   : > { %v8309_v40 = vmov 128.0  }
 0x364   : > { %7891 = vrcp.f32 %v8309_v40 }
 0x366   : > { %v2914_v23 = vpop.f32.mrf.mxu2  ;;  %v2927_v14 = vpop.f32.mrf.mxu3 }
 0x367   : > { %v2915_v24 = vadd.f32 %v2914_v23, %v2902_v22 }
 0x369   : > { %v9282_v54 = vadd.f32 %v2927_v14, %v2915_v24 }
 0x36a   : > { %v7892_v22 = vpop.eup %7891 }
 0x36b   : > { %v3165_v0 = vrot.slane %v9282_v54, 4  ;;  %v3183_v27 = vmul.f32 %v9282_v54, %v9282_v54  ;;  %v3402_v14 = vmul.f32 128.0, %v7892_v22  ;;  %vm3406_vm8 = vweird.f32 %v7892_v22 }
 0x36d   : > { %v3166_v30 = vadd.f32 %v3165_v0, %v9282_v54  ;;  %v3221_v33 = vrot.slane %v3183_v27, 4  ;;  %v3403_v55 = vsub.f32 1.0, %v3402_v14 }
 0x36e   : > { %v2916_v36 = vpop.f32.mrf.mxu2  ;;  %v2929_v37 = vpop.f32.mrf.mxu3 }
 0x36f   : > { %v3167_v42 = vrot.slane %v3166_v30, 2  ;;  %v3222_v43 = vadd.f32 %v3221_v33, %v3183_v27  ;;  %v3404_v33 = vmul.f32 %v7892_v22, %v3403_v55  ;;  %v6788_v55 = vld [vmem:[%s8542_s6 + $0x228] sm:$0xf] }
 0x371   : > { %v3168_v45 = vadd.f32 %v3167_v42, %v3166_v30  ;;  %v3223_v32 = vrot.slane %v3222_v43, 2  ;;  %v3405_v42 = vadd.f32 %v7892_v22, %v3404_v33 }
 0x373   : > { %v3169_v41 = vrot.slane %v3168_v45, 1  ;;  %v3224_v17 = vadd.f32 %v3223_v32, %v3222_v43  ;;  %v3407_v32 = vsel %vm3406_vm8, %v7892_v22, %v3405_v42  ;;  %v6596_v22 = vld [vmem:[%s8542_s6 + $0xa8] sm:$0xf]  ;;  %v6680_v42 = vld [vmem:[%s8542_s6 + $0x150] sm:$0xf] }
 0x375   : > { %v3225_v48 = vrot.slane %v3224_v17, 1  ;;  %v3170_v49 = vadd.f32 %v3169_v41, %v3168_v45 }
 0x377   : > { %v3226_v50 = vadd.f32 %v3225_v48, %v3224_v17 }
 0x379   : > { %v3239_v59 = vsel %vm797_vm1, %v3170_v49, %v3226_v50 }
 0x37a   : > { %v2940_v56 = vpop.f32.mrf.mxu0  ;;  %v2953_v57 = vpop.f32.mrf.mxu1  ;;  %3377 = vmatmul.f32.vlgmr.msra.gmra.mxu2 %v3239_v59  ;;  %v3122_v59 = vld [vmem:[#allocation16 + $0x58] sm:$0xff] }
 0x37b   : > { %v2954_v1 = vadd.f32 %v2953_v57, %v2940_v56  ;;  %v3120_v56 = vld [vmem:[#allocation16 + $0x48] sm:$0xff]  ;;  %v3121_v57 = vld [vmem:[#allocation16 + $0x50] sm:$0xff]  ;;  %3515 = vmatpush.msrb.mxu3 %v3122_v59 }
 0x37c   : > { %3475 = vmatpush.msrb.mxu1 %v3120_v56  ;;  %3495 = vmatpush.msrb.mxu2 %v3121_v57  ;;  %v7582_v56 = vld [vmem:[%s8542_s6 + $0x140] sm:$0xf0] }
 0x382   : > { %v2942_v26 = vpop.f32.mrf.mxu0  ;;  %v2955_v31 = vpop.f32.mrf.mxu1 }
 0x383   : > { %v3112_v26 = vld [vmem:[#allocation16 + $0x8] sm:$0xff]  ;;  %v3113_v31 = vld [vmem:[#allocation16 + $0x10] sm:$0xff] }
 0x384   : > { %3476 = vmatpush.msrb.mxu1 %v3112_v26  ;;  %3496 = vmatpush.msrb.mxu2 %v3113_v31  ;;  %v7606_v26 = vld [vmem:[%s8542_s6 + $0x200] sm:$0xf0]  ;;  %v6860_v31 = vld [vmem:[%s8542_s6 + $0x2b8] sm:$0xf] }
 0x389   : > { %v2966_v61 = vpop.f32.mrf.mxu2  ;;  %v2979_v2 = vpop.f32.mrf.mxu3 }
 0x38a   : > { %v2967_v3 = vadd.f32 %v2966_v61, %v2954_v1  ;;  %v3114_v1 = vld [vmem:[#allocation16 + $0x18] sm:$0xff]  ;;  %v3123_v61 = vld [vmem:[#allocation16 + $0x60] sm:$0xff] }
 0x38b   : > { %3516 = vmatpush.msrb.mxu3 %v3114_v1  ;;  %3535 = vmatpush.msra.mxu0 %v3123_v61  ;;  %v7630_v1 = vld [vmem:[%s8542_s6 + $0x2c0] sm:$0xf0] }
 0x38c   : > { %v9316_v4 = vadd.f32 %v2979_v2, %v2967_v3  ;;  %v3124_v2 = vld [vmem:[#allocation16 + $0x68] sm:$0xff]  ;;  %v3125_v3 = vld [vmem:[#allocation16 + $0x70] sm:$0xff] }
 0x38d   : > { %3555 = vmatpush.msra.mxu1 %v3124_v2  ;;  %3575 = vmatpush.msra.mxu2 %v3125_v3  ;;  %v6669_v2 = vor.u32 %v7582_v56, %v6668_v53  ;;  %v6560_v3 = vld [vmem:[%s8542_s6 + $0x60] sm:$0xf]  ;;  %v7618_v53 = vld [vmem:[%s8542_s6 + $0x260] sm:$0xf0] }
 0x38e   : > { %v3171_v5 = vrot.slane %v9316_v4, 4  ;;  %v3184_v6 = vmul.f32 %v9316_v4, %v9316_v4  ;;  %v6512_v56 = vld [vmem:[%s8542_s6] sm:$0xf] }
 0x390   : > { %v3172_v7 = vadd.f32 %v3171_v5, %v9316_v4  ;;  %v3227_v8 = vrot.slane %v3184_v6, 4  ;;  %v3126_v5 = vld [vmem:[#allocation16 + $0x78] sm:$0xff] }
 0x391   : > { %v2968_v9 = vpop.f32.mrf.mxu2  ;;  %v2981_v51 = vpop.f32.mrf.mxu3 }
 0x392   : > { %v3173_v52 = vrot.slane %v3172_v7, 2  ;;  %v3228_v10 = vadd.f32 %v3227_v8, %v3184_v6  ;;  %v3115_v6 = vld [vmem:[#allocation16 + $0x20] sm:$0xff]  ;;  %v3117_v9 = vld [vmem:[#allocation16 + $0x30] sm:$0xff]  ;;  %v3118_v51 = vld [vmem:[#allocation16 + $0x38] sm:$0xff] }
 0x393   : > { %3536 = vmatpush.msra.mxu0 %v3115_v6  ;;  %3576 = vmatpush.msra.mxu2 %v3117_v9  ;;  %v6656_v6 = vld [vmem:[%s8542_s6 + $0x120] sm:$0xf]  ;;  %v6861_v9 = vor.u32 %v7630_v1, %v6860_v31  ;;  %v7567_v31 = vld [vmem:[%s8542_s6 + $0xc8] sm:$0xf0]  ;;  %v6980_v1 = vld [vmem:[%s8542_s6 + $0x3a8] sm:$0xf] }
 0x394   : > { %v3174_v11 = vadd.f32 %v3173_v52, %v3172_v7  ;;  %v3229_v12 = vrot.slane %v3228_v10, 2  ;;  %v3116_v7 = vld [vmem:[#allocation16 + $0x28] sm:$0xff] }
 0x395   : > { %3556 = vmatpush.msra.mxu1 %v3116_v7  ;;  %v7579_v7 = vld [vmem:[%s8542_s6 + $0x128] sm:$0xf0] }
 0x396   : > { %v3175_v58 = vrot.slane %v3174_v11, 1  ;;  %v3230_v39 = vadd.f32 %v3229_v12, %v3228_v10 }
 0x398   : > { %v3231_v13 = vrot.slane %v3230_v39, 1  ;;  %v3176_v18 = vadd.f32 %v3175_v58, %v3174_v11 }
 0x39a   : > { %v3232_v19 = vadd.f32 %v3231_v13, %v3230_v39  ;;  %v3127_v13 = vld [vmem:[#allocation13] sm:$0x1] }
 0x39b   : > { %v3258_v23 = vpop.f32.mrf.mxu0 }
 0x39c   : > { %v3240_v21 = vsel %vm797_vm1, %v3176_v18, %v3232_v19  ;;  %v3278_v24 = vpop.f32.mrf.mxu1 }
 0x39d   : > { %3397 = vmatmul.f32.vlgmr.msra.gmra.mxu3 %v3240_v21  ;;  %v3279_v0 = vadd.f32 %v3278_v24, %v3258_v23  ;;  %v3128_v21 = vld [vmem:[#allocation14] sm:$0x1]  ;;  %v7564_v23 = vld [vmem:[%s8542_s6 + $0xb0] sm:$0xf0]  ;;  %v6692_v24 = vld [vmem:[%s8542_s6 + $0x168] sm:$0xf] }
 0x39e   : > { %3595 = vmatpush.msra.mxu3 %v3126_v5  ;;  %v6597_v33 = vor.u32 %v7564_v23, %v6596_v22  ;;  %v7555_v5 = vld [vmem:[%s8542_s6 + $0x68] sm:$0xf0]  ;;  %v6740_v22 = vld [vmem:[%s8542_s6 + $0x1c8] sm:$0xf]  ;;  %v7600_v23 = vld [vmem:[%s8542_s6 + $0x1d0] sm:$0xf0] }
 0x3a0   : > { %3596 = vmatpush.msra.mxu3 %v3118_v51  ;;  %v6752_v51 = vld [vmem:[%s8542_s6 + $0x1e0] sm:$0xf] }
 0x3a8   : > { %v3298_v63 = vpop.f32.mrf.mxu2 }
 0x3a9   : > { %v3318_v27 = vpop.f32.mrf.mxu3  ;;  %v3299_v29 = vadd.f32 %v3298_v63, %v3279_v0  ;;  %v7588_v63 = vld [vmem:[%s8542_s6 + $0x170] sm:$0xf0] }
 0x3aa   : > { %v7612_v0 = vld [vmem:[%s8542_s6 + $0x230] sm:$0xf0] }
 0x3ab   : > { %v3319_v34 = vadd.f32 %v3318_v27, %v3299_v29  ;;  %v6884_v27 = vld [vmem:[%s8542_s6 + $0x2e8] sm:$0xf]  ;;  %v7636_v29 = vld [vmem:[%s8542_s6 + $0x2f0] sm:$0xf0] }
 0x3bc   : > { %v3338_v30 = vpop.f32.mrf.mxu0 }
 0x3bd   : > { %v3339_v37 = vadd.f32 %v3338_v30, %v3319_v34  ;;  %v6693_v34 = vor.u32 %v7588_v63, %v6692_v24  ;;  %v7624_v24 = vld [vmem:[%s8542_s6 + $0x290] sm:$0xf0] }
 0x3d7   : > { %v3358_v36 = vpop.f32.mrf.mxu1 }
 0x3d8   : > { %v3359_v43 = vadd.f32 %v3358_v36, %v3339_v37  ;;  %v6584_v36 = vld [vmem:[%s8542_s6 + $0x90] sm:$0xf]  ;;  %v7561_v37 = vld [vmem:[%s8542_s6 + $0x98] sm:$0xf0] }
 0x3fd   : > { %v3378_v38 = vpop.f32.mrf.mxu2 }
 0x3fe   : > { %v3379_v44 = vadd.f32 %v3378_v38, %v3359_v43  ;;  %v7585_v43 = vld [vmem:[%s8542_s6 + $0x158] sm:$0xf0] }
 0x420   : > { %v3398_v45 = vpop.f32.mrf.mxu3 }
 0x421   : > { %v3399_v15 = vadd.f32 %v3398_v45, %v3379_v44  ;;  %v6789_v44 = vor.u32 %v7612_v0, %v6788_v55  ;;  %v6885_v45 = vor.u32 %v7636_v29, %v6884_v27  ;;  %v6536_v0 = vld [vmem:[%s8542_s6 + $0x30] sm:$0xf]  ;;  %v7549_v27 = vld [vmem:[%s8542_s6 + $0x38] sm:$0xf0] }
 0x422   : > { %v6632_v29 = vld [vmem:[%s8542_s6 + $0xf0] sm:$0xf] }
 0x423   : > { %v3408_v41 = vmul.f32 %v3407_v32, %v3399_v15  ;;  %v6776_v32 = vld [vmem:[%s8542_s6 + $0x210] sm:$0xf]  ;;  %v7609_v15 = vld [vmem:[%s8542_s6 + $0x218] sm:$0xf0] }
 0x424   : > { %v6777_v57 = vor.u32 %v7609_v15, %v6776_v32  ;;  %v7546_v32 = vld [vmem:[%s8542_s6 + $0x20] sm:$0xf0]  ;;  %v6620_v15 = vld [vmem:[%s8542_s6 + $0xd8] sm:$0xf] }
 0x425   : > { %v3409_v17 = vmul.f32 %v3408_v41, %v3408_v41 }
 0x427   : > { %v3411_v47 = vrot.slane %v3409_v17, 7  ;;  %v7633_v17 = vld [vmem:[%s8542_s6 + $0x2d8] sm:$0xf0] }
 0x429   : > { %v3413_v48 = vsub.f32 %v3408_v41, %v3411_v47  ;;  %v6585_v47 = vor.u32 %v7561_v37, %v6584_v36  ;;  %v6728_v36 = vld [vmem:[%s8542_s6 + $0x1b0] sm:$0xf]  ;;  %v7597_v37 = vld [vmem:[%s8542_s6 + $0x1b8] sm:$0xf0] }
 0x42b   : > { %v3414_v49 = vmax.f32 %v3413_v48, 0.0  ;;  %v6681_v48 = vor.u32 %v7585_v43, %v6680_v42  ;;  %v7621_v42 = vld [vmem:[%s8542_s6 + $0x278] sm:$0xf0]  ;;  %v6537_v43 = vor.u32 %v7549_v27, %v6536_v0  ;;  %v7256_v27 = vld [vmem:[%s8542_s6 + $0x5d0] sm:$0xf] }
 0x42c   : > { %v7705_v0 = vld [vmem:[%s8542_s6 + $0x518] sm:$0xf0] }
 0x42d   : > { %v3415_v50 = vadd.f32 1e-05, %v3414_v49  ;;  %v6572_v49 = vld [vmem:[%s8542_s6 + $0x78] sm:$0xf] }
 0x42f   : > { %7893 = vrsqrt.f32 %v3415_v50  ;;  %vm3422_vm10 = vweird.f32 %v3415_v50 }
 0x435   : > { %v7894_v8 = vpop.eup %7893 }
 0x436   : > { %v3417_v52 = vmul.f32 %v7894_v8, %v3415_v50  ;;  %vm3423_vm9 = vweird.f32 %v7894_v8  ;;  %v7558_v50 = vld [vmem:[%s8542_s6 + $0x80] sm:$0xf0] }
 0x437   : > { %vm3424_vm11 = vmor %vm3422_vm10, %vm3423_vm9  ;;  %v6573_v61 = vor.u32 %v7558_v50, %v6572_v49  ;;  %v7594_v49 = vld [vmem:[%s8542_s6 + $0x1a0] sm:$0xf0]  ;;  %v6812_v50 = vld [vmem:[%s8542_s6 + $0x258] sm:$0xf] }
 0x438   : > { %v3418_v10 = vmul.f32 %v7894_v8, %v3417_v52  ;;  %v7603_v52 = vld [vmem:[%s8542_s6 + $0x1e8] sm:$0xf0] }
 0x43a   : > { %v3419_v11 = vmul.f32 0.5, %v3418_v10  ;;  %v6848_v10 = vld [vmem:[%s8542_s6 + $0x2a0] sm:$0xf] }
 0x43c   : > { %v3420_v12 = vsub.f32 1.5, %v3419_v11  ;;  %v7627_v11 = vld [vmem:[%s8542_s6 + $0x2a8] sm:$0xf0] }
 0x43e   : > { %v3421_v58 = vmul.f32 %v7894_v8, %v3420_v12  ;;  %v6561_v12 = vor.u32 %v7555_v5, %v6560_v3  ;;  %v6813_v5 = vor.u32 %v7618_v53, %v6812_v50  ;;  %v7675_v50 = vld [vmem:[%s8542_s6 + $0x428] sm:$0xf0] }
 0x440   : > { %v3425_v39 = vsel %vm3424_vm11, %v7894_v8, %v3421_v58  ;;  %v6765_v8 = vor.u32 %v7606_v26, %v6764_v62  ;;  %v6657_v58 = vor.u32 %v7579_v7, %v6656_v6  ;;  %v7543_v62 = vld [vmem:[%s8542_s6 + $0x8] sm:$0xf0]  ;;  %v6608_v26 = vld [vmem:[%s8542_s6 + $0xc0] sm:$0xf]  ;;  %v7684_v6 = vld [vmem:[%s8542_s6 + $0x470] sm:$0xf0] }
 0x441   : > { %3427 = vst [vmem:[#allocation1] sm:$0xff] %v3425_v39  ;;  %v6548_v39 = vld [vmem:[%s8542_s6 + $0x48] sm:$0xf]  ;;  %v6704_v7 = vld [vmem:[%s8542_s6 + $0x180] sm:$0xf] }
 0x448   : > { %v3429_v18 = vld [vmem:[#allocation1 + $0x1] ss:$9 sm:$0xff] }
 0x449   : > { %v3431_v19 = vmul.f32 %v3429_v18, %v3127_v13  ;;  %v7552_v13 = vld [vmem:[%s8542_s6 + $0x50] sm:$0xf0]  ;;  %v6644_v18 = vld [vmem:[%s8542_s6 + $0x108] sm:$0xf] }
 0x44a   : > { %v6549_v63 = vor.u32 %v7552_v13, %v6548_v39  ;;  %v7732_v39 = vld [vmem:[%s8542_s6 + $0x5f0] sm:$0xf0] }
 0x44b   : > { %v3432_v40 = vmul.f32 %v3431_v19, %v3408_v41  ;;  %v6872_v41 = vld [vmem:[%s8542_s6 + $0x2d0] sm:$0xf] }
 0x44c   : > { %v6873_v59 = vor.u32 %v7633_v17, %v6872_v41  ;;  %v7570_v41 = vld [vmem:[%s8542_s6 + $0xe0] sm:$0xf0]  ;;  %v6729_v17 = vor.u32 %v7597_v37, %v6728_v36  ;;  %v7052_v37 = vld [vmem:[%s8542_s6 + $0x438] sm:$0xf] }
 0x44d   : > { %v3433_v14 = vsub.f32 %v3128_v21, %v3432_v40  ;;  %v6753_v21 = vor.u32 %v7603_v52, %v6752_v51  ;;  %v6849_v40 = vor.u32 %v7627_v11, %v6848_v10  ;;  %v7615_v51 = vld [vmem:[%s8542_s6 + $0x248] sm:$0xf0]  ;;  %v7172_v52 = vld [vmem:[%s8542_s6 + $0x528] sm:$0xf]  ;;  %v6513_v10 = vor.u32 %v7543_v62, %v6512_v56  ;;  %v7654_v36 = vld [vmem:[%s8542_s6 + $0x380] sm:$0xf0] }
 0x44e   : > { %v6609_v11 = vor.u32 %v7567_v31, %v6608_v26  ;;  %v6932_v62 = vld [vmem:[%s8542_s6 + $0x348] sm:$0xf]  ;;  %v7648_v26 = vld [vmem:[%s8542_s6 + $0x350] sm:$0xf0] }
 0x44f   : > { %v3435_v30 = vperm.slane %v3433_v14, 0  ;;  %v6836_v14 = vld [vmem:[%s8542_s6 + $0x288] sm:$0xf] }
 0x450   : > { %v7028_v31 = vld [vmem:[%s8542_s6 + $0x408] sm:$0xf] }
 0x451   : > { %v3437_v38 = vsel %vm797_vm1, %v3431_v19, %v3435_v30  ;;  %v7576_v19 = vld [vmem:[%s8542_s6 + $0x110] sm:$0xf0]  ;;  %v7573_v30 = vld [vmem:[%s8542_s6 + $0xf8] sm:$0xf0] }
 0x452   : > { %6502 = vmatmul.msk.f32.vlgmr.msrb.gmra.mxu0 %vm607_vm0, %v3437_v38  ;;  %6503 = vmatmul.msk.f32.vlgmr.msrb.gmra.mxu1 %vm607_vm0, %v3437_v38  ;;  %v6645_v55 = vor.u32 %v7576_v19, %v6644_v18  ;;  %v6968_v19 = vld [vmem:[%s8542_s6 + $0x390] sm:$0xf] }
 0x453   : > { %6504 = vmatmul.msk.f32.vlgmr.msrb.gmra.mxu2 %vm607_vm0, %v3437_v38  ;;  %6505 = vmatmul.msk.f32.vlgmr.msrb.gmra.mxu3 %vm607_vm0, %v3437_v38 }
 0x454   : > { %4937 = vmatpush.bf16.msrb.mxu0 %v6597_v33  ;;  %4950 = vmatpush.bf16.msrb.mxu1 %v6693_v34  ;;  %v6741_v33 = vor.u32 %v7600_v23, %v6740_v22  ;;  %v6837_v34 = vor.u32 %v7624_v24, %v6836_v14  ;;  %v7681_v22 = vld [vmem:[%s8542_s6 + $0x458] sm:$0xf0] }
 0x455   : > { %4963 = vmatpush.bf16.msrb.mxu2 %v6789_v44  ;;  %4976 = vmatpush.bf16.msrb.mxu3 %v6885_v45  ;;  %v6633_v44 = vor.u32 %v7573_v30, %v6632_v29  ;;  %v6524_v45 = vld [vmem:[%s8542_s6 + $0x18] sm:$0xf]  ;;  %v7729_v29 = vld [vmem:[%s8542_s6 + $0x5d8] sm:$0xf0] }
 0x458   : > { %4938 = vmatpush.bf16.msrb.mxu0 %v6585_v47  ;;  %4951 = vmatpush.bf16.msrb.mxu1 %v6681_v48  ;;  %v6716_v48 = vld [vmem:[%s8542_s6 + $0x198] sm:$0xf] }
 0x459   : > { %4964 = vmatpush.bf16.msrb.mxu2 %v6777_v57  ;;  %4977 = vmatpush.bf16.msrb.mxu3 %v6873_v59  ;;  %v6525_v57 = vor.u32 %v7546_v32, %v6524_v45  ;;  %v6621_v59 = vor.u32 %v7570_v41, %v6620_v15  ;;  %v6717_v3 = vor.u32 %v7594_v49, %v6716_v48  ;;  %v7702_v45 = vld [vmem:[%s8542_s6 + $0x500] sm:$0xf0]  ;;  %v7244_v32 = vld [vmem:[%s8542_s6 + $0x5b8] sm:$0xf]  ;;  %v7651_v48 = vld [vmem:[%s8542_s6 + $0x368] sm:$0xf0] }
 0x45a   : > { %6506 = vmatmul.msk.f32.vlgmr.msra.gmra.mxu0 %vm607_vm0, %v3437_v38  ;;  %6507 = vmatmul.msk.f32.vlgmr.msra.gmra.mxu1 %vm607_vm0, %v3437_v38  ;;  %v7726_v15 = vld [vmem:[%s8542_s6 + $0x5c0] sm:$0xf0]  ;;  %v7040_v49 = vld [vmem:[%s8542_s6 + $0x420] sm:$0xf] }
 0x45b   : > { %6508 = vmatmul.msk.f32.vlgmr.msra.gmra.mxu2 %vm607_vm0, %v3437_v38  ;;  %6509 = vmatmul.msk.f32.vlgmr.msra.gmra.mxu3 %vm607_vm0, %v3437_v38  ;;  %v6824_v38 = vld [vmem:[%s8542_s6 + $0x270] sm:$0xf]  ;;  %v7245_v56 = vor.u32 %v7726_v15, %v7244_v32  ;;  %v7690_v32 = vld [vmem:[%s8542_s6 + $0x4a0] sm:$0xf0]  ;;  %v7196_v15 = vld [vmem:[%s8542_s6 + $0x558] sm:$0xf] }
 0x45c   : > { %4939 = vmatpush.bf16.msrb.mxu0 %v6573_v61  ;;  %4952 = vmatpush.bf16.msrb.mxu1 %v6669_v2  ;;  %v6825_v47 = vor.u32 %v7621_v42, %v6824_v38  ;;  %v7660_v61 = vld [vmem:[%s8542_s6 + $0x3b0] sm:$0xf0]  ;;  %v7076_v2 = vld [vmem:[%s8542_s6 + $0x468] sm:$0xf]  ;;  %v7678_v38 = vld [vmem:[%s8542_s6 + $0x440] sm:$0xf0] }
 0x45d   : > { %4965 = vmatpush.bf16.msrb.mxu2 %v6765_v8  ;;  %4978 = vmatpush.bf16.msrb.mxu3 %v6861_v9  ;;  %v7591_v8 = vld [vmem:[%s8542_s6 + $0x188] sm:$0xf0]  ;;  %v6800_v9 = vld [vmem:[%s8542_s6 + $0x240] sm:$0xf]  ;;  %v6981_v13 = vor.u32 %v7660_v61, %v6980_v1  ;;  %v7077_v18 = vor.u32 %v7684_v6, %v7076_v2  ;;  %v6933_v1 = vor.u32 %v7648_v26, %v6932_v62  ;;  %v7672_v61 = vld [vmem:[%s8542_s6 + $0x410] sm:$0xf0] }
 0x45e   : > { %v6705_v23 = vor.u32 %v7591_v8, %v6704_v7  ;;  %v6801_v14 = vor.u32 %v7615_v51, %v6800_v9  ;;  %v7029_v2 = vor.u32 %v7672_v61, %v7028_v31  ;;  %v7232_v6 = vld [vmem:[%s8542_s6 + $0x5a0] sm:$0xf]  ;;  %v7723_v8 = vld [vmem:[%s8542_s6 + $0x5a8] sm:$0xf0]  ;;  %v6920_v51 = vld [vmem:[%s8542_s6 + $0x330] sm:$0xf] }
 0x45f   : > { %v7233_v9 = vor.u32 %v7723_v8, %v7232_v6  ;;  %v6598_v8 = vld [vmem:[%s8542_s6 + $0xb4] sm:$0xf0] }
 0x460   : > { %4940 = vmatpush.bf16.msrb.mxu0 %v6561_v12  ;;  %4953 = vmatpush.bf16.msrb.mxu1 %v6657_v58  ;;  %v7708_v12 = vld [vmem:[%s8542_s6 + $0x530] sm:$0xf0]  ;;  %v7268_v58 = vld [vmem:[%s8542_s6 + $0x5e8] sm:$0xf] }
 0x461   : > { %4966 = vmatpush.bf16.msrb.mxu2 %v6753_v21  ;;  %4979 = vmatpush.bf16.msrb.mxu3 %v6849_v40  ;;  %v7657_v21 = vld [vmem:[%s8542_s6 + $0x398] sm:$0xf0]  ;;  %v7064_v40 = vld [vmem:[%s8542_s6 + $0x450] sm:$0xf]  ;;  %v7173_v24 = vor.u32 %v7708_v12, %v7172_v52 }
 0x462   : > { %v6969_v30 = vor.u32 %v7657_v21, %v6968_v19  ;;  %v7645_v52 = vld [vmem:[%s8542_s6 + $0x338] sm:$0xf0]  ;;  %v7720_v21 = vld [vmem:[%s8542_s6 + $0x590] sm:$0xf0] }
 0x463   : > { %v7669_v12 = vld [vmem:[%s8542_s6 + $0x3f8] sm:$0xf0] }
 0x464   : > { %4941 = vmatpush.bf16.msrb.mxu0 %v6549_v63  ;;  %4954 = vmatpush.bf16.msrb.mxu1 %v6645_v55  ;;  %v7269_v63 = vor.u32 %v7732_v39, %v7268_v58  ;;  %v7160_v55 = vld [vmem:[%s8542_s6 + $0x510] sm:$0xf]  ;;  %v7124_v39 = vld [vmem:[%s8542_s6 + $0x4c8] sm:$0xf] }
 0x465   : > { %4967 = vmatpush.bf16.msrb.mxu2 %v6741_v33  ;;  %4980 = vmatpush.bf16.msrb.mxu3 %v6837_v34  ;;  %v7065_v33 = vor.u32 %v7681_v22, %v7064_v40  ;;  %v6956_v34 = vld [vmem:[%s8542_s6 + $0x378] sm:$0xf]  ;;  %v7161_v42 = vor.u32 %v7705_v0, %v7160_v55  ;;  %v7112_v0 = vld [vmem:[%s8542_s6 + $0x4b0] sm:$0xf] }
 0x466   : > { %v6957_v41 = vor.u32 %v7654_v36, %v6956_v34  ;;  %v6908_v22 = vld [vmem:[%s8542_s6 + $0x318] sm:$0xf]  ;;  %v6896_v36 = vld [vmem:[%s8542_s6 + $0x300] sm:$0xf] }
 0x468   : > { %4942 = vmatpush.bf16.msrb.mxu0 %v6537_v43  ;;  %4955 = vmatpush.bf16.msrb.mxu1 %v6633_v44  ;;  %v7257_v43 = vor.u32 %v7729_v29, %v7256_v27  ;;  %v7148_v44 = vld [vmem:[%s8542_s6 + $0x4f8] sm:$0xf]  ;;  %v7693_v27 = vld [vmem:[%s8542_s6 + $0x4b8] sm:$0xf0]  ;;  %v7208_v29 = vld [vmem:[%s8542_s6 + $0x570] sm:$0xf] }
 0x469   : > { %4968 = vmatpush.bf16.msrb.mxu2 %v6729_v17  ;;  %4981 = vmatpush.bf16.msrb.mxu3 %v6825_v47  ;;  %v7053_v17 = vor.u32 %v7678_v38, %v7052_v37  ;;  %v6944_v47 = vld [vmem:[%s8542_s6 + $0x360] sm:$0xf]  ;;  %v7149_v53 = vor.u32 %v7702_v45, %v7148_v44  ;;  %v7639_v37 = vld [vmem:[%s8542_s6 + $0x308] sm:$0xf0]  ;;  %v7100_v45 = vld [vmem:[%s8542_s6 + $0x498] sm:$0xf] }
 0x46a   : > { %v6992_v38 = vld [vmem:[%s8542_s6 + $0x3c0] sm:$0xf] }
 0x46c   : > { %4943 = vmatpush.bf16.msrb.mxu0 %v6525_v57  ;;  %4956 = vmatpush.bf16.msrb.mxu1 %v6621_v59  ;;  %v6945_v57 = vor.u32 %v7651_v48, %v6944_v47  ;;  %v7041_v59 = vor.u32 %v7675_v50, %v7040_v49  ;;  %v7088_v48 = vld [vmem:[%s8542_s6 + $0x480] sm:$0xf]  ;;  %v7687_v49 = vld [vmem:[%s8542_s6 + $0x488] sm:$0xf0] }
 0x46d   : > { %4969 = vmatpush.bf16.msrb.mxu2 %v6717_v3  ;;  %4982 = vmatpush.bf16.msrb.mxu3 %v6813_v5  ;;  %v7136_v3 = vld [vmem:[%s8542_s6 + $0x4e0] sm:$0xf]  ;;  %v7699_v5 = vld [vmem:[%s8542_s6 + $0x4e8] sm:$0xf0]  ;;  %v7089_v50 = vor.u32 %v7687_v49, %v7088_v48  ;;  %v7557_v48 = vld [vmem:[%s8542_s6 + $0x7c] sm:$0xf] }
 0x46e   : > { %v7137_v7 = vor.u32 %v7699_v5, %v7136_v3  ;;  %v7563_v5 = vld [vmem:[%s8542_s6 + $0xac] sm:$0xf]  ;;  %v6574_v49 = vld [vmem:[%s8542_s6 + $0x84] sm:$0xf0] }
 0x470   : > { %4944 = vmatpush.bf16.msrb.mxu0 %v6513_v10  ;;  %4957 = vmatpush.bf16.msrb.mxu1 %v6609_v11  ;;  %v7016_v10 = vld [vmem:[%s8542_s6 + $0x3f0] sm:$0xf]  ;;  %v6921_v11 = vor.u32 %v7645_v52, %v6920_v51  ;;  %v6694_v51 = vld [vmem:[%s8542_s6 + $0x174] sm:$0xf0] }
 0x471   : > { %4970 = vmatpush.bf16.msrb.mxu2 %v6705_v23  ;;  %4983 = vmatpush.bf16.msrb.mxu3 %v6801_v14  ;;  %v7017_v58 = vor.u32 %v7669_v12, %v7016_v10  ;;  %v7642_v23 = vld [vmem:[%s8542_s6 + $0x320] sm:$0xf0]  ;;  %v7004_v14 = vld [vmem:[%s8542_s6 + $0x3d8] sm:$0xf] }
 0x474   : > { %4989 = vmatpush.bf16.msra.mxu0 %v6981_v13  ;;  %5002 = vmatpush.bf16.msra.mxu1 %v7077_v18  ;;  %v7696_v13 = vld [vmem:[%s8542_s6 + $0x4d0] sm:$0xf0]  ;;  %v7220_v18 = vld [vmem:[%s8542_s6 + $0x588] sm:$0xf] }
 0x475   : > { %5015 = vmatpush.bf16.msra.mxu2 %v7173_v24  ;;  %5028 = vmatpush.bf16.msra.mxu3 %v7269_v63  ;;  %v7125_v19 = vor.u32 %v7696_v13, %v7124_v39  ;;  %v7221_v40 = vor.u32 %v7720_v21, %v7220_v18  ;;  %v6909_v24 = vor.u32 %v7642_v23, %v6908_v22  ;;  %v7666_v63 = vld [vmem:[%s8542_s6 + $0x3e0] sm:$0xf0] }
 0x476   : > { %v7005_v55 = vor.u32 %v7666_v63, %v7004_v14  ;;  %v6601_v18 = vor.u32 %v7563_v5, %v6598_v8  ;;  %v7632_v8 = vld [vmem:[%s8542_s6 + $0x2d4] sm:$0xf] }
 0x478   : > { %4990 = vmatpush.bf16.msra.mxu0 %v6969_v30  ;;  %5003 = vmatpush.bf16.msra.mxu1 %v7065_v33  ;;  %v7113_v30 = vor.u32 %v7693_v27, %v7112_v0  ;;  %v7717_v33 = vld [vmem:[%s8542_s6 + $0x578] sm:$0xf0] }
 0x479   : > { %5016 = vmatpush.bf16.msra.mxu2 %v7161_v42  ;;  %5029 = vmatpush.bf16.msra.mxu3 %v7257_v43  ;;  %v7209_v34 = vor.u32 %v7717_v33, %v7208_v29  ;;  %v6897_v42 = vor.u32 %v7639_v37, %v6896_v36  ;;  %v7663_v43 = vld [vmem:[%s8542_s6 + $0x3c8] sm:$0xf0]  ;;  %v7560_v29 = vld [vmem:[%s8542_s6 + $0x94] sm:$0xf]  ;;  %v6682_v37 = vld [vmem:[%s8542_s6 + $0x15c] sm:$0xf0] }
 0x47a   : > { %v6993_v44 = vor.u32 %v7663_v43, %v6992_v38  ;;  %v7635_v43 = vld [vmem:[%s8542_s6 + $0x2ec] sm:$0xf] }
 0x47c   : > { %4991 = vmatpush.bf16.msra.mxu0 %v6957_v41  ;;  %5004 = vmatpush.bf16.msra.mxu1 %v7053_v17  ;;  %v7714_v41 = vld [vmem:[%s8542_s6 + $0x560] sm:$0xf0]  ;;  %v7101_v17 = vor.u32 %v7690_v32, %v7100_v45  ;;  %v6886_v32 = vld [vmem:[%s8542_s6 + $0x2f4] sm:$0xf0] }
 0x47d   : > { %5017 = vmatpush.bf16.msra.mxu2 %v7149_v53  ;;  %5030 = vmatpush.bf16.msra.mxu3 %v7245_v56  ;;  %v7197_v47 = vor.u32 %v7714_v41, %v7196_v15  ;;  %v7184_v53 = vld [vmem:[%s8542_s6 + $0x540] sm:$0xf]  ;;  %v7711_v56 = vld [vmem:[%s8542_s6 + $0x548] sm:$0xf0] }
 0x480   : > { %4992 = vmatpush.bf16.msra.mxu0 %v6945_v57  ;;  %5005 = vmatpush.bf16.msra.mxu1 %v7041_v59  ;;  %v7185_v57 = vor.u32 %v7711_v56, %v7184_v53 }
 0x481   : > { %5018 = vmatpush.bf16.msra.mxu2 %v7137_v7  ;;  %5031 = vmatpush.bf16.msra.mxu3 %v7233_v9  ;;  %v7587_v9 = vld [vmem:[%s8542_s6 + $0x16c] sm:$0xf] }
 0x484   : > { %4993 = vmatpush.bf16.msra.mxu0 %v6933_v1  ;;  %5006 = vmatpush.bf16.msra.mxu1 %v7029_v2 }
 0x485   : > { %5019 = vmatpush.bf16.msra.mxu2 %v7125_v19  ;;  %5032 = vmatpush.bf16.msra.mxu3 %v7221_v40  ;;  %v6697_v19 = vor.u32 %v7587_v9, %v6694_v51  ;;  %v6874_v9 = vld [vmem:[%s8542_s6 + $0x2dc] sm:$0xf0] }
 0x488   : > { %4994 = vmatpush.bf16.msra.mxu0 %v6921_v11  ;;  %5007 = vmatpush.bf16.msra.mxu1 %v7017_v58 }
 0x489   : > { %5020 = vmatpush.bf16.msra.mxu2 %v7113_v30  ;;  %5033 = vmatpush.bf16.msra.mxu3 %v7209_v34  ;;  %v6586_v30 = vld [vmem:[%s8542_s6 + $0x9c] sm:$0xf0] }
 0x48c   : > { %4995 = vmatpush.bf16.msra.mxu0 %v6909_v24  ;;  %5008 = vmatpush.bf16.msra.mxu1 %v7005_v55 }
 0x48d   : > { %5021 = vmatpush.bf16.msra.mxu2 %v7101_v17  ;;  %5034 = vmatpush.bf16.msra.mxu3 %v7197_v47 }
 0x490   : > { %4996 = vmatpush.bf16.msra.mxu0 %v6897_v42  ;;  %5009 = vmatpush.bf16.msra.mxu1 %v6993_v44  ;;  %v6790_v42 = vld [vmem:[%s8542_s6 + $0x234] sm:$0xf0] }
 0x491   : > { %5022 = vmatpush.bf16.msra.mxu2 %v7089_v50  ;;  %5035 = vmatpush.bf16.msra.mxu3 %v7185_v57 }
 0x4cf   : > { %v3458_v59 = vpop.f32.mrf.mxu0  ;;  %v3478_v62 = vpop.f32.mrf.mxu1 }
 0x4d0   : > { %v3601_v26 = vperm.slane %v3458_v59, 0  ;;  %v3602_v31 = vperm.slane %v3478_v62, 0  ;;  %v3617_v61 = vperm.slane %v3458_v59, 1  ;;  %v3618_v3 = vperm.slane %v3478_v62, 1  ;;  %v7581_v59 = vld [vmem:[%s8542_s6 + $0x13c] sm:$0xf] }
 0x4d1   : > { %v6670_v62 = vld [vmem:[%s8542_s6 + $0x144] sm:$0xf0] }
 0x4d2   : > { %v3609_v1 = vmul.f32 %v3601_v26, %v8881_v46  ;;  %v3610_v2 = vmul.f32 %v3602_v31, %v8890_v20 }
 0x4d4   : > { %v3625_v6 = vadd.f32 %v3617_v61, %v3609_v1  ;;  %v3626_v7 = vadd.f32 %v3618_v3, %v3610_v2  ;;  %v6889_v1 = vor.u32 %v7635_v43, %v6886_v32  ;;  %v7608_v61 = vld [vmem:[%s8542_s6 + $0x214] sm:$0xf]  ;;  %v7626_v43 = vld [vmem:[%s8542_s6 + $0x2a4] sm:$0xf] }
 0x4d6   : > { %v3633_v52 = vmax.f32 %v3625_v6, 0.0  ;;  %v3634_v10 = vmax.f32 %v3626_v7, 0.0  ;;  %v3498_v11 = vpop.f32.mrf.mxu2  ;;  %v3518_v12 = vpop.f32.mrf.mxu3  ;;  %v6577_v6 = vor.u32 %v7557_v48, %v6574_v49  ;;  %v6778_v7 = vld [vmem:[%s8542_s6 + $0x21c] sm:$0xf0] }
 0x4d7   : > { %v3603_v58 = vperm.slane %v3498_v11, 0  ;;  %v3604_v39 = vperm.slane %v3518_v12, 0  ;;  %v3538_v13 = vpop.f32.mrf.mxu0  ;;  %v3558_v46 = vpop.f32.mrf.mxu1  ;;  %v3619_v40 = vperm.slane %v3498_v11, 1  ;;  %v3620_v24 = vperm.slane %v3518_v12, 1  ;;  %v6562_v11 = vld [vmem:[%s8542_s6 + $0x6c] sm:$0xf0] }
 0x4d8   : > { %v3641_v20 = vmul.f32 %v8805_v35, %v3633_v52  ;;  %v3642_v21 = vmul.f32 %v8805_v35, %v3634_v10  ;;  %v3605_v22 = vperm.slane %v3538_v13, 0  ;;  %v3606_v63 = vperm.slane %v3558_v46, 0  ;;  %v7554_v10 = vld [vmem:[%s8542_s6 + $0x64] sm:$0xf] }
 0x4d9   : > { %v3611_v23 = vmul.f32 %v3603_v58, %v8919_v28  ;;  %v3612_v14 = vmul.f32 %v3604_v39, %v9024_v25  ;;  %v7584_v28 = vld [vmem:[%s8542_s6 + $0x154] sm:$0xf]  ;;  %v7611_v25 = vld [vmem:[%s8542_s6 + $0x22c] sm:$0xf]  ;;  %v3621_v38 = vperm.slane %v3538_v13, 1  ;;  %v3622_v45 = vperm.slane %v3558_v46, 1 }
 0x4da   : > { %v9470_v55 = vpack.c.bf16 %v3641_v20, %v3641_v20  ;;  %v9472_v0 = vpack.c.bf16 %v3642_v21, %v3642_v21  ;;  %v3613_v27 = vmul.f32 %v3605_v22, %v9151_v60  ;;  %v3614_v36 = vmul.f32 %v3606_v63, %v9227_v16  ;;  %v7578_v12 = vld [vmem:[%s8542_s6 + $0x124] sm:$0xf]  ;;  %v6658_v46 = vld [vmem:[%s8542_s6 + $0x12c] sm:$0xf0]  ;;  %v6766_v22 = vld [vmem:[%s8542_s6 + $0x204] sm:$0xf0] }
 0x4db   : > { %v3627_v33 = vadd.f32 %v3619_v40, %v3611_v23  ;;  %v3628_v34 = vadd.f32 %v3620_v24, %v3612_v14  ;;  %v6589_v16 = vor.u32 %v7560_v29, %v6586_v30  ;;  %v6685_v47 = vor.u32 %v7584_v28, %v6682_v37  ;;  %v7629_v23 = vld [vmem:[%s8542_s6 + $0x2bc] sm:$0xf]  ;;  %v6862_v14 = vld [vmem:[%s8542_s6 + $0x2c4] sm:$0xf0]  ;;  %v7551_v63 = vld [vmem:[%s8542_s6 + $0x4c] sm:$0xf] }
 0x4dc   : > { %4945 = vmatmul.bf16.vlgmr.msrb.gmra.mxu0 %v9470_v55  ;;  %4958 = vmatmul.bf16.vlgmr.msrb.gmra.mxu1 %v9472_v0  ;;  %v3629_v15 = vadd.f32 %v3621_v38, %v3613_v27  ;;  %v3630_v56 = vadd.f32 %v3622_v45, %v3614_v36  ;;  %v6793_v31 = vor.u32 %v7611_v25, %v6790_v42  ;;  %v6550_v30 = vld [vmem:[%s8542_s6 + $0x54] sm:$0xf0]  ;;  %v7602_v37 = vld [vmem:[%s8542_s6 + $0x1e4] sm:$0xf]  ;;  %v6754_v25 = vld [vmem:[%s8542_s6 + $0x1ec] sm:$0xf0] }
 0x4dd   : > { %v3635_v60 = vmax.f32 %v3627_v33, 0.0  ;;  %v3636_v44 = vmax.f32 %v3628_v34, 0.0  ;;  %5041 = vmatpush.bf16.msrb.mxu0 %v6601_v18  ;;  %5054 = vmatpush.bf16.msrb.mxu1 %v6697_v19  ;;  %v6673_v52 = vor.u32 %v7581_v59, %v6670_v62  ;;  %v6877_v18 = vor.u32 %v7632_v8, %v6874_v9  ;;  %v7605_v19 = vld [vmem:[%s8542_s6 + $0x1fc] sm:$0xf]  ;;  %v7575_v33 = vld [vmem:[%s8542_s6 + $0x10c] sm:$0xf] }
 0x4de   : > { %v3578_v41 = vpop.f32.mrf.mxu2  ;;  %v3598_v17 = vpop.f32.mrf.mxu3  ;;  %v3637_v58 = vmax.f32 %v3629_v15, 0.0  ;;  %v3638_v39 = vmax.f32 %v3630_v56, 0.0  ;;  %v6565_v40 = vor.u32 %v7554_v10, %v6562_v11  ;;  %v6661_v24 = vor.u32 %v7578_v12, %v6658_v46  ;;  %v6646_v34 = vld [vmem:[%s8542_s6 + $0x114] sm:$0xf0]  ;;  %v7623_v59 = vld [vmem:[%s8542_s6 + $0x28c] sm:$0xf] }
 0x4df   : > { %v3643_v50 = vmul.f32 %v8805_v35, %v3635_v60  ;;  %v3644_v53 = vmul.f32 %v8805_v35, %v3636_v44  ;;  %v3607_v57 = vperm.slane %v3578_v41, 0  ;;  %v3608_v26 = vperm.slane %v3598_v17, 0  ;;  %v6850_v60 = vld [vmem:[%s8542_s6 + $0x2ac] sm:$0xf0]  ;;  %v6838_v62 = vld [vmem:[%s8542_s6 + $0x294] sm:$0xf0] }
 0x4e0   : > { %v3623_v13 = vperm.slane %v3578_v41, 1  ;;  %v3645_v27 = vmul.f32 %v8805_v35, %v3637_v58  ;;  %v3646_v29 = vmul.f32 %v8805_v35, %v3638_v39  ;;  %v6769_v36 = vor.u32 %v7605_v19, %v6766_v22  ;;  %v6538_v41 = vld [vmem:[%s8542_s6 + $0x3c] sm:$0xf0]  ;;  %v7596_v8 = vld [vmem:[%s8542_s6 + $0x1b4] sm:$0xf] }
 0x4e1   : > { %v9493_v2 = vpack.c.bf16 %v3643_v50, %v3643_v50  ;;  %v9495_v3 = vpack.c.bf16 %v3644_v53, %v3644_v53  ;;  %v3615_v5 = vmul.f32 %v3607_v57, %v9282_v54  ;;  %5042 = vmatpush.bf16.msrb.mxu0 %v6589_v16  ;;  %v3616_v51 = vmul.f32 %v3608_v26, %v9316_v4  ;;  %v7548_v16 = vld [vmem:[%s8542_s6 + $0x34] sm:$0xf]  ;;  %v7599_v50 = vld [vmem:[%s8542_s6 + $0x1cc] sm:$0xf]  ;;  %v6742_v57 = vld [vmem:[%s8542_s6 + $0x1d4] sm:$0xf0] }
 0x4e2   : > { %5055 = vmatpush.bf16.msrb.mxu1 %v6685_v47  ;;  %v3624_v54 = vperm.slane %v3598_v17, 1  ;;  %v6781_v4 = vor.u32 %v7608_v61, %v6778_v7  ;;  %v6865_v28 = vor.u32 %v7629_v23, %v6862_v14  ;;  %v6553_v44 = vor.u32 %v7551_v63, %v6550_v30  ;;  %v7572_v17 = vld [vmem:[%s8542_s6 + $0xf4] sm:$0xf]  ;;  %v6634_v47 = vld [vmem:[%s8542_s6 + $0xfc] sm:$0xf0] }
 0x4e3   : > { %4971 = vmatmul.bf16.vlgmr.msrb.gmra.mxu2 %v9493_v2  ;;  %4984 = vmatmul.bf16.vlgmr.msrb.gmra.mxu3 %v9495_v3  ;;  %v3631_v20 = vadd.f32 %v3623_v13, %v3615_v5  ;;  %v6649_v45 = vor.u32 %v7575_v33, %v6646_v34  ;;  %v9523_v32 = vpack.c.bf16 %v3645_v27, %v3645_v27  ;;  %v6526_v61 = vld [vmem:[%s8542_s6 + $0x24] sm:$0xf0]  ;;  %v7569_v5 = vld [vmem:[%s8542_s6 + $0xdc] sm:$0xf]  ;;  %v7620_v10 = vld [vmem:[%s8542_s6 + $0x274] sm:$0xf] }
 0x4e4   : > { %5067 = vmatpush.bf16.msrb.mxu2 %v6793_v31  ;;  %5080 = vmatpush.bf16.msrb.mxu3 %v6889_v1  ;;  %v3632_v21 = vadd.f32 %v3624_v54, %v3616_v51  ;;  %v9525_v15 = vpack.c.bf16 %v3646_v29, %v3646_v29  ;;  %v6757_v48 = vor.u32 %v7602_v37, %v6754_v25  ;;  %v7545_v1 = vld [vmem:[%s8542_s6 + $0x1c] sm:$0xf]  ;;  %v6826_v11 = vld [vmem:[%s8542_s6 + $0x27c] sm:$0xf0]  ;;  %v7542_v39 = vld [vmem:[%s8542_s6 + $0x4] sm:$0xf] }
 0x4e5   : > { %5043 = vmatpush.bf16.msrb.mxu0 %v6577_v6  ;;  %v3639_v38 = vmax.f32 %v3631_v20, 0.0  ;;  %v6853_v49 = vor.u32 %v7626_v43, %v6850_v60  ;;  %v6541_v26 = vor.u32 %v7548_v16, %v6538_v41  ;;  %v6637_v31 = vor.u32 %v7572_v17, %v6634_v47  ;;  %v6514_v13 = vld [vmem:[%s8542_s6 + $0xc] sm:$0xf0]  ;;  %v7566_v54 = vld [vmem:[%s8542_s6 + $0xc4] sm:$0xf] }
 0x4e6   : > { %5056 = vmatpush.bf16.msrb.mxu1 %v6673_v52  ;;  %v3640_v42 = vmax.f32 %v3632_v21, 0.0  ;;  %v6745_v6 = vor.u32 %v7599_v50, %v6742_v57  ;;  %v6841_v7 = vor.u32 %v7623_v59, %v6838_v62  ;;  %v6730_v52 = vld [vmem:[%s8542_s6 + $0x1bc] sm:$0xf0]  ;;  %v6529_v12 = vor.u32 %v7545_v1, %v6526_v61  ;;  %v6610_v46 = vld [vmem:[%s8542_s6 + $0xcc] sm:$0xf0] }
 0x4e7   : > { %v3647_v53 = vmul.f32 %v8805_v35, %v3639_v38  ;;  %v6733_v19 = vor.u32 %v7596_v8, %v6730_v52  ;;  %v6829_v20 = vor.u32 %v7620_v10, %v6826_v11  ;;  %v7683_v21 = vld [vmem:[%s8542_s6 + $0x46c] sm:$0xf]  ;;  %v7593_v22 = vld [vmem:[%s8542_s6 + $0x19c] sm:$0xf]  ;;  %v6718_v23 = vld [vmem:[%s8542_s6 + $0x1a4] sm:$0xf0]  ;;  %v6517_v63 = vor.u32 %v7542_v39, %v6514_v13 }
 0x4e8   : > { %5068 = vmatpush.bf16.msrb.mxu2 %v6781_v4  ;;  %5081 = vmatpush.bf16.msrb.mxu3 %v6877_v18  ;;  %v3648_v56 = vmul.f32 %v8805_v35, %v3640_v42  ;;  %v6622_v35 = vld [vmem:[%s8542_s6 + $0xe4] sm:$0xf0]  ;;  %v7659_v4 = vld [vmem:[%s8542_s6 + $0x3ac] sm:$0xf]  ;;  %v6982_v18 = vld [vmem:[%s8542_s6 + $0x3b4] sm:$0xf0]  ;;  %v6613_v27 = vor.u32 %v7566_v54, %v6610_v46 }
 0x4e9   : > { %5044 = vmatpush.bf16.msrb.mxu0 %v6565_v40  ;;  %v9543_v9 = vpack.c.bf16 %v3647_v53, %v3647_v53  ;;  %v6625_v58 = vor.u32 %v7569_v5, %v6622_v35  ;;  %v7078_v40 = vld [vmem:[%s8542_s6 + $0x474] sm:$0xf0]  ;;  %v7617_v14 = vld [vmem:[%s8542_s6 + $0x25c] sm:$0xf]  ;;  %v6985_v29 = vor.u32 %v7659_v4, %v6982_v18  ;;  %v7656_v33 = vld [vmem:[%s8542_s6 + $0x394] sm:$0xf] }
 0x4ea   : > { %5057 = vmatpush.bf16.msrb.mxu1 %v6661_v24  ;;  %v9545_v51 = vpack.c.bf16 %v3648_v56, %v3648_v56  ;;  %v6814_v24 = vld [vmem:[%s8542_s6 + $0x264] sm:$0xf0]  ;;  %v7081_v30 = vor.u32 %v7683_v21, %v7078_v40  ;;  %v6970_v34 = vld [vmem:[%s8542_s6 + $0x39c] sm:$0xf0]  ;;  %v7590_v38 = vld [vmem:[%s8542_s6 + $0x184] sm:$0xf] }
 0x4eb   : > { %v6817_v37 = vor.u32 %v7617_v14, %v6814_v24  ;;  %v7066_v25 = vld [vmem:[%s8542_s6 + $0x45c] sm:$0xf0]  ;;  %v6706_v42 = vld [vmem:[%s8542_s6 + $0x18c] sm:$0xf0]  ;;  %v7614_v43 = vld [vmem:[%s8542_s6 + $0x244] sm:$0xf]  ;;  %v6973_v17 = vor.u32 %v7656_v33, %v6970_v34 }
 0x4ec   : > { %5069 = vmatpush.bf16.msrb.mxu2 %v6769_v36  ;;  %5082 = vmatpush.bf16.msrb.mxu3 %v6865_v28  ;;  %v7680_v36 = vld [vmem:[%s8542_s6 + $0x454] sm:$0xf]  ;;  %v6721_v28 = vor.u32 %v7593_v22, %v6718_v23  ;;  %v6802_v60 = vld [vmem:[%s8542_s6 + $0x24c] sm:$0xf0]  ;;  %v7731_v16 = vld [vmem:[%s8542_s6 + $0x5ec] sm:$0xf] }
 0x4ed   : > { %4997 = vmatmul.bf16.vlgmr.msra.gmra.mxu0 %v9523_v32  ;;  %5010 = vmatmul.bf16.vlgmr.msra.gmra.mxu1 %v9525_v15  ;;  %v7270_v41 = vld [vmem:[%s8542_s6 + $0x5f4] sm:$0xf0]  ;;  %v7069_v47 = vor.u32 %v7680_v36, %v7066_v25  ;;  %v6805_v50 = vor.u32 %v7614_v43, %v6802_v60  ;;  %v6958_v53 = vld [vmem:[%s8542_s6 + $0x384] sm:$0xf0]  ;;  %v7677_v56 = vld [vmem:[%s8542_s6 + $0x43c] sm:$0xf] }
 0x4ee   : > { %5045 = vmatpush.bf16.msrb.mxu0 %v6553_v44  ;;  %5058 = vmatpush.bf16.msrb.mxu1 %v6649_v45  ;;  %v7707_v44 = vld [vmem:[%s8542_s6 + $0x52c] sm:$0xf]  ;;  %v7174_v45 = vld [vmem:[%s8542_s6 + $0x534] sm:$0xf0]  ;;  %v7054_v57 = vld [vmem:[%s8542_s6 + $0x444] sm:$0xf0]  ;;  %v7273_v62 = vor.u32 %v7731_v16, %v7270_v41 }
 0x4ef   : > { %v7177_v59 = vor.u32 %v7707_v44, %v7174_v45  ;;  %v7728_v1 = vld [vmem:[%s8542_s6 + $0x5d4] sm:$0xf]  ;;  %v7258_v61 = vld [vmem:[%s8542_s6 + $0x5dc] sm:$0xf0]  ;;  %v7057_v35 = vor.u32 %v7677_v56, %v7054_v57  ;;  %v7674_v8 = vld [vmem:[%s8542_s6 + $0x424] sm:$0xf] }
 0x4f0   : > { %5070 = vmatpush.bf16.msrb.mxu2 %v6757_v48  ;;  %5083 = vmatpush.bf16.msrb.mxu3 %v6853_v49  ;;  %v7653_v48 = vld [vmem:[%s8542_s6 + $0x37c] sm:$0xf]  ;;  %v6709_v49 = vor.u32 %v7590_v38, %v6706_v42  ;;  %v7042_v52 = vld [vmem:[%s8542_s6 + $0x42c] sm:$0xf0]  ;;  %v7261_v11 = vor.u32 %v7728_v1, %v7258_v61  ;;  %v7246_v13 = vld [vmem:[%s8542_s6 + $0x5c4] sm:$0xf0] }
 0x4f1   : > { %v6961_v5 = vor.u32 %v7653_v48, %v6958_v53  ;;  %v7725_v39 = vld [vmem:[%s8542_s6 + $0x5bc] sm:$0xf]  ;;  %v7045_v46 = vor.u32 %v7674_v8, %v7042_v52  ;;  %v7647_v4 = vld [vmem:[%s8542_s6 + $0x34c] sm:$0xf]  ;;  %v6934_v18 = vld [vmem:[%s8542_s6 + $0x354] sm:$0xf0] }
 0x4f2   : > { %5046 = vmatpush.bf16.msrb.mxu0 %v6541_v26  ;;  %5059 = vmatpush.bf16.msrb.mxu1 %v6637_v31  ;;  %v7704_v26 = vld [vmem:[%s8542_s6 + $0x514] sm:$0xf]  ;;  %v7162_v31 = vld [vmem:[%s8542_s6 + $0x51c] sm:$0xf0]  ;;  %v7249_v40 = vor.u32 %v7725_v39, %v7246_v13  ;;  %v7698_v22 = vld [vmem:[%s8542_s6 + $0x4e4] sm:$0xf] }
 0x4f3   : > { %5023 = vmatmul.bf16.vlgmr.msra.gmra.mxu2 %v9543_v9  ;;  %5036 = vmatmul.bf16.vlgmr.msra.gmra.mxu3 %v9545_v51  ;;  %v7165_v10 = vor.u32 %v7704_v26, %v7162_v31  ;;  %v7138_v23 = vld [vmem:[%s8542_s6 + $0x4ec] sm:$0xf0]  ;;  %v7722_v14 = vld [vmem:[%s8542_s6 + $0x5a4] sm:$0xf]  ;;  %v7668_v33 = vld [vmem:[%s8542_s6 + $0x3f4] sm:$0xf] }
 0x4f4   : > { %5071 = vmatpush.bf16.msrb.mxu2 %v6745_v6  ;;  %5084 = vmatpush.bf16.msrb.mxu3 %v6841_v7  ;;  %v7650_v6 = vld [vmem:[%s8542_s6 + $0x364] sm:$0xf]  ;;  %v6946_v7 = vld [vmem:[%s8542_s6 + $0x36c] sm:$0xf0]  ;;  %v7018_v34 = vld [vmem:[%s8542_s6 + $0x3fc] sm:$0xf0]  ;;  %v7141_v36 = vor.u32 %v7698_v22, %v7138_v23 }
 0x4f5   : > { %v6949_v54 = vor.u32 %v7650_v6, %v6946_v7  ;;  %v7234_v24 = vld [vmem:[%s8542_s6 + $0x5ac] sm:$0xf0]  ;;  %v7126_v25 = vld [vmem:[%s8542_s6 + $0x4d4] sm:$0xf0]  ;;  %v7719_v38 = vld [vmem:[%s8542_s6 + $0x58c] sm:$0xf]  ;;  %v7021_v60 = vor.u32 %v7668_v33, %v7018_v34 }
 0x4f6   : > { %5047 = vmatpush.bf16.msrb.mxu0 %v6529_v12  ;;  %5060 = vmatpush.bf16.msrb.mxu1 %v6625_v58  ;;  %v7701_v12 = vld [vmem:[%s8542_s6 + $0x4fc] sm:$0xf]  ;;  %v7150_v58 = vld [vmem:[%s8542_s6 + $0x504] sm:$0xf0]  ;;  %v7222_v42 = vld [vmem:[%s8542_s6 + $0x594] sm:$0xf0] }
 0x4f7   : > { %v7153_v21 = vor.u32 %v7701_v12, %v7150_v58  ;;  %v7641_v44 = vld [vmem:[%s8542_s6 + $0x31c] sm:$0xf]  ;;  %v6910_v45 = vld [vmem:[%s8542_s6 + $0x324] sm:$0xf0]  ;;  %v7692_v48 = vld [vmem:[%s8542_s6 + $0x4b4] sm:$0xf] }
 0x4f8   : > { %5072 = vmatpush.bf16.msrb.mxu2 %v6733_v19  ;;  %5085 = vmatpush.bf16.msrb.mxu3 %v6829_v20  ;;  %v7671_v19 = vld [vmem:[%s8542_s6 + $0x40c] sm:$0xf]  ;;  %v7030_v20 = vld [vmem:[%s8542_s6 + $0x414] sm:$0xf0]  ;;  %v7665_v16 = vld [vmem:[%s8542_s6 + $0x3dc] sm:$0xf]  ;;  %v6913_v56 = vor.u32 %v7641_v44, %v6910_v45 }
 0x4f9   : > { %v7006_v41 = vld [vmem:[%s8542_s6 + $0x3e4] sm:$0xf0]  ;;  %v7210_v53 = vld [vmem:[%s8542_s6 + $0x57c] sm:$0xf0]  ;;  %v7662_v26 = vld [vmem:[%s8542_s6 + $0x3c4] sm:$0xf] }
 0x4fa   : > { %5048 = vmatpush.bf16.msrb.mxu0 %v6517_v63  ;;  %5061 = vmatpush.bf16.msrb.mxu1 %v6613_v27  ;;  %v6937_v63 = vor.u32 %v7647_v4, %v6934_v18  ;;  %v7033_v27 = vor.u32 %v7671_v19, %v7030_v20  ;;  %v7009_v57 = vor.u32 %v7665_v16, %v7006_v41  ;;  %v6994_v31 = vld [vmem:[%s8542_s6 + $0x3cc] sm:$0xf0]  ;;  %v7565_v61 = vld [vmem:[%s8542_s6 + $0xb8] sm:$0xf0]  ;;  %v7102_v52 = vld [vmem:[%s8542_s6 + $0x4a4] sm:$0xf0] }
 0x4fb   : > { %v6604_v1 = vld [vmem:[%s8542_s6 + $0xb0] sm:$0xf]  ;;  %v7589_v7 = vld [vmem:[%s8542_s6 + $0x178] sm:$0xf0]  ;;  %v6997_v58 = vor.u32 %v7662_v26, %v6994_v31  ;;  %v6688_v4 = vld [vmem:[%s8542_s6 + $0x158] sm:$0xf] }
 0x4fc   : > { %5073 = vmatpush.bf16.msrb.mxu2 %v6721_v28  ;;  %5086 = vmatpush.bf16.msrb.mxu3 %v6817_v37  ;;  %v7237_v28 = vor.u32 %v7722_v14, %v7234_v24  ;;  %v7695_v37 = vld [vmem:[%s8542_s6 + $0x4cc] sm:$0xf]  ;;  %v6700_v6 = vld [vmem:[%s8542_s6 + $0x170] sm:$0xf]  ;;  %v7689_v8 = vld [vmem:[%s8542_s6 + $0x49c] sm:$0xf]  ;;  %v6605_v39 = vor.u32 %v7565_v61, %v6604_v1 }
 0x4fd   : > { %5049 = vmatmul.bf16.vlgmr.msrb.gmra.mxu0 %v9470_v55  ;;  %5062 = vmatmul.bf16.vlgmr.msrb.gmra.mxu1 %v9472_v0  ;;  %v6701_v13 = vor.u32 %v7589_v7, %v6700_v6  ;;  %v7105_v18 = vor.u32 %v7689_v8, %v7102_v52  ;;  %v7586_v20 = vld [vmem:[%s8542_s6 + $0x160] sm:$0xf0]  ;;  %v7186_v23 = vld [vmem:[%s8542_s6 + $0x54c] sm:$0xf0]  ;;  %v7613_v24 = vld [vmem:[%s8542_s6 + $0x238] sm:$0xf0] }
 0x4fe   : > { %5093 = vmatpush.bf16.msra.mxu0 %v6985_v29  ;;  %5106 = vmatpush.bf16.msra.mxu1 %v7081_v30  ;;  %v7644_v29 = vld [vmem:[%s8542_s6 + $0x334] sm:$0xf]  ;;  %v6922_v30 = vld [vmem:[%s8542_s6 + $0x33c] sm:$0xf0]  ;;  %v7710_v22 = vld [vmem:[%s8542_s6 + $0x544] sm:$0xf] }
 0x4ff   : > { %v6925_v43 = vor.u32 %v7644_v29, %v6922_v30  ;;  %v6796_v14 = vld [vmem:[%s8542_s6 + $0x230] sm:$0xf]  ;;  %v6689_v30 = vor.u32 %v7586_v20, %v6688_v4  ;;  %v7189_v34 = vor.u32 %v7710_v22, %v7186_v23  ;;  %v6880_v44 = vld [vmem:[%s8542_s6 + $0x2d8] sm:$0xf]  ;;  %v7634_v45 = vld [vmem:[%s8542_s6 + $0x2e0] sm:$0xf0] }
 0x500   : > { %5074 = vmatpush.bf16.msrb.mxu2 %v6709_v49  ;;  %5087 = vmatpush.bf16.msrb.mxu3 %v6805_v50  ;;  %v7114_v49 = vld [vmem:[%s8542_s6 + $0x4bc] sm:$0xf0]  ;;  %v7716_v50 = vld [vmem:[%s8542_s6 + $0x574] sm:$0xf]  ;;  %v6556_v1 = vld [vmem:[%s8542_s6 + $0x50] sm:$0xf] }
 0x501   : > { %v7553_v61 = vld [vmem:[%s8542_s6 + $0x58] sm:$0xf0]  ;;  %v6652_v6 = vld [vmem:[%s8542_s6 + $0x110] sm:$0xf]  ;;  %v6760_v8 = vld [vmem:[%s8542_s6 + $0x1e8] sm:$0xf] }
 0x502   : > { %5094 = vmatpush.bf16.msra.mxu0 %v6973_v17  ;;  %5107 = vmatpush.bf16.msra.mxu1 %v7069_v47  ;;  %v7129_v17 = vor.u32 %v7695_v37, %v7126_v25  ;;  %v7225_v47 = vor.u32 %v7719_v38, %v7222_v42  ;;  %v6797_v37 = vor.u32 %v7613_v24, %v6796_v14  ;;  %v6676_v38 = vld [vmem:[%s8542_s6 + $0x140] sm:$0xf]  ;;  %v7583_v42 = vld [vmem:[%s8542_s6 + $0x148] sm:$0xf0]  ;;  %v7577_v7 = vld [vmem:[%s8542_s6 + $0x118] sm:$0xf0] }
 0x503   : > { %5075 = vmatmul.bf16.vlgmr.msrb.gmra.mxu2 %v9493_v2  ;;  %5088 = vmatmul.bf16.vlgmr.msrb.gmra.mxu3 %v9495_v3  ;;  %v6677_v41 = vor.u32 %v7583_v42, %v6676_v38  ;;  %v7604_v52 = vld [vmem:[%s8542_s6 + $0x1f0] sm:$0xf0]  ;;  %v6640_v4 = vld [vmem:[%s8542_s6 + $0xf8] sm:$0xf]  ;;  %v7601_v20 = vld [vmem:[%s8542_s6 + $0x1d8] sm:$0xf0] }
 0x504   : > { %5119 = vmatpush.bf16.msra.mxu2 %v7177_v59  ;;  %5132 = vmatpush.bf16.msra.mxu3 %v7273_v62  ;;  %v7638_v59 = vld [vmem:[%s8542_s6 + $0x304] sm:$0xf]  ;;  %v6898_v62 = vld [vmem:[%s8542_s6 + $0x30c] sm:$0xf0]  ;;  %v6532_v14 = vld [vmem:[%s8542_s6 + $0x20] sm:$0xf] }
 0x505   : > { %v6901_v12 = vor.u32 %v7638_v59, %v6898_v62  ;;  %v6868_v59 = vld [vmem:[%s8542_s6 + $0x2c0] sm:$0xf]  ;;  %v7631_v62 = vld [vmem:[%s8542_s6 + $0x2c8] sm:$0xf0]  ;;  %v6520_v38 = vld [vmem:[%s8542_s6 + $0x8] sm:$0xf] }
 0x506   : > { %5095 = vmatpush.bf16.msra.mxu0 %v6961_v5  ;;  %5108 = vmatpush.bf16.msra.mxu1 %v7057_v35  ;;  %v7117_v5 = vor.u32 %v7692_v48, %v7114_v49  ;;  %v7213_v35 = vor.u32 %v7716_v50, %v7210_v53  ;;  %v6881_v49 = vor.u32 %v7634_v45, %v6880_v44  ;;  %v6664_v50 = vld [vmem:[%s8542_s6 + $0x128] sm:$0xf]  ;;  %v7580_v53 = vld [vmem:[%s8542_s6 + $0x130] sm:$0xf0]  ;;  %v7547_v24 = vld [vmem:[%s8542_s6 + $0x28] sm:$0xf0] }
 0x507   : > { %v6665_v31 = vor.u32 %v7580_v53, %v6664_v50  ;;  %v7544_v42 = vld [vmem:[%s8542_s6 + $0x10] sm:$0xf0]  ;;  %v6820_v50 = vld [vmem:[%s8542_s6 + $0x260] sm:$0xf]  ;;  %v7619_v53 = vld [vmem:[%s8542_s6 + $0x268] sm:$0xf0] }
 0x508   : > { %5120 = vmatpush.bf16.msra.mxu2 %v7165_v10  ;;  %5133 = vmatpush.bf16.msra.mxu3 %v7261_v11  ;;  %v7713_v10 = vld [vmem:[%s8542_s6 + $0x55c] sm:$0xf]  ;;  %v7198_v11 = vld [vmem:[%s8542_s6 + $0x564] sm:$0xf0]  ;;  %v7568_v45 = vld [vmem:[%s8542_s6 + $0xd0] sm:$0xf0] }
 0x509   : > { %v7201_v19 = vor.u32 %v7713_v10, %v7198_v11  ;;  %v6856_v10 = vld [vmem:[%s8542_s6 + $0x2a8] sm:$0xf]  ;;  %v7628_v11 = vld [vmem:[%s8542_s6 + $0x2b0] sm:$0xf0] }
 0x50a   : > { %5096 = vmatpush.bf16.msra.mxu0 %v6949_v54  ;;  %5109 = vmatpush.bf16.msra.mxu1 %v7045_v46  ;;  %v6592_v54 = vld [vmem:[%s8542_s6 + $0x98] sm:$0xf]  ;;  %v7562_v46 = vld [vmem:[%s8542_s6 + $0xa0] sm:$0xf0] }
 0x50b   : > { %v6593_v29 = vor.u32 %v7562_v46, %v6592_v54  ;;  %v6761_v54 = vor.u32 %v7604_v52, %v6760_v8  ;;  %v6857_v46 = vor.u32 %v7628_v11, %v6856_v10  ;;  %v6808_v8 = vld [vmem:[%s8542_s6 + $0x248] sm:$0xf]  ;;  %v7616_v52 = vld [vmem:[%s8542_s6 + $0x250] sm:$0xf0]  ;;  %v7180_v10 = vld [vmem:[%s8542_s6 + $0x530] sm:$0xf] }
 0x50c   : > { %5121 = vmatpush.bf16.msra.mxu2 %v7153_v21  ;;  %5134 = vmatpush.bf16.msra.mxu3 %v7249_v40  ;;  %v7686_v21 = vld [vmem:[%s8542_s6 + $0x484] sm:$0xf]  ;;  %v7090_v40 = vld [vmem:[%s8542_s6 + $0x48c] sm:$0xf0]  ;;  %v7709_v11 = vld [vmem:[%s8542_s6 + $0x538] sm:$0xf0] }
 0x50d   : > { %v7093_v33 = vor.u32 %v7686_v21, %v7090_v40  ;;  %v6844_v21 = vld [vmem:[%s8542_s6 + $0x290] sm:$0xf]  ;;  %v7625_v40 = vld [vmem:[%s8542_s6 + $0x298] sm:$0xf0] }
 0x50e   : > { %5097 = vmatpush.bf16.msra.mxu0 %v6937_v63  ;;  %5110 = vmatpush.bf16.msra.mxu1 %v7033_v27  ;;  %v6892_v63 = vld [vmem:[%s8542_s6 + $0x2f0] sm:$0xf]  ;;  %v7637_v27 = vld [vmem:[%s8542_s6 + $0x2f8] sm:$0xf0] }
 0x50f   : > { %v6893_v25 = vor.u32 %v7637_v27, %v6892_v63  ;;  %v6845_v27 = vor.u32 %v7625_v40, %v6844_v21  ;;  %v7060_v21 = vld [vmem:[%s8542_s6 + $0x440] sm:$0xf]  ;;  %v7679_v40 = vld [vmem:[%s8542_s6 + $0x448] sm:$0xf0] }
 0x510   : > { %5122 = vmatpush.bf16.msra.mxu2 %v7141_v36  ;;  %5135 = vmatpush.bf16.msra.mxu3 %v7237_v28  ;;  %v6580_v36 = vld [vmem:[%s8542_s6 + $0x80] sm:$0xf]  ;;  %v7559_v28 = vld [vmem:[%s8542_s6 + $0x88] sm:$0xf0] }
 0x511   : > { %v6581_v16 = vor.u32 %v7559_v28, %v6580_v36  ;;  %v6832_v36 = vld [vmem:[%s8542_s6 + $0x278] sm:$0xf]  ;;  %v7622_v28 = vld [vmem:[%s8542_s6 + $0x280] sm:$0xf0] }
 0x512   : > { %5098 = vmatpush.bf16.msra.mxu0 %v6925_v43  ;;  %5111 = vmatpush.bf16.msra.mxu1 %v7021_v60  ;;  %v6784_v43 = vld [vmem:[%s8542_s6 + $0x218] sm:$0xf]  ;;  %v7610_v60 = vld [vmem:[%s8542_s6 + $0x220] sm:$0xf0]  ;;  %v6833_v44 = vor.u32 %v7622_v28, %v6832_v36  ;;  %v7156_v36 = vld [vmem:[%s8542_s6 + $0x500] sm:$0xf] }
 0x513   : > { %v6785_v48 = vor.u32 %v7610_v60, %v6784_v43  ;;  %v6616_v43 = vld [vmem:[%s8542_s6 + $0xc8] sm:$0xf]  ;;  %v7703_v28 = vld [vmem:[%s8542_s6 + $0x508] sm:$0xf0] }
 0x514   : > { %5123 = vmatpush.bf16.msra.mxu2 %v7129_v17  ;;  %5136 = vmatpush.bf16.msra.mxu3 %v7225_v47  ;;  %v6568_v17 = vld [vmem:[%s8542_s6 + $0x68] sm:$0xf]  ;;  %v7556_v47 = vld [vmem:[%s8542_s6 + $0x70] sm:$0xf0] }
 0x515   : > { %v6569_v26 = vor.u32 %v7556_v47, %v6568_v17  ;;  %v7084_v17 = vld [vmem:[%s8542_s6 + $0x470] sm:$0xf]  ;;  %v7685_v47 = vld [vmem:[%s8542_s6 + $0x478] sm:$0xf0] }
 0x516   : > { %5099 = vmatpush.bf16.msra.mxu0 %v6913_v56  ;;  %5112 = vmatpush.bf16.msra.mxu1 %v7009_v57  ;;  %v6772_v56 = vld [vmem:[%s8542_s6 + $0x200] sm:$0xf]  ;;  %v7607_v57 = vld [vmem:[%s8542_s6 + $0x208] sm:$0xf0] }
 0x518   : > { %5124 = vmatpush.bf16.msra.mxu2 %v7117_v5  ;;  %5137 = vmatpush.bf16.msra.mxu3 %v7213_v35  ;;  %v6773_v5 = vor.u32 %v7607_v57, %v6772_v56  ;;  %v6869_v35 = vor.u32 %v7631_v62, %v6868_v59  ;;  %v6521_v56 = vor.u32 %v7544_v42, %v6520_v38 }
 0x519   : > { %v6617_v57 = vor.u32 %v7568_v45, %v6616_v43  ;;  %v7085_v62 = vor.u32 %v7685_v47, %v7084_v17  ;;  %v6940_v43 = vld [vmem:[%s8542_s6 + $0x350] sm:$0xf]  ;;  %v7240_v17 = vld [vmem:[%s8542_s6 + $0x5a8] sm:$0xf]  ;;  %v7724_v47 = vld [vmem:[%s8542_s6 + $0x5b0] sm:$0xf0] }
 0x51a   : > { %5100 = vmatpush.bf16.msra.mxu0 %v6901_v12  ;;  %5113 = vmatpush.bf16.msra.mxu1 %v6997_v58  ;;  %v6557_v12 = vor.u32 %v7553_v61, %v6556_v1  ;;  %v6653_v58 = vor.u32 %v7577_v7, %v6652_v6  ;;  %v7072_v1 = vld [vmem:[%s8542_s6 + $0x458] sm:$0xf]  ;;  %v6712_v6 = vld [vmem:[%s8542_s6 + $0x188] sm:$0xf]  ;;  %v7592_v7 = vld [vmem:[%s8542_s6 + $0x190] sm:$0xf0] }
 0x51c   : > { %5125 = vmatpush.bf16.msra.mxu2 %v7105_v18  ;;  %5138 = vmatpush.bf16.msra.mxu3 %v7201_v19  ;;  %v7574_v18 = vld [vmem:[%s8542_s6 + $0x100] sm:$0xf0]  ;;  %v6748_v19 = vld [vmem:[%s8542_s6 + $0x1d0] sm:$0xf] }
 0x51d   : > { %5101 = vmatmul.bf16.vlgmr.msra.gmra.mxu0 %v9523_v32  ;;  %5114 = vmatmul.bf16.vlgmr.msra.gmra.mxu1 %v9525_v15  ;;  %v6641_v23 = vor.u32 %v7574_v18, %v6640_v4  ;;  %v6749_v63 = vor.u32 %v7601_v20, %v6748_v19  ;;  %v6964_v4 = vld [vmem:[%s8542_s6 + $0x380] sm:$0xf]  ;;  %v7655_v18 = vld [vmem:[%s8542_s6 + $0x388] sm:$0xf0]  ;;  %v7181_v19 = vor.u32 %v7709_v11, %v7180_v10 }
 0x51e   : > { %5145 = vmatpush.bf16.msrb.mxu0 %v6605_v39  ;;  %5158 = vmatpush.bf16.msrb.mxu1 %v6701_v13  ;;  %v6544_v39 = vld [vmem:[%s8542_s6 + $0x38] sm:$0xf]  ;;  %v7550_v13 = vld [vmem:[%s8542_s6 + $0x40] sm:$0xf0]  ;;  %v7012_v10 = vld [vmem:[%s8542_s6 + $0x3e0] sm:$0xf] }
 0x51f   : > { %v6545_v22 = vor.u32 %v7550_v13, %v6544_v39  ;;  %v7667_v11 = vld [vmem:[%s8542_s6 + $0x3e8] sm:$0xf0] }
 0x520   : > { %5126 = vmatpush.bf16.msra.mxu2 %v7093_v33  ;;  %5139 = vmatpush.bf16.msra.mxu3 %v7189_v34  ;;  %v6736_v33 = vld [vmem:[%s8542_s6 + $0x1b8] sm:$0xf]  ;;  %v7598_v34 = vld [vmem:[%s8542_s6 + $0x1c0] sm:$0xf0] }
 0x521   : > { %v6737_v60 = vor.u32 %v7598_v34, %v6736_v33  ;;  %v7048_v33 = vld [vmem:[%s8542_s6 + $0x428] sm:$0xf]  ;;  %v7676_v34 = vld [vmem:[%s8542_s6 + $0x430] sm:$0xf0] }
 0x522   : > { %5146 = vmatpush.bf16.msrb.mxu0 %v6593_v29  ;;  %5159 = vmatpush.bf16.msrb.mxu1 %v6689_v30  ;;  %v6628_v29 = vld [vmem:[%s8542_s6 + $0xe0] sm:$0xf]  ;;  %v7571_v30 = vld [vmem:[%s8542_s6 + $0xe8] sm:$0xf0]  ;;  %v7049_v42 = vor.u32 %v7676_v34, %v7048_v33  ;;  %v7192_v33 = vld [vmem:[%s8542_s6 + $0x548] sm:$0xf] }
 0x523   : > { %5127 = vmatmul.bf16.vlgmr.msra.gmra.mxu2 %v9543_v9  ;;  %5140 = vmatmul.bf16.vlgmr.msra.gmra.mxu3 %v9545_v51  ;;  %v7712_v34 = vld [vmem:[%s8542_s6 + $0x550] sm:$0xf0] }
 0x524   : > { %5171 = vmatpush.bf16.msrb.mxu2 %v6797_v37  ;;  %5184 = vmatpush.bf16.msrb.mxu3 %v6893_v25  ;;  %v6533_v37 = vor.u32 %v7547_v24, %v6532_v14  ;;  %v6629_v25 = vor.u32 %v7571_v30, %v6628_v29  ;;  %v7264_v14 = vld [vmem:[%s8542_s6 + $0x5d8] sm:$0xf]  ;;  %v7730_v24 = vld [vmem:[%s8542_s6 + $0x5e0] sm:$0xf0] }
 0x525   : > { %v7265_v30 = vor.u32 %v7730_v24, %v7264_v14  ;;  %v7204_v14 = vld [vmem:[%s8542_s6 + $0x560] sm:$0xf]  ;;  %v7715_v24 = vld [vmem:[%s8542_s6 + $0x568] sm:$0xf0] }
 0x526   : > { %5147 = vmatpush.bf16.msrb.mxu0 %v6581_v16  ;;  %5160 = vmatpush.bf16.msrb.mxu1 %v6677_v41  ;;  %v6988_v16 = vld [vmem:[%s8542_s6 + $0x3b0] sm:$0xf]  ;;  %v7661_v41 = vld [vmem:[%s8542_s6 + $0x3b8] sm:$0xf0] }
 0x527   : > { %v6989_v59 = vor.u32 %v7661_v41, %v6988_v16  ;;  %v7036_v16 = vld [vmem:[%s8542_s6 + $0x410] sm:$0xf]  ;;  %v7673_v41 = vld [vmem:[%s8542_s6 + $0x418] sm:$0xf0] }
 0x528   : > { %5172 = vmatpush.bf16.msrb.mxu2 %v6785_v48  ;;  %5185 = vmatpush.bf16.msrb.mxu3 %v6881_v49  ;;  %v6724_v48 = vld [vmem:[%s8542_s6 + $0x1a0] sm:$0xf]  ;;  %v7595_v49 = vld [vmem:[%s8542_s6 + $0x1a8] sm:$0xf0] }
 0x529   : > { %v6725_v61 = vor.u32 %v7595_v49, %v6724_v48  ;;  %v7037_v49 = vor.u32 %v7673_v41, %v7036_v16 }
 0x52a   : > { %5148 = vmatpush.bf16.msrb.mxu0 %v6569_v26  ;;  %5161 = vmatpush.bf16.msrb.mxu1 %v6665_v31  ;;  %v6976_v26 = vld [vmem:[%s8542_s6 + $0x398] sm:$0xf]  ;;  %v7658_v31 = vld [vmem:[%s8542_s6 + $0x3a0] sm:$0xf0] }
 0x52b   : > { %v6977_v39 = vor.u32 %v7658_v31, %v6976_v26  ;;  %v7132_v26 = vld [vmem:[%s8542_s6 + $0x4d0] sm:$0xf]  ;;  %v7697_v31 = vld [vmem:[%s8542_s6 + $0x4d8] sm:$0xf0] }
 0x52c   : > { %5173 = vmatpush.bf16.msrb.mxu2 %v6773_v5  ;;  %5186 = vmatpush.bf16.msrb.mxu3 %v6869_v35  ;;  %v6821_v5 = vor.u32 %v7619_v53, %v6820_v50  ;;  %v7682_v35 = vld [vmem:[%s8542_s6 + $0x460] sm:$0xf0]  ;;  %v6928_v50 = vld [vmem:[%s8542_s6 + $0x338] sm:$0xf] }
 0x52d   : > { %v7073_v13 = vor.u32 %v7682_v35, %v7072_v1  ;;  %v7646_v53 = vld [vmem:[%s8542_s6 + $0x340] sm:$0xf0]  ;;  %v7228_v1 = vld [vmem:[%s8542_s6 + $0x590] sm:$0xf] }
 0x52e   : > { %5149 = vmatpush.bf16.msrb.mxu0 %v6557_v12  ;;  %5162 = vmatpush.bf16.msrb.mxu1 %v6653_v58  ;;  %v7276_v12 = vld [vmem:[%s8542_s6 + $0x5f0] sm:$0xf]  ;;  %v7733_v58 = vld [vmem:[%s8542_s6 + $0x5f8] sm:$0xf0] }
 0x52f   : > { %v7277_v20 = vor.u32 %v7733_v58, %v7276_v12  ;;  %v7120_v12 = vld [vmem:[%s8542_s6 + $0x4b8] sm:$0xf]  ;;  %v7694_v58 = vld [vmem:[%s8542_s6 + $0x4c0] sm:$0xf0] }
 0x530   : > { %5174 = vmatpush.bf16.msrb.mxu2 %v6761_v54  ;;  %5187 = vmatpush.bf16.msrb.mxu3 %v6857_v46  ;;  %v6713_v54 = vor.u32 %v7592_v7, %v6712_v6  ;;  %v6809_v46 = vor.u32 %v7616_v52, %v6808_v8  ;;  %v6916_v6 = vld [vmem:[%s8542_s6 + $0x320] sm:$0xf]  ;;  %v7643_v7 = vld [vmem:[%s8542_s6 + $0x328] sm:$0xf0]  ;;  %v7133_v8 = vor.u32 %v7697_v31, %v7132_v26 }
 0x532   : > { %5150 = vmatpush.bf16.msrb.mxu0 %v6545_v22  ;;  %5163 = vmatpush.bf16.msrb.mxu1 %v6641_v23  ;;  %v7168_v22 = vld [vmem:[%s8542_s6 + $0x518] sm:$0xf]  ;;  %v7706_v23 = vld [vmem:[%s8542_s6 + $0x520] sm:$0xf0] }
 0x533   : > { %v7169_v29 = vor.u32 %v7706_v23, %v7168_v22  ;;  %v7108_v22 = vld [vmem:[%s8542_s6 + $0x4a0] sm:$0xf]  ;;  %v7691_v23 = vld [vmem:[%s8542_s6 + $0x4a8] sm:$0xf0] }
 0x534   : > { %5175 = vmatpush.bf16.msrb.mxu2 %v6749_v63  ;;  %5188 = vmatpush.bf16.msrb.mxu3 %v6845_v27  ;;  %v6952_v63 = vld [vmem:[%s8542_s6 + $0x368] sm:$0xf]  ;;  %v7652_v27 = vld [vmem:[%s8542_s6 + $0x370] sm:$0xf0] }
 0x535   : > { %v6953_v38 = vor.u32 %v7652_v27, %v6952_v63  ;;  %v7109_v63 = vor.u32 %v7691_v23, %v7108_v22  ;;  %v7205_v27 = vor.u32 %v7715_v24, %v7204_v14 }
 0x536   : > { %5151 = vmatpush.bf16.msrb.mxu0 %v6533_v37  ;;  %5164 = vmatpush.bf16.msrb.mxu1 %v6629_v25  ;;  %v7252_v37 = vld [vmem:[%s8542_s6 + $0x5c0] sm:$0xf]  ;;  %v7727_v25 = vld [vmem:[%s8542_s6 + $0x5c8] sm:$0xf0] }
 0x537   : > { %v7253_v45 = vor.u32 %v7727_v25, %v7252_v37 }
 0x538   : > { %5176 = vmatpush.bf16.msrb.mxu2 %v6737_v60  ;;  %5189 = vmatpush.bf16.msrb.mxu3 %v6833_v44  ;;  %v7649_v60 = vld [vmem:[%s8542_s6 + $0x358] sm:$0xf0]  ;;  %v7157_v44 = vor.u32 %v7703_v28, %v7156_v36  ;;  %v7193_v28 = vor.u32 %v7712_v34, %v7192_v33 }
 0x539   : > { %v6941_v48 = vor.u32 %v7649_v60, %v6940_v43 }
 0x53a   : > { %5152 = vmatpush.bf16.msrb.mxu0 %v6521_v56  ;;  %5165 = vmatpush.bf16.msrb.mxu1 %v6617_v57  ;;  %v7241_v57 = vor.u32 %v7724_v47, %v7240_v17 }
 0x53c   : > { %5177 = vmatpush.bf16.msrb.mxu2 %v6725_v61  ;;  %5190 = vmatpush.bf16.msrb.mxu3 %v6821_v5  ;;  %v7721_v61 = vld [vmem:[%s8542_s6 + $0x598] sm:$0xf0]  ;;  %v6929_v5 = vor.u32 %v7646_v53, %v6928_v50 }
 0x53d   : > { %5153 = vmatmul.bf16.vlgmr.msrb.gmra.mxu0 %v9470_v55  ;;  %5166 = vmatmul.bf16.vlgmr.msrb.gmra.mxu1 %v9472_v0  ;;  %v6965_v55 = vor.u32 %v7655_v18, %v6964_v4  ;;  %v7061_v0 = vor.u32 %v7679_v40, %v7060_v21  ;;  %v7229_v52 = vor.u32 %v7721_v61, %v7228_v1  ;;  %v6904_v4 = vld [vmem:[%s8542_s6 + $0x308] sm:$0xf]  ;;  %v7640_v18 = vld [vmem:[%s8542_s6 + $0x310] sm:$0xf0] }
 0x53e   : > { %5197 = vmatpush.bf16.msra.mxu0 %v6989_v59  ;;  %5210 = vmatpush.bf16.msra.mxu1 %v7085_v62  ;;  %v7024_v59 = vld [vmem:[%s8542_s6 + $0x3f8] sm:$0xf]  ;;  %v7670_v62 = vld [vmem:[%s8542_s6 + $0x400] sm:$0xf0]  ;;  %v7000_v21 = vld [vmem:[%s8542_s6 + $0x3c8] sm:$0xf] }
 0x53f   : > { %v7025_v35 = vor.u32 %v7670_v62, %v7024_v59  ;;  %v7664_v40 = vld [vmem:[%s8542_s6 + $0x3d0] sm:$0xf0] }
 0x540   : > { %5178 = vmatpush.bf16.msrb.mxu2 %v6713_v54  ;;  %5191 = vmatpush.bf16.msrb.mxu3 %v6809_v46  ;;  %v6917_v54 = vor.u32 %v7643_v7, %v6916_v6  ;;  %v7013_v46 = vor.u32 %v7667_v11, %v7012_v10 }
 0x542   : > { %5198 = vmatpush.bf16.msra.mxu0 %v6977_v39  ;;  %5211 = vmatpush.bf16.msra.mxu1 %v7073_v13  ;;  %v7216_v39 = vld [vmem:[%s8542_s6 + $0x578] sm:$0xf]  ;;  %v7718_v13 = vld [vmem:[%s8542_s6 + $0x580] sm:$0xf0] }
 0x543   : > { %5179 = vmatmul.bf16.vlgmr.msrb.gmra.mxu2 %v9493_v2  ;;  %5192 = vmatmul.bf16.vlgmr.msrb.gmra.mxu3 %v9495_v3  ;;  %v7144_v2 = vld [vmem:[%s8542_s6 + $0x4e8] sm:$0xf]  ;;  %v7700_v3 = vld [vmem:[%s8542_s6 + $0x4f0] sm:$0xf0] }
 0x544   : > { %5223 = vmatpush.bf16.msra.mxu2 %v7181_v19  ;;  %5236 = vmatpush.bf16.msra.mxu3 %v7277_v20  ;;  %v7145_v56 = vor.u32 %v7700_v3, %v7144_v2  ;;  %v7121_v19 = vor.u32 %v7694_v58, %v7120_v12  ;;  %v7217_v20 = vor.u32 %v7718_v13, %v7216_v39 }
 0x546   : > { %5199 = vmatpush.bf16.msra.mxu0 %v6965_v55  ;;  %5212 = vmatpush.bf16.msra.mxu1 %v7061_v0  ;;  %v6905_v55 = vor.u32 %v7640_v18, %v6904_v4  ;;  %v7001_v0 = vor.u32 %v7664_v40, %v7000_v21 }
 0x548   : > { %5224 = vmatpush.bf16.msra.mxu2 %v7169_v29  ;;  %5237 = vmatpush.bf16.msra.mxu3 %v7265_v30  ;;  %v7096_v29 = vld [vmem:[%s8542_s6 + $0x488] sm:$0xf]  ;;  %v7688_v30 = vld [vmem:[%s8542_s6 + $0x490] sm:$0xf0]  ;;  %s7737_s6 = smul.u32 24, %s8538_s0 }
 0x549   : > { %v7097_v36 = vor.u32 %v7688_v30, %v7096_v29 }
 0x54a   : > { %5200 = vmatpush.bf16.msra.mxu0 %v6953_v38  ;;  %5213 = vmatpush.bf16.msra.mxu1 %v7049_v42  ;;  %s9773_s2 = scalar_lea.vmem [#allocation19], %s7737_s6 }
 0x54b   : > { %s5269_s15 = sshll.u32 %s9773_s2, 4  ;;  %s5270_s15 = int_to_ptr.vmem [resolvable:$true] %s5269_s15 }
 0x54c   : > { %5225 = vmatpush.bf16.msra.mxu2 %v7157_v44  ;;  %5238 = vmatpush.bf16.msra.mxu3 %v7253_v45 }
 0x54e   : > { %5201 = vmatpush.bf16.msra.mxu0 %v6941_v48  ;;  %5214 = vmatpush.bf16.msra.mxu1 %v7037_v49 }
 0x550   : > { %5226 = vmatpush.bf16.msra.mxu2 %v7145_v56  ;;  %5239 = vmatpush.bf16.msra.mxu3 %v7241_v57 }
 0x552   : > { %5202 = vmatpush.bf16.msra.mxu0 %v6929_v5  ;;  %5215 = vmatpush.bf16.msra.mxu1 %v7025_v35 }
 0x554   : > { %5227 = vmatpush.bf16.msra.mxu2 %v7133_v8  ;;  %5240 = vmatpush.bf16.msra.mxu3 %v7229_v52 }
 0x556   : > { %5203 = vmatpush.bf16.msra.mxu0 %v6917_v54  ;;  %5216 = vmatpush.bf16.msra.mxu1 %v7013_v46 }
 0x558   : > { %5228 = vmatpush.bf16.msra.mxu2 %v7121_v19  ;;  %5241 = vmatpush.bf16.msra.mxu3 %v7217_v20 }
 0x559   : > { %v4946_v37 = vpop.f32.mrf.mxu0  ;;  %v4959_v25 = vpop.f32.mrf.mxu1 }
 0x55a   : > { %5204 = vmatpush.bf16.msra.mxu0 %v6905_v55  ;;  %5217 = vmatpush.bf16.msra.mxu1 %v7001_v0  ;;  %v4960_v44 = vadd.f32 %v4959_v25, %v4946_v37 }
 0x55c   : > { %5229 = vmatpush.bf16.msra.mxu2 %v7109_v63  ;;  %5242 = vmatpush.bf16.msra.mxu3 %v7205_v27 }
 0x55d   : > { %5205 = vmatmul.bf16.vlgmr.msra.gmra.mxu0 %v9523_v32  ;;  %5218 = vmatmul.bf16.vlgmr.msra.gmra.mxu1 %v9525_v15 }
 0x560   : > { %5230 = vmatpush.bf16.msra.mxu2 %v7097_v36  ;;  %5243 = vmatpush.bf16.msra.mxu3 %v7193_v28 }
 0x561   : > { %v4948_v38 = vpop.f32.mrf.mxu0  ;;  %v4961_v42 = vpop.f32.mrf.mxu1 }
 0x563   : > { %5231 = vmatmul.bf16.vlgmr.msra.gmra.mxu2 %v9543_v9  ;;  %5244 = vmatmul.bf16.vlgmr.msra.gmra.mxu3 %v9545_v51 }
 0x566   : > { %v4972_v43 = vpop.f32.mrf.mxu2  ;;  %v4985_v60 = vpop.f32.mrf.mxu3 }
 0x567   : > { %v4973_v45 = vadd.f32 %v4972_v43, %v4960_v44 }
 0x569   : > { %v4986_v32 = vadd.f32 %v4985_v60, %v4973_v45 }
 0x56a   : > { %v4998_v16 = vpop.f32.mrf.mxu0  ;;  %v5011_v41 = vpop.f32.mrf.mxu1 }
 0x56b   : > { %v4999_v3 = vadd.f32 %v4998_v16, %v4986_v32 }
 0x56d   : > { %v5012_v48 = vadd.f32 %v5011_v41, %v4999_v3 }
 0x56e   : > { %v4974_v2 = vpop.f32.mrf.mxu2  ;;  %v4987_v15 = vpop.f32.mrf.mxu3 }
 0x572   : > { %v5000_v17 = vpop.f32.mrf.mxu0  ;;  %v5013_v47 = vpop.f32.mrf.mxu1 }
 0x576   : > { %v5024_v49 = vpop.f32.mrf.mxu2  ;;  %v5037_v9 = vpop.f32.mrf.mxu3 }
 0x577   : > { %v5025_v50 = vadd.f32 %v5024_v49, %v5012_v48 }
 0x579   : > { %v5038_v51 = vadd.f32 %v5037_v9, %v5025_v50 }
 0x57a   : > { %v5050_v53 = vpop.f32.mrf.mxu0  ;;  %v5063_v56 = vpop.f32.mrf.mxu1 }
 0x57b   : > { %7895 = vtanh.f32 %v5038_v51  ;;  %v5064_v6 = vadd.f32 %v5063_v56, %v5050_v53 }
 0x57e   : > { %v5026_v57 = vpop.f32.mrf.mxu2  ;;  %v5039_v59 = vpop.f32.mrf.mxu3 }
 0x581   : > { %v7896_v62 = vpop.eup %7895 }
 0x582   : > { %v5052_v26 = vpop.f32.mrf.mxu0  ;;  %v5065_v31 = vpop.f32.mrf.mxu1  ;;  %5252 = vst [vmem:[%s9773_s2] sm:$0xff] %v7896_v62 }
 0x586   : > { %v5076_v1 = vpop.f32.mrf.mxu2  ;;  %v5089_v61 = vpop.f32.mrf.mxu3 }
 0x587   : > { %v5077_v52 = vadd.f32 %v5076_v1, %v5064_v6 }
 0x589   : > { %v5090_v10 = vadd.f32 %v5089_v61, %v5077_v52 }
 0x58e   : > { %v5078_v5 = vpop.f32.mrf.mxu2  ;;  %v5091_v35 = vpop.f32.mrf.mxu3 }
 0x59a   : > { %v5102_v7 = vpop.f32.mrf.mxu0  ;;  %v5115_v8 = vpop.f32.mrf.mxu1 }
 0x59b   : > { %v5103_v11 = vadd.f32 %v5102_v7, %v5090_v10 }
 0x59d   : > { %v5116_v39 = vadd.f32 %v5115_v8, %v5103_v11 }
 0x5a2   : > { %v5104_v12 = vpop.f32.mrf.mxu0  ;;  %v5117_v58 = vpop.f32.mrf.mxu1 }
 0x5a6   : > { %v5128_v13 = vpop.f32.mrf.mxu2  ;;  %v5141_v54 = vpop.f32.mrf.mxu3 }
 0x5a7   : > { %v5129_v46 = vadd.f32 %v5128_v13, %v5116_v39 }
 0x5a9   : > { %v5142_v4 = vadd.f32 %v5141_v54, %v5129_v46 }
 0x5ab   : > { %7897 = vtanh.f32 %v5142_v4 }
 0x5ae   : > { %v5130_v18 = vpop.f32.mrf.mxu2  ;;  %v5143_v19 = vpop.f32.mrf.mxu3 }
 0x5b1   : > { %v7898_v20 = vpop.eup %7897 }
 0x5b2   : > { %5253 = vst [vmem:[%s9773_s2 + $0x8] sm:$0xff] %v7898_v20 }
 0x5ba   : > { %v5154_v21 = vpop.f32.mrf.mxu0  ;;  %v5167_v40 = vpop.f32.mrf.mxu1 }
 0x5bb   : > { %v5168_v63 = vadd.f32 %v5167_v40, %v5154_v21 }
 0x5c2   : > { %v5156_v22 = vpop.f32.mrf.mxu0  ;;  %v5169_v23 = vpop.f32.mrf.mxu1 }
 0x5c6   : > { %v5180_v14 = vpop.f32.mrf.mxu2  ;;  %v5193_v24 = vpop.f32.mrf.mxu3 }
 0x5c7   : > { %v5181_v27 = vadd.f32 %v5180_v14, %v5168_v63 }
 0x5c9   : > { %v5194_v33 = vadd.f32 %v5193_v24, %v5181_v27 }
 0x5ce   : > { %v5182_v55 = vpop.f32.mrf.mxu2  ;;  %v5195_v0 = vpop.f32.mrf.mxu3 }
 0x5da   : > { %v5206_v29 = vpop.f32.mrf.mxu0  ;;  %v5219_v30 = vpop.f32.mrf.mxu1 }
 0x5db   : > { %v5207_v34 = vadd.f32 %v5206_v29, %v5194_v33 }
 0x5dd   : > { %v5220_v37 = vadd.f32 %v5219_v30, %v5207_v34 }
 0x5e2   : > { %v5208_v36 = vpop.f32.mrf.mxu0  ;;  %v5221_v28 = vpop.f32.mrf.mxu1 }
 0x5e6   : > { %v5232_v25 = vpop.f32.mrf.mxu2  ;;  %v5245_v38 = vpop.f32.mrf.mxu3 }
 0x5e7   : > { %v5233_v42 = vadd.f32 %v5232_v25, %v5220_v37 }
 0x5e9   : > { %v5246_v43 = vadd.f32 %v5245_v38, %v5233_v42 }
 0x5eb   : > { %7899 = vtanh.f32 %v5246_v43 }
 0x5ee   : > { %v5234_v60 = vpop.f32.mrf.mxu2  ;;  %v5247_v44 = vpop.f32.mrf.mxu3 }
 0x5f1   : > { %v7900_v45 = vpop.eup %7899 }
 0x5f2   : > { %5254 = vst [vmem:[%s9773_s2 + $0x10] sm:$0xff] %v7900_v45 }
 0x5f3   : > { %8228 = shalt.err (!%p8225_p9)
}
 0x5f4   : > { %7776 = dma.vmem_to_hbm [thread:$0]  (%p8487_p0), %s5270_s15, 384, %s5272_s27, %s5256_s18  }
 0x5f5 PF: > { %s5283_s0 = sand.u32 1, %s8275_s21   ;;  %p9854_p10 = scmp.ge.s32.totalorder %s8287_s24, 2 }
 0x5f6   : > { %s5284_s2 = scalar_lea.sflag [#allocation4], %s5283_s0 }
 0x5f7   : > { %p7811_p11 = pnand %p9854_p10, %p8493_p6 }
 0x5f9   : > { %p7812_p12 = pneg %p7811_p11 }
 0x5fb   : > { %8270 = dma.done.wait (%p7812_p12), %s5284_s2, 384  }
 0x5fc   : > { %8272 = vsyncadd (%p7812_p12), %s5284_s2, 4294966912  ;;  %p30_p2 = scmp.ge.s32.totalorder %s8467_s16, 4   ;;  %s9855_s21 = smov %s8279_s22 }
 0x5fd   : > { %s9856_s22 = smov %s8283_s23  ;;  %s9857_s23 = smov %s8479_s19 }
 0x5fe   : > { %s9858_s24 = smov %s8467_s16  ;;  %32 = sbr.rel (!%p30_p2) target bundleno = 20 (0x14), region = 152 }
 0x603   :  { %5290 = vsyncpa [#allocation3], 1 }
 0x604   :  { %5292 = vsyncpa [#allocation3 + $0x1], 1 }
 0x605   :  { %5293 = vsyncpa [#allocation6], 1 }
 0x606   :  { %5294 = vsyncpa [#allocation9], 1 }
 0x607   :  { %5295 = vsyncpa [#allocation12], 1 }
 0x608   :  { %5296 = vsyncpa [#allocation15], 1 }
 0x609   :  { %5297 = vsyncpa [#allocation18], 1 }
 0x60a   :  { %5299 = vsyncpa [#allocation18 + $0x1], 1 }
 0x60b   :  { %5300 = vsyncpa [#allocation4], 1 }
 0x60c   :  { %5302 = vsyncpa [#allocation4 + $0x1], 1 }

</bundles_post_ra>
